<compile_context>
chip_gen: v7x
topology: tpu7x:2x2x1
jax: 0.10.0
libtpu: 0.0.40
codegen_flags: <defaults>
</compile_context>

<pallas_src>
import functools
from dataclasses import dataclass

import jax
import jax.numpy as jnp
from jax import lax
from jax.experimental import pallas as pl
from jax.experimental.pallas import tpu as pltpu

LANE = 128  # pad feature dims to multiples of this (lane-dense outputs)


def _round_up(x, m):
    return ((x + m - 1) // m) * m


def _pad_to(x, shape):
    pads = [(0, s - d) for d, s in zip(x.shape, shape)]
    return jnp.pad(x, pads)


def _vmem_capacity_bytes():
    try:
        return int(pltpu.get_tpu_info().vmem_capacity_bytes)
    except Exception:
        return 64 << 20  # v7x floor — the most constrained generation


def _pick_tile_k(n_pad):
    # Lane dim of the A_hat block / sublane dim of the X k-tile: multiple of
    # 128, as large as divides n_pad (n_pad is rounded to 256 on this path).
    for t in (512, 384, 256, 128):
        if n_pad % t == 0:
            return t
    return 128


def _pick_tile_m(n_pad, cap=512):
    # Sublane dim of the A_hat / output blocks: only needs to be a multiple
    # of 8.  Prefer an even number of row tiles (balanced across v7x's 2
    # TensorCores on the "parallel" axis), then the largest tile <= cap.
    best, best_key = 8, (False, 8)
    for t in range(8, min(n_pad, cap) + 1, 8):
        if n_pad % t:
            continue
        rows = n_pad // t
        key = (rows % 2 == 0, t)
        if key > best_key:
            best, best_key = t, key
    return best


# ----------------------------------------------------------------------------
# Path A kernel: all layers fused, everything VMEM-resident, single invocation
# ----------------------------------------------------------------------------
def fused_gcn_kernel(a_ref, x_ref, w_ref, b_ref, o_ref, *, num_layers):
    a = a_ref[...]                       # bf16 [n_pad, n_pad]
    h = x_ref[...]                       # bf16 [n_pad, f_pad]
    for layer in range(num_layers):
        xw = jnp.dot(h, w_ref[layer], preferred_element_type=jnp.float32)
        h32 = jnp.dot(a, xw.astype(jnp.bfloat16),
                      preferred_element_type=jnp.float32)
        h32 = h32 + b_ref[layer]
        if layer < num_layers - 1:
            h = jnp.maximum(h32, 0.0).astype(jnp.bfloat16)
        else:
            h = h32                      # final layer stays f32
    o_ref[...] = h


def fused_gcn_forward(a_hat, x, w_stack, b_stack, *, vmem_limit):
    num_layers, _, f_pad = w_stack.shape
    n_pad = a_hat.shape[0]
    return pl.pallas_call(
        functools.partial(fused_gcn_kernel, num_layers=num_layers),
        out_shape=jax.ShapeDtypeStruct((n_pad, f_pad), jnp.float32),
        compiler_params=pltpu.CompilerParams(vmem_limit_bytes=vmem_limit),
    )(a_hat, x, w_stack, b_stack)


# ----------------------------------------------------------------------------
# Path B kernel: one GCN layer, tiled over (row "parallel", k "arbitrary"),
# XW fused in (X k-tile streamed, W resident), f32 accumulator scratch.
# ----------------------------------------------------------------------------
def gcn_layer_kernel(a_ref, x_ref, w_ref, b_ref, o_ref, acc_ref, *, apply_relu):
    k = pl.program_id(1)

    @pl.when(k == 0)
    def _():
        acc_ref[...] = jnp.zeros_like(acc_ref)

    # xw tile computed on the fly; recompute per row tile hides under the
    # HBM-bound A_hat stream.
    xw = jnp.dot(x_ref[...], w_ref[...], preferred_element_type=jnp.float32)
    acc_ref[...] += jnp.dot(a_ref[...], xw.astype(jnp.bfloat16),
                            preferred_element_type=jnp.float32)

    @pl.when(k == pl.num_programs(1) - 1)
    def _():
        h = acc_ref[...] + b_ref[...]
        if apply_relu:
            h = jnp.maximum(h, 0.0)
        o_ref[...] = h.astype(o_ref.dtype)


def gcn_layer_tiled(a_hat, h, w, b, *, apply_relu, out_dtype, tile_m, tile_k):
    n_pad = a_hat.shape[0]
    f_in, f_out = w.shape
    grid = (n_pad // tile_m, n_pad // tile_k)

    out_bytes = jnp.dtype(out_dtype).itemsize
    est = (2 * tile_m * tile_k * 2        # A_hat bf16 stream (double buffered)
           + 2 * tile_k * f_in * 2        # X k-tile bf16
           + 2 * f_in * f_out * 2         # resident W bf16
           + 2 * f_out * 4                # resident bias f32
           + 2 * tile_m * f_out * out_bytes   # output tile
           + tile_m * f_out * 4)          # f32 accumulator scratch
    vmem_cap = int(0.75 * _vmem_capacity_bytes())
    vmem_limit = int(min(max(2 * est + (8 << 20), 32 << 20), vmem_cap))

    return pl.pallas_call(
        functools.partial(gcn_layer_kernel, apply_relu=apply_relu),
        out_shape=jax.ShapeDtypeStruct((n_pad, f_out), out_dtype),
        grid_spec=pltpu.PrefetchScalarGridSpec(
            num_scalar_prefetch=0,
            grid=grid,
            in_specs=[
                pl.BlockSpec((tile_m, tile_k), lambda i, k: (i, k)),  # A_hat
                pl.BlockSpec((tile_k, f_in), lambda i, k: (k, 0)),    # X k-tile
                pl.BlockSpec((f_in, f_out), lambda i, k: (0, 0)),     # resident W
                pl.BlockSpec((1, f_out), lambda i, k: (0, 0)),        # resident b
            ],
            out_specs=pl.BlockSpec((tile_m, f_out), lambda i, k: (i, 0)),
            scratch_shapes=[pltpu.VMEM((tile_m, f_out), jnp.float32)],
        ),
        compiler_params=pltpu.CompilerParams(
            dimension_semantics=("parallel", "arbitrary"),
            vmem_limit_bytes=vmem_limit,
        ),
    )(a_hat, h, w, b)


# ----------------------------------------------------------------------------
# Glue: D^{-1/2} (A + I) D^{-1/2} from edge_index (PyG GCNConv semantics,
# add_remaining_self_loops: existing self-loops dropped, one per node added)
# ----------------------------------------------------------------------------
def build_normalized_adjacency(edge_index, num_nodes):
    src = edge_index[0]
    dst = edge_index[1]
    edge_w = jnp.where(src != dst, 1.0, 0.0).astype(jnp.float32)
    loop = jnp.arange(num_nodes, dtype=edge_index.dtype)
    src = jnp.concatenate([src, loop])
    dst = jnp.concatenate([dst, loop])
    w = jnp.concatenate([edge_w, jnp.ones((num_nodes,), jnp.float32)])
    deg = jnp.zeros((num_nodes,), jnp.float32).at[dst].add(w)
    dinv_sqrt = jnp.where(deg > 0, lax.rsqrt(deg), 0.0)
    norm = dinv_sqrt[src] * w * dinv_sqrt[dst]
    a_hat = jnp.zeros((num_nodes, num_nodes), jnp.float32).at[dst, src].add(norm)
    return a_hat


# ----------------------------------------------------------------------------
# Model
# ----------------------------------------------------------------------------
@dataclass
class Config:
    model_name: str = "GCN"
    num_layers: int = 3
    input_dim: int = 8
    hidden_dim: int = 32
    output_dim: int = 8


def init_params(config: Config, key):
    params = []
    for i in range(config.num_layers):
        in_dim = config.input_dim if i == 0 else config.hidden_dim
        out_dim = (
            config.output_dim if i == config.num_layers - 1 else config.hidden_dim
        )
        key, wk, bk = jax.random.split(key, 3)
        scale = jnp.sqrt(2.0 / (in_dim + out_dim)).astype(jnp.float32)
        w = jax.random.normal(wk, (in_dim, out_dim), jnp.float32) * scale
        b = jax.random.normal(bk, (1, out_dim), jnp.float32) * 0.01
        params.append((w, b))
    return params


def complex_gnn_forward(params, x, edge_index, *, force_tiled=False):
    n, f_in = x.shape
    num_layers = len(params)
    out_dim = params[-1][0].shape[1]

    a_hat_f32 = build_normalized_adjacency(edge_index, n)

    dims = [f_in] + [w.shape[1] for (w, _) in params]
    f_pads = [_round_up(d, LANE) for d in dims]
    f_max = max(f_pads)

    vmem_cap = int(0.75 * _vmem_capacity_bytes())

    # ---------- Path A: fully fused single kernel (small graphs) ----------
    n_pad_a = _round_up(max(n, LANE), LANE)
    est_a = (n_pad_a * n_pad_a * 2                 # A_hat bf16
             + n_pad_a * f_max * 2                 # x bf16
             + num_layers * f_max * f_max * 2      # stacked W bf16
             + num_layers * f_max * 4              # stacked b f32
             + 3 * n_pad_a * f_max * 4)            # out + live f32 intermediates
    vmem_needed_a = 2 * est_a + (8 << 20)

    if (not force_tiled) and vmem_needed_a <= vmem_cap:
        a_hat = _pad_to(a_hat_f32, (n_pad_a, n_pad_a)).astype(jnp.bfloat16)
        h = _pad_to(x, (n_pad_a, f_max)).astype(jnp.bfloat16)
        w_stack = jnp.stack(
            [_pad_to(w, (f_max, f_max)) for (w, _) in params]).astype(jnp.bfloat16)
        b_stack = jnp.stack(
            [_pad_to(b, (1, f_max)) for (_, b) in params]).astype(jnp.float32)
        out = fused_gcn_forward(
            a_hat, h, w_stack, b_stack,
            vmem_limit=int(min(max(vmem_needed_a, 32 << 20), vmem_cap)))
        return out[:n, :out_dim]

    # ---------- Path B: per-layer tiled kernels (large graphs) ----------
    n_pad = _round_up(max(n, 256), 256)
    tile_k = _pick_tile_k(n_pad)
    tile_m = _pick_tile_m(n_pad)

    a_hat = _pad_to(a_hat_f32, (n_pad, n_pad)).astype(jnp.bfloat16)
    h = _pad_to(x, (n_pad, f_pads[0])).astype(jnp.bfloat16)

    for i, (w, b) in enumerate(params):
        f_in_p, f_out_p = f_pads[i], f_pads[i + 1]
        w_pad = _pad_to(w, (f_in_p, f_out_p)).astype(jnp.bfloat16)
        b_pad = _pad_to(b, (1, f_out_p)).astype(jnp.float32)
        is_last = i == num_layers - 1
        h = gcn_layer_tiled(
            a_hat, h, w_pad, b_pad,
            apply_relu=not is_last,
            out_dtype=jnp.float32 if is_last else jnp.bfloat16,
            tile_m=tile_m, tile_k=tile_k,
        )
    return h[:n, :out_dim]


def reference_forward(params, x, edge_index):
    n = x.shape[0]
    a_hat = build_normalized_adjacency(edge_index, n)
    h = x
    for i, (w, b) in enumerate(params):
        h = a_hat @ (h @ w) + b
        if i < len(params) - 1:
            h = jnp.maximum(h, 0.0)
    return h


# ----------------------------------------------------------------------------
# Main
# ----------------------------------------------------------------------------
if __name__ == "__main__":
    config = Config()
    key = jax.random.PRNGKey(0)
    key, xk, ek, pk = jax.random.split(key, 4)

    num_nodes = 300
    num_edges = 900

    x = jax.random.normal(xk, (num_nodes, config.input_dim), jnp.float32)
    edge_index = jax.random.randint(ek, (2, num_edges), 0, num_nodes, jnp.int32)
    params = init_params(config, pk)

    ref = reference_forward(params, x, edge_index)

    # Path A: fully fused single-kernel fast path (what a 300-node graph takes).
    fwd_fused = jax.jit(complex_gnn_forward)
    out = jax.block_until_ready(fwd_fused(params, x, edge_index))
    assert out.shape == (num_nodes, config.output_dim), out.shape
    assert bool(jnp.all(jnp.isfinite(out)))
    err_fused = float(jnp.max(jnp.abs(out - ref)))
    assert err_fused < 5e-2, f"fused path max|err| vs f32 reference = {err_fused}"

    # Path B: tiled per-layer kernels (large-graph path), forced here for coverage.
    fwd_tiled = jax.jit(functools.partial(complex_gnn_forward, force_tiled=True))
    out_t = jax.block_until_ready(fwd_tiled(params, x, edge_index))
    assert out_t.shape == (num_nodes, config.output_dim), out_t.shape
    assert bool(jnp.all(jnp.isfinite(out_t)))
    err_tiled = float(jnp.max(jnp.abs(out_t - ref)))
    assert err_tiled < 5e-2, f"tiled path max|err| vs f32 reference = {err_tiled}"

    print("KERNEL_OK")
</pallas_src>

<mosaic_0001>
module attributes {stable_mosaic.version = 11 : i64} {
  func.func private @main(%arg0: i32) attributes {dimension_semantics = [#tpu.dimension_semantics<core_parallel>], iteration_bounds = array<i64: 2>, tpu.core_type = #tpu.core_type<sc_scalar_subcore>, window_params = []} {
    return
  }
}

module attributes {stable_mosaic.version = 11 : i64} {
  func.func private @main(%arg0: i32) attributes {dimension_semantics = [#tpu.dimension_semantics<core_parallel>], iteration_bounds = array<i64: 2>, tpu.core_type = #tpu.core_type<sc_scalar_subcore>, window_params = []} {
    return
  }
}

module attributes {stable_mosaic.version = 11 : i64} {
  func.func @fused_gcn_kernel(%arg0: memref<384x384xbf16, #tpu.memory_space<vmem>>, %arg1: memref<384x128xbf16, #tpu.memory_space<vmem>>, %arg2: memref<3x128x128xbf16, #tpu.memory_space<vmem>>, %arg3: memref<3x1x128xf32, #tpu.memory_space<vmem>>, %arg4: memref<384x128xf32, #tpu.memory_space<vmem>>) attributes {dimension_semantics = [], scalar_prefetch = 0 : i64, scratch_operands = 0 : i64, tpu.core_type = #tpu.core_type<tc>} {
    %c0 = arith.constant 0 : index
    %c0_0 = arith.constant 0 : index
    %0 = vector.load %arg0[%c0, %c0_0] : memref<384x384xbf16, #tpu.memory_space<vmem>>, vector<384x384xbf16>
    %c0_1 = arith.constant 0 : index
    %c0_2 = arith.constant 0 : index
    %1 = vector.load %arg1[%c0_1, %c0_2] : memref<384x128xbf16, #tpu.memory_space<vmem>>, vector<384x128xbf16>
    %c0_3 = arith.constant 0 : index
    %c0_4 = arith.constant 0 : index
    %c0_5 = arith.constant 0 : index
    %2 = vector.load %arg2[%c0_3, %c0_4, %c0_5] : memref<3x128x128xbf16, #tpu.memory_space<vmem>>, vector<1x128x128xbf16>
    %3 = vector.shape_cast %2 : vector<1x128x128xbf16> to vector<128x128xbf16>
    %cst = arith.constant dense<0.000000e+00> : vector<384x128xf32>
    %4 = tpu.matmul %1, %3, %cst {dimension_numbers = #tpu.dot_dimension_numbers<[1], [0], [0], [1], [0, 0, 1, 1], [], []>} : vector<384x128xbf16>, vector<128x128xbf16>, vector<384x128xf32> -> vector<384x128xf32>
    %5 = arith.truncf %4 : vector<384x128xf32> to vector<384x128xbf16>
    %cst_6 = arith.constant dense<0.000000e+00> : vector<384x128xf32>
    %6 = tpu.matmul %0, %5, %cst_6 {dimension_numbers = #tpu.dot_dimension_numbers<[1], [0], [0], [1], [0, 0, 1, 1], [], []>} : vector<384x384xbf16>, vector<384x128xbf16>, vector<384x128xf32> -> vector<384x128xf32>
    %c0_7 = arith.constant 0 : index
    %c0_8 = arith.constant 0 : index
    %c0_9 = arith.constant 0 : index
    %7 = vector.load %arg3[%c0_7, %c0_8, %c0_9] : memref<3x1x128xf32, #tpu.memory_space<vmem>>, vector<1x1x128xf32>
    %8 = vector.shape_cast %7 : vector<1x1x128xf32> to vector<1x128xf32>
    %9 = vector.broadcast %8 : vector<1x128xf32> to vector<384x128xf32>
    %10 = arith.addf %6, %9 : vector<384x128xf32>
    %cst_10 = arith.constant 0.000000e+00 : f32
    %11 = vector.broadcast %cst_10 : f32 to vector<384x128xf32>
    %12 = arith.maximumf %10, %11 : vector<384x128xf32>
    %13 = arith.truncf %12 : vector<384x128xf32> to vector<384x128xbf16>
    %c1 = arith.constant 1 : index
    %c0_11 = arith.constant 0 : index
    %c0_12 = arith.constant 0 : index
    %14 = vector.load %arg2[%c1, %c0_11, %c0_12] : memref<3x128x128xbf16, #tpu.memory_space<vmem>>, vector<1x128x128xbf16>
    %15 = vector.shape_cast %14 : vector<1x128x128xbf16> to vector<128x128xbf16>
    %cst_13 = arith.constant dense<0.000000e+00> : vector<384x128xf32>
    %16 = tpu.matmul %13, %15, %cst_13 {dimension_numbers = #tpu.dot_dimension_numbers<[1], [0], [0], [1], [0, 0, 1, 1], [], []>} : vector<384x128xbf16>, vector<128x128xbf16>, vector<384x128xf32> -> vector<384x128xf32>
    %17 = arith.truncf %16 : vector<384x128xf32> to vector<384x128xbf16>
    %cst_14 = arith.constant dense<0.000000e+00> : vector<384x128xf32>
    %18 = tpu.matmul %0, %17, %cst_14 {dimension_numbers = #tpu.dot_dimension_numbers<[1], [0], [0], [1], [0, 0, 1, 1], [], []>} : vector<384x384xbf16>, vector<384x128xbf16>, vector<384x128xf32> -> vector<384x128xf32>
    %c1_15 = arith.constant 1 : index
    %c0_16 = arith.constant 0 : index
    %c0_17 = arith.constant 0 : index
    %19 = vector.load %arg3[%c1_15, %c0_16, %c0_17] : memref<3x1x128xf32, #tpu.memory_space<vmem>>, vector<1x1x128xf32>
    %20 = vector.shape_cast %19 : vector<1x1x128xf32> to vector<1x128xf32>
    %21 = vector.broadcast %20 : vector<1x128xf32> to vector<384x128xf32>
    %22 = arith.addf %18, %21 : vector<384x128xf32>
    %cst_18 = arith.constant 0.000000e+00 : f32
    %23 = vector.broadcast %cst_18 : f32 to vector<384x128xf32>
    %24 = arith.maximumf %22, %23 : vector<384x128xf32>
    %25 = arith.truncf %24 : vector<384x128xf32> to vector<384x128xbf16>
    %c2 = arith.constant 2 : index
    %c0_19 = arith.constant 0 : index
    %c0_20 = arith.constant 0 : index
    %26 = vector.load %arg2[%c2, %c0_19, %c0_20] : memref<3x128x128xbf16, #tpu.memory_space<vmem>>, vector<1x128x128xbf16>
    %27 = vector.shape_cast %26 : vector<1x128x128xbf16> to vector<128x128xbf16>
    %cst_21 = arith.constant dense<0.000000e+00> : vector<384x128xf32>
    %28 = tpu.matmul %25, %27, %cst_21 {dimension_numbers = #tpu.dot_dimension_numbers<[1], [0], [0], [1], [0, 0, 1, 1], [], []>} : vector<384x128xbf16>, vector<128x128xbf16>, vector<384x128xf32> -> vector<384x128xf32>
    %29 = arith.truncf %28 : vector<384x128xf32> to vector<384x128xbf16>
    %cst_22 = arith.constant dense<0.000000e+00> : vector<384x128xf32>
    %30 = tpu.matmul %0, %29, %cst_22 {dimension_numbers = #tpu.dot_dimension_numbers<[1], [0], [0], [1], [0, 0, 1, 1], [], []>} : vector<384x384xbf16>, vector<384x128xbf16>, vector<384x128xf32> -> vector<384x128xf32>
    %c2_23 = arith.constant 2 : index
    %c0_24 = arith.constant 0 : index
    %c0_25 = arith.constant 0 : index
    %31 = vector.load %arg3[%c2_23, %c0_24, %c0_25] : memref<3x1x128xf32, #tpu.memory_space<vmem>>, vector<1x1x128xf32>
    %32 = vector.shape_cast %31 : vector<1x1x128xf32> to vector<1x128xf32>
    %33 = vector.broadcast %32 : vector<1x128xf32> to vector<384x128xf32>
    %34 = arith.addf %30, %33 : vector<384x128xf32>
    %c0_26 = arith.constant 0 : index
    %c0_27 = arith.constant 0 : index
    %35 = vector.load %arg4[%c0_26, %c0_27] : memref<384x128xf32, #tpu.memory_space<vmem>>, vector<384x128xf32>
    tpu.vector_store %arg4[%c0_26, %c0_27], %34 {strides = array<i32>} : memref<384x128xf32, #tpu.memory_space<vmem>>, vector<384x128xf32>,
    return
  }
}

</mosaic_0001>

<bundles_post_ra>
// kernel: complex_gnn_forward.1
= control target key start
LH: loop header
LB: loop body
LE: loop exit
PB: predicated region body
PF: predicated region fallthrough
CT: control target
= control target key end

     0   :  { %v4221_v32 = vmov 0   ;;  %s5502_s2 = inlined_call_operand.vmem [shape: bf16[3,128,128], index: 2, kind: input, shape index: {}]   ;;  %s5503_s1 = inlined_call_operand.vmem [shape: bf16[384,128], index: 1, kind: input, shape index: {}]   ;;  %s5504_s0 = inlined_call_operand.vmem [shape: bf16[384,384], index: 0, kind: input, shape index: {}]   ;;  %s5505_s3 = inlined_call_operand.vmem [shape: f32[3,1,128], index: 3, kind: input, shape index: {}]   ;;  %s5506_s4 = inlined_call_operand.vmem [shape: f32[384,128], index: 4, kind: output, shape index: {}]  }
   0x1   :  { %v3934_v0 = vld [vmem:[%s5502_s2] sm:$0xff]   ;;  %v3935_v1 = vld [vmem:[%s5502_s2 + $0x8] sm:$0xff]   ;;  %v3936_v2 = vld [vmem:[%s5502_s2 + $0x10] sm:$0xff]   ;;  %1010 = vmatprep.subr.bf16.mxu1 %v4221_v32 }
   0x2   :  { %3549 = vmatprep.subr.bf16.mxu0 %v3934_v0  ;;  %v3937_v3 = vld [vmem:[%s5502_s2 + $0x18] sm:$0xff]   ;;  %v3942_v4 = vld [vmem:[%s5503_s1] sm:$0xff]   ;;  %v3939_v6 = vld [vmem:[%s5502_s2 + $0x28] sm:$0xff]  }
   0x3   :  { %3550 = vmatpush3.bf16.msra.mxu0 %v3934_v0  ;;  %3565 = vmatprep.mubr.bf16.mxu0 %v3942_v4  ;;  %v3938_v5 = vld [vmem:[%s5502_s2 + $0x20] sm:$0xff]   ;;  %v3940_v7 = vld [vmem:[%s5502_s2 + $0x30] sm:$0xff]   ;;  %v3941_v8 = vld [vmem:[%s5502_s2 + $0x38] sm:$0xff]  }
   0x4   :  { %3551 = vmatprep.subr.bf16.mxu0 %v3935_v1  ;;  %v3943_v9 = vld [vmem:[%s5503_s1 + $0x8] sm:$0xff]   ;;  %v3944_v10 = vld [vmem:[%s5503_s1 + $0x10] sm:$0xff]   ;;  %v3945_v11 = vld [vmem:[%s5503_s1 + $0x18] sm:$0xff]  }
   0x5   :  { %v3946_v12 = vld [vmem:[%s5503_s1 + $0x20] sm:$0xff]   ;;  %v3947_v13 = vld [vmem:[%s5503_s1 + $0x28] sm:$0xff]   ;;  %v3948_v14 = vld [vmem:[%s5503_s1 + $0x30] sm:$0xff]  }
   0x6   :  { %v3949_v15 = vld [vmem:[%s5503_s1 + $0x38] sm:$0xff]   ;;  %v3950_v16 = vld [vmem:[%s5503_s1 + $0x40] sm:$0xff]   ;;  %v3951_v17 = vld [vmem:[%s5503_s1 + $0x48] sm:$0xff]  }
   0x7   :  { %3552 = vmatpush3.bf16.msra.mxu0 %v3935_v1  ;;  %v3952_v18 = vld [vmem:[%s5503_s1 + $0x50] sm:$0xff]   ;;  %v3953_v19 = vld [vmem:[%s5503_s1 + $0x58] sm:$0xff]   ;;  %v3954_v20 = vld [vmem:[%s5503_s1 + $0x60] sm:$0xff]  }
   0x8   :  { %3553 = vmatprep.subr.bf16.mxu0 %v3936_v2  ;;  %v3955_v21 = vld [vmem:[%s5503_s1 + $0x68] sm:$0xff]   ;;  %v3956_v22 = vld [vmem:[%s5503_s1 + $0x70] sm:$0xff]   ;;  %v3957_v23 = vld [vmem:[%s5503_s1 + $0x78] sm:$0xff]  }
   0x9   :  { %v3958_v24 = vld [vmem:[%s5503_s1 + $0x80] sm:$0xff]   ;;  %v3959_v25 = vld [vmem:[%s5503_s1 + $0x88] sm:$0xff]   ;;  %v3960_v26 = vld [vmem:[%s5503_s1 + $0x90] sm:$0xff]  }
   0xa   :  { %v3961_v27 = vld [vmem:[%s5503_s1 + $0x98] sm:$0xff]   ;;  %v3962_v28 = vld [vmem:[%s5503_s1 + $0xa0] sm:$0xff]   ;;  %v3963_v29 = vld [vmem:[%s5503_s1 + $0xa8] sm:$0xff]  }
   0xb   :  { %3554 = vmatpush3.bf16.msra.mxu0 %v3936_v2  ;;  %v3964_v30 = vld [vmem:[%s5503_s1 + $0xb0] sm:$0xff]   ;;  %v3965_v31 = vld [vmem:[%s5503_s1 + $0xb8] sm:$0xff]  }
   0xc   :  { %3555 = vmatprep.subr.bf16.mxu0 %v3937_v3  ;;  %v4347_v33 = vld [vmem:[%s5504_s0 + $0x4] ss:$12 sps:$4 sm:$0xff]   ;;  %v3981_v34 = vld [vmem:[%s5504_s0 + $0x8] ss:$12 sps:$4 sm:$0xff]  }
   0xd   :  { %1042 = vmatprep.mubr.bf16.mxu1 %v4347_v33 }
   0xf   :  { %3556 = vmatpush3.bf16.msra.mxu0 %v3937_v3 }
  0x10   :  { %3557 = vmatprep.subr.bf16.mxu0 %v3938_v5 }
  0x13   :  { %3558 = vmatpush3.bf16.msra.mxu0 %v3938_v5 }
  0x14   :  { %3559 = vmatprep.subr.bf16.mxu0 %v3939_v6 }
  0x17   :  { %3560 = vmatpush3.bf16.msra.mxu0 %v3939_v6 }
  0x18   :  { %3561 = vmatprep.subr.bf16.mxu0 %v3940_v7 }
  0x1b   :  { %3562 = vmatpush3.bf16.msra.mxu0 %v3940_v7 }
  0x1c   :  { %3563 = vmatprep.subr.bf16.mxu0 %v3941_v8 }
  0x1f   :  { %3564 = vmatpush3.bf16.msra.mxu0 %v3941_v8 }
  0x22   :  { %3566 = vmatmul.mubr.bf16.vlgmr.msra.gmra.mrb[0].mxu0 %v3943_v9 }
  0x23   :  { %3569 = vmatprep.mubr.bf16.mxu0 %v3944_v10 }
  0x2a   :  { %3570 = vmatmul.mubr.bf16.gmra.mrb[4].mxu0 %v3945_v11 }
  0x2b   :  { %3573 = vmatprep.mubr.bf16.mxu0 %v3946_v12 }
  0x32   :  { %3574 = vmatmul.mubr.bf16.gmra.mrb[8].mxu0 %v3947_v13 }
  0x33   :  { %3577 = vmatprep.mubr.bf16.mxu0 %v3948_v14 }
  0x3a   :  { %3578 = vmatmul.mubr.bf16.gmra.mrb[12].mxu0 %v3949_v15 }
  0x3b   :  { %3581 = vmatprep.mubr.bf16.mxu0 %v3950_v16 }
  0x42   :  { %3582 = vmatmul.mubr.bf16.gmra.mrb[16].mxu0 %v3951_v17 }
  0x43   :  { %3585 = vmatprep.mubr.bf16.mxu0 %v3952_v18 }
  0x4a   :  { %3586 = vmatmul.mubr.bf16.gmra.mrb[20].mxu0 %v3953_v19 }
  0x4b   :  { %3589 = vmatprep.mubr.bf16.mxu0 %v3954_v20 }
  0x52   :  { %3590 = vmatmul.mubr.bf16.gmra.mrb[24].mxu0 %v3955_v21  ;;  %v3968_v21 = vld [vmem:[%s5504_s0] ss:$12 sps:$4 sm:$0xff]  }
  0x53   :  { %3593 = vmatprep.mubr.bf16.mxu0 %v3956_v22 }
  0x5a   :  { %3594 = vmatmul.mubr.bf16.gmra.mrb[28].mxu0 %v3957_v23  ;;  %v3969_v23 = vld [vmem:[%s5504_s0 + $0x1c] ss:$12 sps:$4 sm:$0xff]  }
  0x5b   :  { %3597 = vmatprep.mubr.bf16.mxu0 %v3958_v24 }
  0x62   :  { %3598 = vmatmul.mubr.bf16.gmra.mrb[32].mxu0 %v3959_v25 }
  0x63   :  { %3601 = vmatprep.mubr.bf16.mxu0 %v3960_v26 }
  0x6a   :  { %3602 = vmatmul.mubr.bf16.gmra.mrb[36].mxu0 %v3961_v27 }
  0x6b   :  { %3605 = vmatprep.mubr.bf16.mxu0 %v3962_v28 }
  0x72   :  { %3606 = vmatmul.mubr.bf16.gmra.mrb[40].mxu0 %v3963_v29  ;;  %v3971_v29 = vld [vmem:[%s5504_s0 + $0x18] ss:$12 sps:$4 sm:$0xff]  }
  0x73   :  { %3609 = vmatprep.mubr.bf16.mxu0 %v3964_v30 }
  0x7a   :  { %3610 = vmatmul.mubr.bf16.gmra.mrb[44].mxu0 %v3965_v31  ;;  %v3972_v31 = vld [vmem:[%s5504_s0 + $0x34] ss:$12 sps:$4 sm:$0xff]  }
  0x7b   :  { %3629 = vmatprep.mubr.bf16.mxu0 %v3981_v34 }
  0xf5   :  { %v3567_v35 = vpop.f32.mrb[0].mxu0 }
  0xf6   :  { %v404_v36 = vpop.f32.mrb[1].mxu0 }
  0xf7   :  { %v3568_v37 = vpop.f32.mrb[2].mxu0 }
  0xf8   :  { %v596_v38 = vpack.c.bf16 %v3568_v37, %v3567_v35  ;;  %v407_v39 = vpop.f32.mrb[3].mxu0 }
  0xf9   :  { %v595_v40 = vpack.c.bf16 %v407_v39, %v404_v36  ;;  %v3974_v39 = vld [vmem:[%s5504_s0 + $0x30] ss:$12 sps:$4 sm:$0xff]  }
  0xfb   :  { %1011 = vmatpush1.bf16.msra.mxu1 %v595_v40 }
  0xfc   :  { %1012 = vmatprep.subr.bf16.mxu1 %v4221_v32 }
  0xfd   :  { %v3571_v41 = vpop.f32.mrb[4].mxu0 }
  0xfe   :  { %v420_v42 = vpop.f32.mrb[5].mxu0 }
  0xff   :  { %v3572_v43 = vpop.f32.mrb[6].mxu0  ;;  %1013 = vmatpush1.bf16.msra.mxu1 %v596_v38 }
 0x100   :  { %v598_v44 = vpack.c.bf16 %v3572_v43, %v3571_v41  ;;  %v423_v45 = vpop.f32.mrb[7].mxu0  ;;  %1014 = vmatprep.subr.bf16.mxu1 %v4221_v32  ;;  %v3975_v41 = vld [vmem:[%s5504_s0 + $0x4c] ss:$12 sps:$4 sm:$0xff]  }
 0x101   :  { %v597_v46 = vpack.c.bf16 %v423_v45, %v420_v42 }
 0x103   :  { %1015 = vmatpush1.bf16.msra.mxu1 %v597_v46 }
 0x104   :  { %1016 = vmatprep.subr.bf16.mxu1 %v4221_v32 }
 0x105   :  { %v3575_v47 = vpop.f32.mrb[8].mxu0 }
 0x106   :  { %v436_v48 = vpop.f32.mrb[9].mxu0 }
 0x107   :  { %v3576_v49 = vpop.f32.mrb[10].mxu0  ;;  %1017 = vmatpush1.bf16.msra.mxu1 %v598_v44 }
 0x108   :  { %v600_v50 = vpack.c.bf16 %v3576_v49, %v3575_v47  ;;  %v439_v51 = vpop.f32.mrb[11].mxu0  ;;  %1018 = vmatprep.subr.bf16.mxu1 %v4221_v32  ;;  %v3977_v47 = vld [vmem:[%s5504_s0 + $0x48] ss:$12 sps:$4 sm:$0xff]   ;;  %v3978_v49 = vld [vmem:[%s5504_s0 + $0x64] ss:$12 sps:$4 sm:$0xff]  }
 0x109   :  { %v599_v52 = vpack.c.bf16 %v439_v51, %v436_v48 }
 0x10b   :  { %1019 = vmatpush1.bf16.msra.mxu1 %v599_v52 }
 0x10c   :  { %1020 = vmatprep.subr.bf16.mxu1 %v4221_v32 }
 0x10d   :  { %v3579_v53 = vpop.f32.mrb[12].mxu0 }
 0x10e   :  { %v452_v54 = vpop.f32.mrb[13].mxu0 }
 0x10f   :  { %v3580_v55 = vpop.f32.mrb[14].mxu0  ;;  %1021 = vmatpush1.bf16.msra.mxu1 %v600_v50 }
 0x110   :  { %v602_v56 = vpack.c.bf16 %v3580_v55, %v3579_v53  ;;  %v455_v57 = vpop.f32.mrb[15].mxu0  ;;  %1022 = vmatprep.subr.bf16.mxu1 %v4221_v32  ;;  %v3980_v53 = vld [vmem:[%s5504_s0 + $0x60] ss:$12 sps:$4 sm:$0xff]   ;;  %v3983_v55 = vld [vmem:[%s5504_s0 + $0x7c] ss:$12 sps:$4 sm:$0xff]  }
 0x111   :  { %v601_v58 = vpack.c.bf16 %v455_v57, %v452_v54  ;;  %v3982_v54 = vld [vmem:[%s5504_s0 + $0x20] ss:$12 sps:$4 sm:$0xff]   ;;  %v3985_v57 = vld [vmem:[%s5504_s0 + $0x78] ss:$12 sps:$4 sm:$0xff]  }
 0x113   :  { %1023 = vmatpush1.bf16.msra.mxu1 %v601_v58  ;;  %v3987_v58 = vld [vmem:[%s5504_s0 + $0x50] ss:$12 sps:$4 sm:$0xff]  }
 0x114   :  { %1024 = vmatprep.subr.bf16.mxu1 %v4221_v32 }
 0x115   :  { %v3583_v59 = vpop.f32.mrb[16].mxu0 }
 0x116   :  { %v468_v60 = vpop.f32.mrb[17].mxu0 }
 0x117   :  { %v3584_v61 = vpop.f32.mrb[18].mxu0  ;;  %1025 = vmatpush1.bf16.msra.mxu1 %v602_v56  ;;  %v3986_v56 = vld [vmem:[%s5504_s0 + $0x38] ss:$12 sps:$4 sm:$0xff]  }
 0x118   :  { %v604_v62 = vpack.c.bf16 %v3584_v61, %v3583_v59  ;;  %v471_v63 = vpop.f32.mrb[19].mxu0  ;;  %1026 = vmatprep.subr.bf16.mxu1 %v4221_v32  ;;  %v3988_v59 = vld [vmem:[%s5504_s0 + $0x94] ss:$12 sps:$4 sm:$0xff]   ;;  %v3990_v61 = vld [vmem:[%s5504_s0 + $0x90] ss:$12 sps:$4 sm:$0xff]  }
 0x119   :  { %v603_v0 = vpack.c.bf16 %v471_v63, %v468_v60  ;;  %v3991_v60 = vld [vmem:[%s5504_s0 + $0x68] ss:$12 sps:$4 sm:$0xff]   ;;  %v3993_v63 = vld [vmem:[%s5504_s0 + $0xac] ss:$12 sps:$4 sm:$0xff]  }
 0x11b   :  { %1027 = vmatpush1.bf16.msra.mxu1 %v603_v0  ;;  %v3996_v0 = vld [vmem:[%s5504_s0 + $0x98] ss:$12 sps:$4 sm:$0xff]  }
 0x11c   :  { %1028 = vmatprep.subr.bf16.mxu1 %v4221_v32 }
 0x11d   :  { %v3587_v1 = vpop.f32.mrb[20].mxu0 }
 0x11e   :  { %v484_v2 = vpop.f32.mrb[21].mxu0 }
 0x11f   :  { %v3588_v3 = vpop.f32.mrb[22].mxu0  ;;  %1029 = vmatpush1.bf16.msra.mxu1 %v604_v62  ;;  %v3992_v62 = vld [vmem:[%s5504_s0 + $0x80] ss:$12 sps:$4 sm:$0xff]  }
 0x120   :  { %v606_v4 = vpack.c.bf16 %v3588_v3, %v3587_v1  ;;  %v487_v5 = vpop.f32.mrb[23].mxu0  ;;  %1030 = vmatprep.subr.bf16.mxu1 %v4221_v32  ;;  %v3995_v1 = vld [vmem:[%s5504_s0 + $0xa8] ss:$12 sps:$4 sm:$0xff]   ;;  %v3998_v3 = vld [vmem:[%s5504_s0 + $0xc4] ss:$12 sps:$4 sm:$0xff]  }
 0x121   :  { %v605_v6 = vpack.c.bf16 %v487_v5, %v484_v2  ;;  %v3997_v2 = vld [vmem:[%s5504_s0 + $0xb0] ss:$12 sps:$4 sm:$0xff]   ;;  %v4000_v5 = vld [vmem:[%s5504_s0 + $0xc0] ss:$12 sps:$4 sm:$0xff]  }
 0x123   :  { %1031 = vmatpush1.bf16.msra.mxu1 %v605_v6  ;;  %v4002_v6 = vld [vmem:[%s5504_s0 + $0xe0] ss:$12 sps:$4 sm:$0xff]  }
 0x124   :  { %1032 = vmatprep.subr.bf16.mxu1 %v4221_v32 }
 0x125   :  { %v3591_v7 = vpop.f32.mrb[24].mxu0 }
 0x126   :  { %v500_v8 = vpop.f32.mrb[25].mxu0 }
 0x127   :  { %v3592_v9 = vpop.f32.mrb[26].mxu0  ;;  %1033 = vmatpush1.bf16.msra.mxu1 %v606_v4  ;;  %v4001_v4 = vld [vmem:[%s5504_s0 + $0xc8] ss:$12 sps:$4 sm:$0xff]  }
 0x128   :  { %v608_v10 = vpack.c.bf16 %v3592_v9, %v3591_v7  ;;  %v503_v11 = vpop.f32.mrb[27].mxu0  ;;  %1034 = vmatprep.subr.bf16.mxu1 %v4221_v32  ;;  %v4003_v7 = vld [vmem:[%s5504_s0 + $0xdc] ss:$12 sps:$4 sm:$0xff]   ;;  %v4005_v9 = vld [vmem:[%s5504_s0 + $0xd8] ss:$12 sps:$4 sm:$0xff]  }
 0x129   :  { %v607_v12 = vpack.c.bf16 %v503_v11, %v500_v8  ;;  %v4009_v8 = vld [vmem:[%s5504_s0 + $0xf8] ss:$12 sps:$4 sm:$0xff]   ;;  %v4010_v11 = vld [vmem:[%s5504_s0 + $0x110] ss:$12 sps:$4 sm:$0xff]  }
 0x12b   :  { %1035 = vmatpush1.bf16.msra.mxu1 %v607_v12  ;;  %v4017_v12 = vld [vmem:[%s5504_s0 + $0x128] ss:$12 sps:$4 sm:$0xff]  }
 0x12c   :  { %1036 = vmatprep.subr.bf16.mxu1 %v4221_v32 }
 0x12d   :  { %v3595_v13 = vpop.f32.mrb[28].mxu0 }
 0x12e   :  { %v516_v14 = vpop.f32.mrb[29].mxu0 }
 0x12f   :  { %v3596_v15 = vpop.f32.mrb[30].mxu0  ;;  %1037 = vmatpush1.bf16.msra.mxu1 %v608_v10  ;;  %v4006_v10 = vld [vmem:[%s5504_s0 + $0xf4] ss:$12 sps:$4 sm:$0xff]  }
 0x130   :  { %v610_v16 = vpack.c.bf16 %v3596_v15, %v3595_v13  ;;  %v519_v17 = vpop.f32.mrb[31].mxu0  ;;  %1038 = vmatprep.subr.bf16.mxu1 %v4221_v32  ;;  %v4008_v13 = vld [vmem:[%s5504_s0 + $0xf0] ss:$12 sps:$4 sm:$0xff]   ;;  %v4018_v15 = vld [vmem:[%s5504_s0 + $0x140] ss:$12 sps:$4 sm:$0xff]  }
 0x131   :  { %v609_v18 = vpack.c.bf16 %v519_v17, %v516_v14  ;;  %v4011_v14 = vld [vmem:[%s5504_s0 + $0x10c] ss:$12 sps:$4 sm:$0xff]   ;;  %v4013_v17 = vld [vmem:[%s5504_s0 + $0x108] ss:$12 sps:$4 sm:$0xff]  }
 0x133   :  { %1039 = vmatpush1.bf16.msra.mxu1 %v609_v18  ;;  %v4014_v18 = vld [vmem:[%s5504_s0 + $0x124] ss:$12 sps:$4 sm:$0xff]  }
 0x134   :  { %1040 = vmatprep.subr.bf16.mxu1 %v4221_v32 }
 0x135   :  { %v3599_v19 = vpop.f32.mrb[32].mxu0 }
 0x136   :  { %v532_v20 = vpop.f32.mrb[33].mxu0 }
 0x137   :  { %v3600_v22 = vpop.f32.mrb[34].mxu0  ;;  %1041 = vmatpush1.bf16.msra.mxu1 %v610_v16  ;;  %v4025_v16 = vld [vmem:[%s5504_s0 + $0x158] ss:$12 sps:$4 sm:$0xff]  }
 0x138   :  { %v612_v24 = vpack.c.bf16 %v3600_v22, %v3599_v19  ;;  %v535_v25 = vpop.f32.mrb[35].mxu0  ;;  %1854 = vmatprep.subr.bf16.mxu1 %v4221_v32  ;;  %v4026_v19 = vld [vmem:[%s5504_s0 + $0x170] ss:$12 sps:$4 sm:$0xff]  }
 0x139   :  { %v611_v26 = vpack.c.bf16 %v535_v25, %v532_v20  ;;  %v4033_v20 = vld [vmem:[%s5504_s0 + $0x188] ss:$12 sps:$4 sm:$0xff]   ;;  %v4041_v25 = vld [vmem:[%s5504_s0 + $0x1b8] ss:$12 sps:$4 sm:$0xff]  }
 0x13a   :  { %1043 = vmatmul.mubr.bf16.vlgmr.msra.gmra.mrb[0].mxu1 %v3968_v21  ;;  %v4016_v21 = vld [vmem:[%s5504_s0 + $0x120] ss:$12 sps:$4 sm:$0xff]   ;;  %v4019_v22 = vld [vmem:[%s5504_s0 + $0x13c] ss:$12 sps:$4 sm:$0xff]  }
 0x13b   :  { %3613 = vmatprep.subr.bf16.mxu0 %v611_v26  ;;  %1050 = vmatprep.mubr.bf16.mxu1 %v3969_v23  ;;  %v4034_v23 = vld [vmem:[%s5504_s0 + $0x1a0] ss:$12 sps:$4 sm:$0xff]  }
 0x13c   :  { %3614 = vmatpush3.bf16.msra.mxu0 %v611_v26  ;;  %v4063_v26 = vld [vmem:[%s5502_s2 + $0x48] sm:$0xff]  }
 0x13d   :  { %v3603_v27 = vpop.f32.mrb[36].mxu0  ;;  %3615 = vmatprep.subr.bf16.mxu0 %v612_v24 }
 0x13e   :  { %v548_v28 = vpop.f32.mrb[37].mxu0 }
 0x13f   :  { %v3604_v30 = vpop.f32.mrb[38].mxu0 }
 0x140   :  { %v614_v34 = vpack.c.bf16 %v3604_v30, %v3603_v27  ;;  %v551_v35 = vpop.f32.mrb[39].mxu0  ;;  %3616 = vmatpush3.bf16.msra.mxu0 %v612_v24  ;;  %v4062_v24 = vld [vmem:[%s5502_s2 + $0x40] sm:$0xff]   ;;  %v4064_v30 = vld [vmem:[%s5502_s2 + $0x50] sm:$0xff]  }
 0x141   :  { %v613_v36 = vpack.c.bf16 %v551_v35, %v548_v28  ;;  %v4021_v27 = vld [vmem:[%s5504_s0 + $0x138] ss:$12 sps:$4 sm:$0xff]   ;;  %v4022_v28 = vld [vmem:[%s5504_s0 + $0x154] ss:$12 sps:$4 sm:$0xff]   ;;  %v4024_v35 = vld [vmem:[%s5504_s0 + $0x150] ss:$12 sps:$4 sm:$0xff]  }
 0x142   :  { %1051 = vmatmul.mubr.bf16.gmra.mrb[4].mxu1 %v3971_v29  ;;  %v4042_v29 = vld [vmem:[%s5504_s0 + $0x1d0] ss:$12 sps:$4 sm:$0xff]  }
 0x143   :  { %3617 = vmatprep.subr.bf16.mxu0 %v613_v36  ;;  %1058 = vmatprep.mubr.bf16.mxu1 %v3972_v31  ;;  %v4049_v31 = vld [vmem:[%s5504_s0 + $0x1e8] ss:$12 sps:$4 sm:$0xff]  }
 0x144   :  { %3618 = vmatpush3.bf16.msra.mxu0 %v613_v36  ;;  %v4027_v36 = vld [vmem:[%s5504_s0 + $0x16c] ss:$12 sps:$4 sm:$0xff]  }
 0x145   :  { %v3607_v37 = vpop.f32.mrb[40].mxu0  ;;  %3619 = vmatprep.subr.bf16.mxu0 %v614_v34 }
 0x146   :  { %v564_v38 = vpop.f32.mrb[41].mxu0 }
 0x147   :  { %v3608_v40 = vpop.f32.mrb[42].mxu0 }
 0x148   :  { %v616_v42 = vpack.c.bf16 %v3608_v40, %v3607_v37  ;;  %v567_v43 = vpop.f32.mrb[43].mxu0  ;;  %3620 = vmatpush3.bf16.msra.mxu0 %v614_v34  ;;  %v4065_v34 = vld [vmem:[%s5502_s2 + $0x58] sm:$0xff]   ;;  %v4050_v37 = vld [vmem:[%s5504_s0 + $0x200] ss:$12 sps:$4 sm:$0xff]  }
 0x149   :  { %v615_v44 = vpack.c.bf16 %v567_v43, %v564_v38  ;;  %v4066_v38 = vld [vmem:[%s5502_s2 + $0x60] sm:$0xff]   ;;  %v4067_v40 = vld [vmem:[%s5502_s2 + $0x68] sm:$0xff]   ;;  %v4058_v43 = vld [vmem:[%s5504_s0 + $0x230] ss:$12 sps:$4 sm:$0xff]  }
 0x14a   :  { %1059 = vmatmul.mubr.bf16.gmra.mrb[8].mxu1 %v3974_v39  ;;  %v4057_v39 = vld [vmem:[%s5504_s0 + $0x218] ss:$12 sps:$4 sm:$0xff]  }
 0x14b   :  { %3621 = vmatprep.subr.bf16.mxu0 %v615_v44  ;;  %1066 = vmatprep.mubr.bf16.mxu1 %v3975_v41  ;;  %v4029_v41 = vld [vmem:[%s5504_s0 + $0x168] ss:$12 sps:$4 sm:$0xff]  }
 0x14c   :  { %3622 = vmatpush3.bf16.msra.mxu0 %v615_v44  ;;  %v4068_v44 = vld [vmem:[%s5502_s2 + $0x70] sm:$0xff]  }
 0x14d   :  { %v3611_v45 = vpop.f32.mrb[44].mxu0  ;;  %3623 = vmatprep.subr.bf16.mxu0 %v616_v42 }
 0x14e   :  { %v580_v46 = vpop.f32.mrb[45].mxu0 }
 0x14f   :  { %v3612_v48 = vpop.f32.mrb[46].mxu0 }
 0x150   :  { %v618_v50 = vpack.c.bf16 %v3612_v48, %v3611_v45  ;;  %v583_v51 = vpop.f32.mrb[47].mxu0  ;;  %3624 = vmatpush3.bf16.msra.mxu0 %v616_v42  ;;  %v4030_v42 = vld [vmem:[%s5504_s0 + $0x184] ss:$12 sps:$4 sm:$0xff]   ;;  %v4069_v45 = vld [vmem:[%s5502_s2 + $0x78] sm:$0xff]  }
 0x151   :  { %v617_v52 = vpack.c.bf16 %v583_v51, %v580_v46  ;;  %v4032_v46 = vld [vmem:[%s5504_s0 + $0x180] ss:$12 sps:$4 sm:$0xff]   ;;  %v4037_v48 = vld [vmem:[%s5504_s0 + $0x198] ss:$12 sps:$4 sm:$0xff]  }
 0x152   :  { %1067 = vmatmul.mubr.bf16.gmra.mrb[12].mxu1 %v3977_v47  ;;  %v4035_v47 = vld [vmem:[%s5504_s0 + $0x19c] ss:$12 sps:$4 sm:$0xff]   ;;  %v4043_v51 = vld [vmem:[%s5504_s0 + $0x1cc] ss:$12 sps:$4 sm:$0xff]  }
 0x153   :  { %3625 = vmatprep.subr.bf16.mxu0 %v617_v52  ;;  %1074 = vmatprep.mubr.bf16.mxu1 %v3978_v49  ;;  %v4038_v49 = vld [vmem:[%s5504_s0 + $0x1b4] ss:$12 sps:$4 sm:$0xff]  }
 0x154   :  { %3626 = vmatpush3.bf16.msra.mxu0 %v617_v52  ;;  %v4045_v52 = vld [vmem:[%s5504_s0 + $0x1c8] ss:$12 sps:$4 sm:$0xff]  }
 0x155   :  { %3627 = vmatprep.subr.bf16.mxu0 %v618_v50 }
 0x158   :  { %3628 = vmatpush3.bf16.msra.mxu0 %v618_v50  ;;  %v4040_v50 = vld [vmem:[%s5504_s0 + $0x1b0] ss:$12 sps:$4 sm:$0xff]  }
 0x159   :  { %3677 = vmatprep.subr.bf16.mxu0 %v4062_v24 }
 0x15a   :  { %1075 = vmatmul.mubr.bf16.gmra.mrb[16].mxu1 %v3980_v53  ;;  %v4046_v53 = vld [vmem:[%s5504_s0 + $0x1e4] ss:$12 sps:$4 sm:$0xff]  }
 0x15b   :  { %3630 = vmatmul.mubr.bf16.vlgmr.msra.gmra.mrb[48].mxu0 %v3982_v54  ;;  %1082 = vmatprep.mubr.bf16.mxu1 %v3983_v55  ;;  %v4048_v54 = vld [vmem:[%s5504_s0 + $0x1e0] ss:$12 sps:$4 sm:$0xff]   ;;  %v4051_v55 = vld [vmem:[%s5504_s0 + $0x1fc] ss:$12 sps:$4 sm:$0xff]  }
 0x15c   :  { %3633 = vmatprep.mubr.bf16.mxu0 %v3986_v56  ;;  %3678 = vmatpush3.bf16.msra.mxu0 %v4062_v24  ;;  %v4053_v56 = vld [vmem:[%s5504_s0 + $0x1f8] ss:$12 sps:$4 sm:$0xff]  }
 0x15d   :  { %3679 = vmatprep.subr.bf16.mxu0 %v4063_v26 }
 0x160   :  { %3680 = vmatpush3.bf16.msra.mxu0 %v4063_v26 }
 0x161   :  { %3681 = vmatprep.subr.bf16.mxu0 %v4064_v30 }
 0x162   :  { %1083 = vmatmul.mubr.bf16.gmra.mrb[20].mxu1 %v3985_v57  ;;  %v4054_v57 = vld [vmem:[%s5504_s0 + $0x214] ss:$12 sps:$4 sm:$0xff]  }
 0x163   :  { %3634 = vmatmul.mubr.bf16.gmra.mrb[52].mxu0 %v3987_v58  ;;  %1090 = vmatprep.mubr.bf16.mxu1 %v3988_v59  ;;  %v4056_v58 = vld [vmem:[%s5504_s0 + $0x210] ss:$12 sps:$4 sm:$0xff]   ;;  %v4059_v59 = vld [vmem:[%s5504_s0 + $0x22c] ss:$12 sps:$4 sm:$0xff]  }
 0x164   :  { %3637 = vmatprep.mubr.bf16.mxu0 %v3991_v60  ;;  %3682 = vmatpush3.bf16.msra.mxu0 %v4064_v30  ;;  %v4061_v60 = vld [vmem:[%s5504_s0 + $0x228] ss:$12 sps:$4 sm:$0xff]  }
 0x165   :  { %3683 = vmatprep.subr.bf16.mxu0 %v4065_v34 }
 0x168   :  { %3684 = vmatpush3.bf16.msra.mxu0 %v4065_v34 }
 0x169   :  { %3685 = vmatprep.subr.bf16.mxu0 %v4066_v38 }
 0x16a   :  { %1091 = vmatmul.mubr.bf16.gmra.mrb[24].mxu1 %v3990_v61 }
 0x16b   :  { %3638 = vmatmul.mubr.bf16.gmra.mrb[56].mxu0 %v3992_v62  ;;  %1098 = vmatprep.mubr.bf16.mxu1 %v3993_v63 }
 0x16c   :  { %3641 = vmatprep.mubr.bf16.mxu0 %v3996_v0  ;;  %3686 = vmatpush3.bf16.msra.mxu0 %v4066_v38 }
 0x16d   :  { %3687 = vmatprep.subr.bf16.mxu0 %v4067_v40 }
 0x170   :  { %3688 = vmatpush3.bf16.msra.mxu0 %v4067_v40 }
 0x171   :  { %3689 = vmatprep.subr.bf16.mxu0 %v4068_v44 }
 0x172   :  { %1099 = vmatmul.mubr.bf16.gmra.mrb[28].mxu1 %v3995_v1 }
 0x173   :  { %3642 = vmatmul.mubr.bf16.gmra.mrb[60].mxu0 %v3997_v2  ;;  %1106 = vmatprep.mubr.bf16.mxu1 %v3998_v3 }
 0x174   :  { %3645 = vmatprep.mubr.bf16.mxu0 %v4001_v4  ;;  %3690 = vmatpush3.bf16.msra.mxu0 %v4068_v44 }
 0x175   :  { %3691 = vmatprep.subr.bf16.mxu0 %v4069_v45 }
 0x178   :  { %3692 = vmatpush3.bf16.msra.mxu0 %v4069_v45 }
 0x17a   :  { %1107 = vmatmul.mubr.bf16.gmra.mrb[32].mxu1 %v4000_v5 }
 0x17b   :  { %3646 = vmatmul.mubr.bf16.gmra.mrb[64].mxu0 %v4002_v6  ;;  %1114 = vmatprep.mubr.bf16.mxu1 %v4003_v7 }
 0x17c   :  { %3649 = vmatprep.mubr.bf16.mxu0 %v4009_v8 }
 0x182   :  { %1115 = vmatmul.mubr.bf16.gmra.mrb[36].mxu1 %v4005_v9 }
 0x183   :  { %1122 = vmatprep.mubr.bf16.mxu1 %v4006_v10  ;;  %3650 = vmatmul.mubr.bf16.gmra.mrb[68].mxu0 %v4010_v11 }
 0x184   :  { %3653 = vmatprep.mubr.bf16.mxu0 %v4017_v12 }
 0x18a   :  { %1123 = vmatmul.mubr.bf16.gmra.mrb[40].mxu1 %v4008_v13 }
 0x18b   :  { %1130 = vmatprep.mubr.bf16.mxu1 %v4011_v14  ;;  %3654 = vmatmul.mubr.bf16.gmra.mrb[72].mxu0 %v4018_v15 }
 0x18c   :  { %3657 = vmatprep.mubr.bf16.mxu0 %v4025_v16 }
 0x192   :  { %1131 = vmatmul.mubr.bf16.gmra.mrb[44].mxu1 %v4013_v17 }
 0x193   :  { %1138 = vmatprep.mubr.bf16.mxu1 %v4014_v18  ;;  %3658 = vmatmul.mubr.bf16.gmra.mrb[76].mxu0 %v4026_v19 }
 0x194   :  { %3661 = vmatprep.mubr.bf16.mxu0 %v4033_v20 }
 0x19a   :  { %1139 = vmatmul.mubr.bf16.gmra.mrb[48].mxu1 %v4016_v21 }
 0x19b   :  { %1146 = vmatprep.mubr.bf16.mxu1 %v4019_v22  ;;  %3662 = vmatmul.mubr.bf16.gmra.mrb[80].mxu0 %v4034_v23 }
 0x19c   :  { %3665 = vmatprep.mubr.bf16.mxu0 %v4041_v25 }
 0x1a2   :  { %1147 = vmatmul.mubr.bf16.gmra.mrb[52].mxu1 %v4021_v27 }
 0x1a3   :  { %1154 = vmatprep.mubr.bf16.mxu1 %v4022_v28  ;;  %3666 = vmatmul.mubr.bf16.gmra.mrb[84].mxu0 %v4042_v29 }
 0x1a4   :  { %3669 = vmatprep.mubr.bf16.mxu0 %v4049_v31 }
 0x1aa   :  { %1155 = vmatmul.mubr.bf16.gmra.mrb[56].mxu1 %v4024_v35 }
 0x1ab   :  { %1162 = vmatprep.mubr.bf16.mxu1 %v4027_v36  ;;  %3670 = vmatmul.mubr.bf16.gmra.mrb[88].mxu0 %v4050_v37 }
 0x1ac   :  { %3673 = vmatprep.mubr.bf16.mxu0 %v4057_v39 }
 0x1b2   :  { %1163 = vmatmul.mubr.bf16.gmra.mrb[60].mxu1 %v4029_v41 }
 0x1b3   :  { %1170 = vmatprep.mubr.bf16.mxu1 %v4030_v42  ;;  %3674 = vmatmul.mubr.bf16.gmra.mrb[92].mxu0 %v4058_v43 }
 0x1ba   :  { %1171 = vmatmul.mubr.bf16.gmra.mrb[64].mxu1 %v4032_v46 }
 0x1bb   :  { %1178 = vmatprep.mubr.bf16.mxu1 %v4035_v47 }
 0x1c2   :  { %1179 = vmatmul.mubr.bf16.gmra.mrb[68].mxu1 %v4037_v48 }
 0x1c3   :  { %1186 = vmatprep.mubr.bf16.mxu1 %v4038_v49 }
 0x1ca   :  { %1187 = vmatmul.mubr.bf16.gmra.mrb[72].mxu1 %v4040_v50 }
 0x1cb   :  { %1194 = vmatprep.mubr.bf16.mxu1 %v4043_v51 }
 0x1d2   :  { %1195 = vmatmul.mubr.bf16.gmra.mrb[76].mxu1 %v4045_v52 }
 0x1d3   :  { %1202 = vmatprep.mubr.bf16.mxu1 %v4046_v53 }
 0x1da   :  { %1203 = vmatmul.mubr.bf16.gmra.mrb[80].mxu1 %v4048_v54 }
 0x1db   :  { %1210 = vmatprep.mubr.bf16.mxu1 %v4051_v55 }
 0x1e2   :  { %1211 = vmatmul.mubr.bf16.gmra.mrb[84].mxu1 %v4053_v56 }
 0x1e3   :  { %1218 = vmatprep.mubr.bf16.mxu1 %v4054_v57 }
 0x1ea   :  { %1219 = vmatmul.mubr.bf16.gmra.mrb[88].mxu1 %v4056_v58 }
 0x1eb   :  { %1226 = vmatprep.mubr.bf16.mxu1 %v4059_v59 }
 0x1f2   :  { %1227 = vmatmul.mubr.bf16.gmra.mrb[92].mxu1 %v4061_v60 }
 0x1f3   :  { %1886 = vmatprep.mubr.bf16.mxu1 %v4347_v33  ;;  %v4607_v33 = vld [vmem:[%s5505_s3] ss:$0 sm:$0xff] }
 0x20d   :  { %v1044_v61 = vpop.f32.mrb[0].mxu1 }
 0x20e   :  { %v1046_v62 = vpop.f32.mrb[1].mxu1  ;;  %v1045_v17 = vadd.f32 %v4607_v33, %v1044_v61 }
 0x20f   :  { %v1047_v63 = vpop.f32.mrb[2].mxu1 }
 0x210   :  { %v1049_v0 = vpop.f32.mrb[3].mxu1  ;;  %v1048_v25 = vadd.f32 %v4607_v33, %v1047_v63 }
 0x215   :  { %v1052_v1 = vpop.f32.mrb[4].mxu1 }
 0x216   :  { %v1054_v2 = vpop.f32.mrb[5].mxu1  ;;  %v1053_v14 = vadd.f32 %v4607_v33, %v1052_v1 }
 0x217   :  { %v1055_v3 = vpop.f32.mrb[6].mxu1 }
 0x218   :  { %v1057_v4 = vpop.f32.mrb[7].mxu1  ;;  %v1056_v21 = vadd.f32 %v4607_v33, %v1055_v3 }
 0x21d   :  { %v1060_v5 = vpop.f32.mrb[8].mxu1 }
 0x21e   :  { %v1062_v6 = vpop.f32.mrb[9].mxu1  ;;  %v1061_v41 = vadd.f32 %v4607_v33, %v1060_v5 }
 0x21f   :  { %v1063_v7 = vpop.f32.mrb[10].mxu1 }
 0x220   :  { %v1065_v8 = vpop.f32.mrb[11].mxu1  ;;  %v1064_v49 = vadd.f32 %v4607_v33, %v1063_v7 }
 0x225   :  { %v1068_v9 = vpop.f32.mrb[12].mxu1 }
 0x226   :  { %v1070_v10 = vpop.f32.mrb[13].mxu1  ;;  %v1069_v37 = vadd.f32 %v4607_v33, %v1068_v9 }
 0x227   :  { %v1071_v11 = vpop.f32.mrb[14].mxu1 }
 0x228   :  { %v1073_v12 = vpop.f32.mrb[15].mxu1  ;;  %v1072_v45 = vadd.f32 %v4607_v33, %v1071_v11 }
 0x22d   :  { %v1076_v13 = vpop.f32.mrb[16].mxu1 }
 0x22e   :  { %v1078_v15 = vpop.f32.mrb[17].mxu1  ;;  %v3631_v16 = vpop.f32.mrb[48].mxu0  ;;  %v1077_v63 = vadd.f32 %v4607_v33, %v1076_v13 }
 0x22f   :  { %v1278_v18 = vadd.f32 %v3631_v16, %v1053_v14  ;;  %v1079_v19 = vpop.f32.mrb[18].mxu1  ;;  %v1269_v20 = vpop.f32.mrb[49].mxu0 }
 0x230   :  { %v1270_v22 = vadd.f32 %v1269_v20, %v1045_v17  ;;  %v1081_v23 = vpop.f32.mrb[19].mxu1  ;;  %v3632_v24 = vpop.f32.mrb[50].mxu0  ;;  %v1080_v7 = vadd.f32 %v4607_v33, %v1079_v19 }
 0x231   :  { %v1281_v26 = vadd.f32 %v3632_v24, %v1056_v21  ;;  %v1272_v27 = vpop.f32.mrb[51].mxu0  ;;  %v1462_v29 = vmax.f32 %v1278_v18, 0.0 }
 0x232   :  { %v1273_v28 = vadd.f32 %v1272_v27, %v1048_v25  ;;  %v1460_v31 = vmax.f32 %v1270_v22, 0.0 }
 0x233   :  { %v1463_v30 = vmax.f32 %v1281_v26, 0.0 }
 0x234   :  { %v1461_v34 = vmax.f32 %v1273_v28, 0.0 }
 0x235   :  { %v1509_v35 = vpack.c.bf16 %v1463_v30, %v1462_v29  ;;  %v1084_v36 = vpop.f32.mrb[20].mxu1 }
 0x236   :  { %v1508_v38 = vpack.c.bf16 %v1461_v34, %v1460_v31  ;;  %v1086_v39 = vpop.f32.mrb[21].mxu1  ;;  %v3635_v40 = vpop.f32.mrb[52].mxu0  ;;  %v1085_v59 = vadd.f32 %v4607_v33, %v1084_v36 }
 0x237   :  { %v1294_v42 = vadd.f32 %v3635_v40, %v1069_v37  ;;  %v1087_v43 = vpop.f32.mrb[22].mxu1  ;;  %v1285_v44 = vpop.f32.mrb[53].mxu0 }
 0x238   :  { %v1286_v46 = vadd.f32 %v1285_v44, %v1061_v41  ;;  %v1089_v47 = vpop.f32.mrb[23].mxu1  ;;  %v3636_v48 = vpop.f32.mrb[54].mxu0  ;;  %3693 = vmatprep.mubr.bf16.mxu0 %v1508_v38  ;;  %v1088_v3 = vadd.f32 %v4607_v33, %v1087_v43 }
 0x239   :  { %v1297_v50 = vadd.f32 %v3636_v48, %v1072_v45  ;;  %v1288_v51 = vpop.f32.mrb[55].mxu0  ;;  %3694 = vmatmul.mubr.bf16.vlgmr.msra.gmra.mrb[96].mxu0 %v1509_v35  ;;  %v1466_v53 = vmax.f32 %v1294_v42, 0.0 }
 0x23a   :  { %v1289_v52 = vadd.f32 %v1288_v51, %v1064_v49  ;;  %v1464_v55 = vmax.f32 %v1286_v46, 0.0 }
 0x23b   :  { %v1467_v54 = vmax.f32 %v1297_v50, 0.0 }
 0x23c   :  { %v1465_v56 = vmax.f32 %v1289_v52, 0.0 }
 0x23d   :  { %v1511_v57 = vpack.c.bf16 %v1467_v54, %v1466_v53  ;;  %v1092_v58 = vpop.f32.mrb[24].mxu1 }
 0x23e   :  { %v1510_v60 = vpack.c.bf16 %v1465_v56, %v1464_v55  ;;  %v1094_v61 = vpop.f32.mrb[25].mxu1  ;;  %v3639_v62 = vpop.f32.mrb[56].mxu0  ;;  %v1093_v22 = vadd.f32 %v4607_v33, %v1092_v58 }
 0x23f   :  { %v1310_v0 = vadd.f32 %v3639_v62, %v1085_v59  ;;  %v1095_v1 = vpop.f32.mrb[26].mxu1  ;;  %v1301_v2 = vpop.f32.mrb[57].mxu0 }
 0x240   :  { %v1302_v4 = vadd.f32 %v1301_v2, %v1077_v63  ;;  %v1097_v5 = vpop.f32.mrb[27].mxu1  ;;  %v3640_v6 = vpop.f32.mrb[58].mxu0  ;;  %3697 = vmatprep.mubr.bf16.mxu0 %v1510_v60  ;;  %v1096_v29 = vadd.f32 %v4607_v33, %v1095_v1 }
 0x241   :  { %v1313_v8 = vadd.f32 %v3640_v6, %v1088_v3  ;;  %v1304_v9 = vpop.f32.mrb[59].mxu0  ;;  %3698 = vmatmul.mubr.bf16.gmra.mrb[100].mxu0 %v1511_v57  ;;  %v1470_v11 = vmax.f32 %v1310_v0, 0.0 }
 0x242   :  { %v1305_v10 = vadd.f32 %v1304_v9, %v1080_v7  ;;  %v1468_v14 = vmax.f32 %v1302_v4, 0.0 }
 0x243   :  { %v1471_v12 = vmax.f32 %v1313_v8, 0.0 }
 0x244   :  { %v1469_v15 = vmax.f32 %v1305_v10, 0.0 }
 0x245   :  { %v1513_v13 = vpack.c.bf16 %v1471_v12, %v1470_v11  ;;  %v1100_v16 = vpop.f32.mrb[28].mxu1 }
 0x246   :  { %v1512_v17 = vpack.c.bf16 %v1469_v15, %v1468_v14  ;;  %v1102_v18 = vpop.f32.mrb[29].mxu1  ;;  %v1101_v20 = vadd.f32 %v4607_v33, %v1100_v16  ;;  %v3643_v21 = vpop.f32.mrb[60].mxu0 }
 0x247   :  { %v1103_v23 = vpop.f32.mrb[30].mxu1  ;;  %v1317_v24 = vpop.f32.mrb[61].mxu0 }
 0x248   :  { %v1326_v19 = vadd.f32 %v3643_v21, %v1101_v20  ;;  %v1318_v25 = vadd.f32 %v1317_v24, %v1093_v22  ;;  %v1105_v26 = vpop.f32.mrb[31].mxu1  ;;  %v1104_v27 = vadd.f32 %v4607_v33, %v1103_v23  ;;  %v3644_v28 = vpop.f32.mrb[62].mxu0  ;;  %3701 = vmatprep.mubr.bf16.mxu0 %v1512_v17 }
 0x249   :  { %v1320_v30 = vpop.f32.mrb[63].mxu0  ;;  %3702 = vmatmul.mubr.bf16.gmra.mrb[104].mxu0 %v1513_v13 }
 0x24a   :  { %v1329_v31 = vadd.f32 %v3644_v28, %v1104_v27  ;;  %v1321_v34 = vadd.f32 %v1320_v30, %v1096_v29  ;;  %v1474_v35 = vmax.f32 %v1326_v19, 0.0  ;;  %v1472_v36 = vmax.f32 %v1318_v25, 0.0 }
 0x24c   :  { %v1475_v37 = vmax.f32 %v1329_v31, 0.0  ;;  %v1473_v38 = vmax.f32 %v1321_v34, 0.0 }
 0x24d   :  { %v1108_v39 = vpop.f32.mrb[32].mxu1 }
 0x24e   :  { %v1515_v40 = vpack.c.bf16 %v1475_v37, %v1474_v35  ;;  %v1514_v41 = vpack.c.bf16 %v1473_v38, %v1472_v36  ;;  %v1109_v42 = vadd.f32 %v4607_v33, %v1108_v39  ;;  %v1110_v43 = vpop.f32.mrb[33].mxu1  ;;  %v3647_v44 = vpop.f32.mrb[64].mxu0 }
 0x24f   :  { %v1111_v45 = vpop.f32.mrb[34].mxu1  ;;  %v1333_v46 = vpop.f32.mrb[65].mxu0 }
 0x250   :  { %v1112_v47 = vadd.f32 %v4607_v33, %v1111_v45  ;;  %v1334_v48 = vadd.f32 %v1333_v46, %v1109_v42  ;;  %v1113_v49 = vpop.f32.mrb[35].mxu1  ;;  %v3648_v50 = vpop.f32.mrb[66].mxu0  ;;  %3705 = vmatprep.mubr.bf16.mxu0 %v1514_v41 }
 0x251   :  { %v1336_v51 = vpop.f32.mrb[67].mxu0  ;;  %3706 = vmatmul.mubr.bf16.gmra.mrb[108].mxu0 %v1515_v40 }
 0x252   :  { %v1337_v52 = vadd.f32 %v1336_v51, %v1112_v47  ;;  %v1476_v53 = vmax.f32 %v1334_v48, 0.0 }
 0x254   :  { %v1477_v54 = vmax.f32 %v1337_v52, 0.0 }
 0x255   :  { %v1116_v55 = vpop.f32.mrb[36].mxu1 }
 0x256   :  { %v1516_v56 = vpack.c.bf16 %v1477_v54, %v1476_v53  ;;  %v1117_v57 = vadd.f32 %v4607_v33, %v1116_v55  ;;  %v1118_v58 = vpop.f32.mrb[37].mxu1  ;;  %v3651_v59 = vpop.f32.mrb[68].mxu0 }
 0x257   :  { %v1119_v60 = vpop.f32.mrb[38].mxu1  ;;  %v1349_v61 = vpop.f32.mrb[69].mxu0 }
 0x258   :  { %v1342_v62 = vadd.f32 %v3647_v44, %v1117_v57  ;;  %v1120_v63 = vadd.f32 %v4607_v33, %v1119_v60  ;;  %v1121_v0 = vpop.f32.mrb[39].mxu1  ;;  %3709 = vmatprep.mubr.bf16.mxu0 %v1516_v56  ;;  %v3652_v1 = vpop.f32.mrb[70].mxu0 }
 0x259   :  { %v1352_v2 = vpop.f32.mrb[71].mxu0 }
 0x25a   :  { %v1345_v3 = vadd.f32 %v3648_v50, %v1120_v63  ;;  %v1478_v4 = vmax.f32 %v1342_v62, 0.0 }
 0x25c   :  { %v1479_v5 = vmax.f32 %v1345_v3, 0.0 }
 0x25d   :  { %v1124_v6 = vpop.f32.mrb[40].mxu1 }
 0x25e   :  { %v1125_v7 = vadd.f32 %v4607_v33, %v1124_v6  ;;  %v1126_v8 = vpop.f32.mrb[41].mxu1  ;;  %v1517_v9 = vpack.c.bf16 %v1479_v5, %v1478_v4  ;;  %v3655_v10 = vpop.f32.mrb[72].mxu0 }
 0x25f   :  { %v1127_v11 = vpop.f32.mrb[42].mxu1  ;;  %v1365_v12 = vpop.f32.mrb[73].mxu0 }
 0x260   :  { %v1128_v14 = vadd.f32 %v4607_v33, %v1127_v11  ;;  %v1350_v15 = vadd.f32 %v1349_v61, %v1125_v7  ;;  %v1129_v13 = vpop.f32.mrb[43].mxu1  ;;  %3710 = vmatmul.mubr.bf16.gmra.mrb[112].mxu0 %v1517_v9  ;;  %v3656_v16 = vpop.f32.mrb[74].mxu0 }
 0x261   :  { %v1368_v17 = vpop.f32.mrb[75].mxu0 }
 0x262   :  { %v1353_v18 = vadd.f32 %v1352_v2, %v1128_v14  ;;  %v1480_v20 = vmax.f32 %v1350_v15, 0.0 }
 0x264   :  { %v1481_v21 = vmax.f32 %v1353_v18, 0.0 }
 0x265   :  { %v1132_v22 = vpop.f32.mrb[44].mxu1 }
 0x266   :  { %v1518_v23 = vpack.c.bf16 %v1481_v21, %v1480_v20  ;;  %v1133_v24 = vadd.f32 %v4607_v33, %v1132_v22  ;;  %v1134_v19 = vpop.f32.mrb[45].mxu1  ;;  %v4632_v25 = vpop.f32.mrb[76].mxu0 }
 0x267   :  { %v1135_v26 = vpop.f32.mrb[46].mxu1  ;;  %v1381_v27 = vpop.f32.mrb[77].mxu0 }
 0x268   :  { %v1358_v28 = vadd.f32 %v3651_v59, %v1133_v24  ;;  %v1136_v29 = vadd.f32 %v4607_v33, %v1135_v26  ;;  %v1137_v30 = vpop.f32.mrb[47].mxu1  ;;  %3713 = vmatprep.mubr.bf16.mxu0 %v1518_v23  ;;  %v4635_v31 = vpop.f32.mrb[78].mxu0 }
 0x269   :  { %v1384_v34 = vpop.f32.mrb[79].mxu0 }
 0x26a   :  { %v1361_v35 = vadd.f32 %v3652_v1, %v1136_v29  ;;  %v1482_v36 = vmax.f32 %v1358_v28, 0.0 }
 0x26c   :  { %v1483_v37 = vmax.f32 %v1361_v35, 0.0 }
 0x26d   :  { %v1140_v38 = vpop.f32.mrb[48].mxu1 }
 0x26e   :  { %v1141_v39 = vadd.f32 %v4607_v33, %v1140_v38  ;;  %v1142_v40 = vpop.f32.mrb[49].mxu1  ;;  %v1519_v41 = vpack.c.bf16 %v1483_v37, %v1482_v36  ;;  %v4638_v42 = vpop.f32.mrb[80].mxu0 }
 0x26f   :  { %v1143_v43 = vpop.f32.mrb[50].mxu1  ;;  %v4640_v44 = vpop.f32.mrb[81].mxu0 }
 0x270   :  { %v1144_v45 = vadd.f32 %v4607_v33, %v1143_v43  ;;  %v1366_v46 = vadd.f32 %v1365_v12, %v1141_v39  ;;  %v1145_v47 = vpop.f32.mrb[51].mxu1  ;;  %3714 = vmatmul.mubr.bf16.gmra.mrb[116].mxu0 %v1519_v41  ;;  %v4643_v48 = vpop.f32.mrb[82].mxu0 }
 0x271   :  { %v1400_v49 = vpop.f32.mrb[83].mxu0 }
 0x272   :  { %v1369_v50 = vadd.f32 %v1368_v17, %v1144_v45  ;;  %v1484_v51 = vmax.f32 %v1366_v46, 0.0 }
 0x274   :  { %v1485_v52 = vmax.f32 %v1369_v50, 0.0 }
 0x275   :  { %v1148_v53 = vpop.f32.mrb[52].mxu1 }
 0x276   :  { %v1520_v54 = vpack.c.bf16 %v1485_v52, %v1484_v51  ;;  %v1149_v55 = vadd.f32 %v4607_v33, %v1148_v53  ;;  %v1150_v56 = vpop.f32.mrb[53].mxu1  ;;  %v4646_v57 = vpop.f32.mrb[84].mxu0 }
 0x277   :  { %v1151_v58 = vpop.f32.mrb[54].mxu1  ;;  %v4648_v59 = vpop.f32.mrb[85].mxu0 }
 0x278   :  { %v1374_v60 = vadd.f32 %v3655_v10, %v1149_v55  ;;  %v1152_v61 = vadd.f32 %v4607_v33, %v1151_v58  ;;  %v1153_v62 = vpop.f32.mrb[55].mxu1  ;;  %3717 = vmatprep.mubr.bf16.mxu0 %v1520_v54  ;;  %v4651_v63 = vpop.f32.mrb[86].mxu0 }
 0x279   :  { %v4653_v0 = vpop.f32.mrb[87].mxu0 }
 0x27a   :  { %v1377_v1 = vadd.f32 %v3656_v16, %v1152_v61  ;;  %v1486_v2 = vmax.f32 %v1374_v60, 0.0 }
 0x27c   :  { %v1487_v3 = vmax.f32 %v1377_v1, 0.0 }
 0x27d   :  { %v1156_v4 = vpop.f32.mrb[56].mxu1 }
 0x27e   :  { %v1157_v5 = vadd.f32 %v4607_v33, %v1156_v4  ;;  %v1158_v6 = vpop.f32.mrb[57].mxu1  ;;  %v1521_v7 = vpack.c.bf16 %v1487_v3, %v1486_v2  ;;  %v4656_v8 = vpop.f32.mrb[88].mxu0 }
 0x27f   :  { %v1159_v9 = vpop.f32.mrb[58].mxu1  ;;  %v4658_v10 = vpop.f32.mrb[89].mxu0 }
 0x280   :  { %v1160_v11 = vadd.f32 %v4607_v33, %v1159_v9  ;;  %v1382_v12 = vadd.f32 %v1381_v27, %v1157_v5  ;;  %v1161_v14 = vpop.f32.mrb[59].mxu1  ;;  %3718 = vmatmul.mubr.bf16.gmra.mrb[120].mxu0 %v1521_v7  ;;  %v4661_v15 = vpop.f32.mrb[90].mxu0 }
 0x281   :  { %v4663_v13 = vpop.f32.mrb[91].mxu0 }
 0x282   :  { %v1385_v16 = vadd.f32 %v1384_v34, %v1160_v11  ;;  %v1488_v17 = vmax.f32 %v1382_v12, 0.0 }
 0x284   :  { %v1489_v18 = vmax.f32 %v1385_v16, 0.0 }
 0x285   :  { %v1164_v20 = vpop.f32.mrb[60].mxu1 }
 0x286   :  { %v1522_v21 = vpack.c.bf16 %v1489_v18, %v1488_v17  ;;  %v1165_v22 = vadd.f32 %v4607_v33, %v1164_v20  ;;  %v1166_v23 = vpop.f32.mrb[61].mxu1  ;;  %v4666_v24 = vpop.f32.mrb[92].mxu0 }
 0x287   :  { %v1167_v19 = vpop.f32.mrb[62].mxu1  ;;  %v4668_v26 = vpop.f32.mrb[93].mxu0 }
 0x288   :  { %v1390_v27 = vadd.f32 %v4632_v25, %v1165_v22  ;;  %v1168_v28 = vadd.f32 %v4607_v33, %v1167_v19  ;;  %v1169_v29 = vpop.f32.mrb[63].mxu1  ;;  %3721 = vmatprep.mubr.bf16.mxu0 %v1522_v21  ;;  %v4672_v30 = vpop.f32.mrb[94].mxu0 }
 0x289   :  { %v4674_v34 = vpop.f32.mrb[95].mxu0 }
 0x28a   :  { %v1393_v35 = vadd.f32 %v4635_v31, %v1168_v28  ;;  %v1490_v36 = vmax.f32 %v1390_v27, 0.0 }
 0x28c   :  { %v1491_v37 = vmax.f32 %v1393_v35, 0.0 }
 0x28d   :  { %v1172_v38 = vpop.f32.mrb[64].mxu1 }
 0x28e   :  { %v1173_v39 = vadd.f32 %v4607_v33, %v1172_v38  ;;  %v1174_v40 = vpop.f32.mrb[65].mxu1  ;;  %v1523_v41 = vpack.c.bf16 %v1491_v37, %v1490_v36 }
 0x28f   :  { %v1175_v43 = vpop.f32.mrb[66].mxu1 }
 0x290   :  { %v1176_v25 = vadd.f32 %v4607_v33, %v1175_v43  ;;  %v1398_v45 = vadd.f32 %v4640_v44, %v1173_v39  ;;  %v1177_v46 = vpop.f32.mrb[67].mxu1  ;;  %3722 = vmatmul.mubr.bf16.gmra.mrb[124].mxu0 %v1523_v41 }
 0x292   :  { %v1401_v47 = vadd.f32 %v1400_v49, %v1176_v25  ;;  %v1492_v50 = vmax.f32 %v1398_v45, 0.0 }
 0x294   :  { %v1493_v51 = vmax.f32 %v1401_v47, 0.0 }
 0x295   :  { %v1180_v52 = vpop.f32.mrb[68].mxu1 }
 0x296   :  { %v1524_v53 = vpack.c.bf16 %v1493_v51, %v1492_v50  ;;  %v1181_v31 = vadd.f32 %v4607_v33, %v1180_v52  ;;  %v1182_v54 = vpop.f32.mrb[69].mxu1 }
 0x297   :  { %v1183_v55 = vpop.f32.mrb[70].mxu1 }
 0x298   :  { %v1406_v56 = vadd.f32 %v4638_v42, %v1181_v31  ;;  %v1184_v58 = vadd.f32 %v4607_v33, %v1183_v55  ;;  %v1185_v60 = vpop.f32.mrb[71].mxu1  ;;  %3725 = vmatprep.mubr.bf16.mxu0 %v1524_v53 }
 0x29a   :  { %v1409_v61 = vadd.f32 %v4643_v48, %v1184_v58  ;;  %v1494_v44 = vmax.f32 %v1406_v56, 0.0 }
 0x29c   :  { %v1495_v62 = vmax.f32 %v1409_v61, 0.0 }
 0x29d   :  { %v1188_v1 = vpop.f32.mrb[72].mxu1 }
 0x29e   :  { %v1189_v49 = vadd.f32 %v4607_v33, %v1188_v1  ;;  %v1190_v2 = vpop.f32.mrb[73].mxu1  ;;  %v1525_v3 = vpack.c.bf16 %v1495_v62, %v1494_v44 }
 0x29f   :  { %v1191_v4 = vpop.f32.mrb[74].mxu1 }
 0x2a0   :  { %v1192_v5 = vadd.f32 %v4607_v33, %v1191_v4  ;;  %v1414_v6 = vadd.f32 %v4648_v59, %v1189_v49  ;;  %v1193_v7 = vpop.f32.mrb[75].mxu1  ;;  %3726 = vmatmul.mubr.bf16.gmra.mrb[128].mxu0 %v1525_v3 }
 0x2a2   :  { %v1417_v42 = vadd.f32 %v4653_v0, %v1192_v5  ;;  %v1496_v9 = vmax.f32 %v1414_v6, 0.0 }
 0x2a4   :  { %v1497_v11 = vmax.f32 %v1417_v42, 0.0 }
 0x2a5   :  { %v1196_v12 = vpop.f32.mrb[76].mxu1 }
 0x2a6   :  { %v1526_v48 = vpack.c.bf16 %v1497_v11, %v1496_v9  ;;  %v1197_v14 = vadd.f32 %v4607_v33, %v1196_v12  ;;  %v1198_v16 = vpop.f32.mrb[77].mxu1 }
 0x2a7   :  { %v1199_v17 = vpop.f32.mrb[78].mxu1 }
 0x2a8   :  { %v1422_v18 = vadd.f32 %v4646_v57, %v1197_v14  ;;  %v1200_v20 = vadd.f32 %v4607_v33, %v1199_v17  ;;  %v1201_v21 = vpop.f32.mrb[79].mxu1  ;;  %3729 = vmatprep.mubr.bf16.mxu0 %v1526_v48 }
 0x2aa   :  { %v1425_v59 = vadd.f32 %v4651_v63, %v1200_v20  ;;  %v1498_v22 = vmax.f32 %v1422_v18, 0.0 }
 0x2ac   :  { %v1499_v23 = vmax.f32 %v1425_v59, 0.0 }
 0x2ad   :  { %v1204_v19 = vpop.f32.mrb[80].mxu1 }
 0x2ae   :  { %v1205_v0 = vadd.f32 %v4607_v33, %v1204_v19  ;;  %v1206_v27 = vpop.f32.mrb[81].mxu1  ;;  %v1527_v28 = vpack.c.bf16 %v1499_v23, %v1498_v22 }
 0x2af   :  { %v1207_v29 = vpop.f32.mrb[82].mxu1 }
 0x2b0   :  { %v1208_v35 = vadd.f32 %v4607_v33, %v1207_v29  ;;  %v1430_v36 = vadd.f32 %v4658_v10, %v1205_v0  ;;  %v1209_v37 = vpop.f32.mrb[83].mxu1  ;;  %3730 = vmatmul.mubr.bf16.gmra.mrb[132].mxu0 %v1527_v28 }
 0x2b2   :  { %v1433_v57 = vadd.f32 %v4663_v13, %v1208_v35  ;;  %v1500_v38 = vmax.f32 %v1430_v36, 0.0 }
 0x2b4   :  { %v1501_v39 = vmax.f32 %v1433_v57, 0.0 }
 0x2b5   :  { %v1212_v40 = vpop.f32.mrb[84].mxu1 }
 0x2b6   :  { %v1528_v63 = vpack.c.bf16 %v1501_v39, %v1500_v38  ;;  %v1213_v41 = vadd.f32 %v4607_v33, %v1212_v40  ;;  %v1214_v43 = vpop.f32.mrb[85].mxu1 }
 0x2b7   :  { %v1215_v25 = vpop.f32.mrb[86].mxu1 }
 0x2b8   :  { %v1438_v45 = vadd.f32 %v4656_v8, %v1213_v41  ;;  %v1216_v46 = vadd.f32 %v4607_v33, %v1215_v25  ;;  %v1217_v47 = vpop.f32.mrb[87].mxu1  ;;  %3733 = vmatprep.mubr.bf16.mxu0 %v1528_v63 }
 0x2ba   :  { %v1441_v10 = vadd.f32 %v4661_v15, %v1216_v46  ;;  %v1502_v50 = vmax.f32 %v1438_v45, 0.0 }
 0x2bc   :  { %v1503_v51 = vmax.f32 %v1441_v10, 0.0 }
 0x2bd   :  { %v1220_v52 = vpop.f32.mrb[88].mxu1 }
 0x2be   :  { %v1221_v13 = vadd.f32 %v4607_v33, %v1220_v52  ;;  %v1222_v53 = vpop.f32.mrb[89].mxu1  ;;  %v1529_v31 = vpack.c.bf16 %v1503_v51, %v1502_v50 }
 0x2bf   :  { %v1223_v54 = vpop.f32.mrb[90].mxu1 }
 0x2c0   :  { %v1224_v55 = vadd.f32 %v4607_v33, %v1223_v54  ;;  %v1446_v56 = vadd.f32 %v4668_v26, %v1221_v13  ;;  %v1225_v58 = vpop.f32.mrb[91].mxu1  ;;  %3734 = vmatmul.mubr.bf16.gmra.mrb[136].mxu0 %v1529_v31 }
 0x2c2   :  { %v1449_v8 = vadd.f32 %v4674_v34, %v1224_v55  ;;  %v1504_v60 = vmax.f32 %v1446_v56, 0.0  ;;  %v4078_v34 = vld [vmem:[%s5504_s0 + $0x8] ss:$12 sps:$4 sm:$0xff]  }
 0x2c4   :  { %v1505_v61 = vmax.f32 %v1449_v8, 0.0 }
 0x2c5   :  { %v1228_v44 = vpop.f32.mrb[92].mxu1 }
 0x2c6   :  { %v1530_v15 = vpack.c.bf16 %v1505_v61, %v1504_v60  ;;  %v1229_v62 = vadd.f32 %v4607_v33, %v1228_v44  ;;  %v1230_v1 = vpop.f32.mrb[93].mxu1  ;;  %v4079_v60 = vld [vmem:[%s5504_s0] ss:$12 sps:$4 sm:$0xff]   ;;  %v4080_v61 = vld [vmem:[%s5504_s0 + $0x1c] ss:$12 sps:$4 sm:$0xff]  }
 0x2c7   :  { %v1231_v49 = vpop.f32.mrb[94].mxu1 }
 0x2c8   :  { %v1454_v2 = vadd.f32 %v4666_v24, %v1229_v62  ;;  %v1232_v3 = vadd.f32 %v4607_v33, %v1231_v49  ;;  %v1233_v4 = vpop.f32.mrb[95].mxu1  ;;  %3737 = vmatprep.mubr.bf16.mxu0 %v1530_v15 }
 0x2c9   :  { %v4082_v4 = vld [vmem:[%s5504_s0 + $0x34] ss:$12 sps:$4 sm:$0xff]  }
 0x2ca   :  { %v1457_v26 = vadd.f32 %v4672_v30, %v1232_v3  ;;  %v1506_v5 = vmax.f32 %v1454_v2, 0.0  ;;  %v4081_v3 = vld [vmem:[%s5504_s0 + $0x18] ss:$12 sps:$4 sm:$0xff]  }
 0x2cc   :  { %v1507_v6 = vmax.f32 %v1457_v26, 0.0  ;;  %v4083_v26 = vld [vmem:[%s5504_s0 + $0x30] ss:$12 sps:$4 sm:$0xff]  }
 0x2ce   :  { %v1531_v7 = vpack.c.bf16 %v1507_v6, %v1506_v5  ;;  %v4084_v5 = vld [vmem:[%s5504_s0 + $0x4c] ss:$12 sps:$4 sm:$0xff]  }
 0x2d0   :  { %3738 = vmatmul.mubr.bf16.gmra.mrb[140].mxu0 %v1531_v7 }
 0x2d1   :  { %3757 = vmatprep.mubr.bf16.mxu0 %v4078_v34 }
 0x30c   :  { %v3695_v42 = vpop.f32.mrb[96].mxu0 }
 0x30d   :  { %v1631_v9 = vpop.f32.mrb[97].mxu0 }
 0x30e   :  { %v3696_v11 = vpop.f32.mrb[98].mxu0 }
 0x30f   :  { %v1823_v12 = vpack.c.bf16 %v3696_v11, %v3695_v42  ;;  %v1634_v24 = vpop.f32.mrb[99].mxu0 }
 0x310   :  { %v1822_v48 = vpack.c.bf16 %v1634_v24, %v1631_v9  ;;  %v4086_v24 = vld [vmem:[%s5504_s0 + $0x64] ss:$12 sps:$4 sm:$0xff]  }
 0x312   :  { %1855 = vmatpush1.bf16.msra.mxu1 %v1822_v48  ;;  %v4087_v48 = vld [vmem:[%s5504_s0 + $0x60] ss:$12 sps:$4 sm:$0xff]  }
 0x313   :  { %1856 = vmatprep.subr.bf16.mxu1 %v4221_v32 }
 0x314   :  { %v3699_v33 = vpop.f32.mrb[100].mxu0 }
 0x315   :  { %v1647_v30 = vpop.f32.mrb[101].mxu0 }
 0x316   :  { %v3700_v14 = vpop.f32.mrb[102].mxu0  ;;  %1857 = vmatpush1.bf16.msra.mxu1 %v1823_v12  ;;  %v4085_v12 = vld [vmem:[%s5504_s0 + $0x48] ss:$12 sps:$4 sm:$0xff]  }
 0x317   :  { %v1825_v16 = vpack.c.bf16 %v3700_v14, %v3699_v33  ;;  %v1650_v17 = vpop.f32.mrb[103].mxu0  ;;  %1858 = vmatprep.subr.bf16.mxu1 %v4221_v32  ;;  %v4088_v33 = vld [vmem:[%s5504_s0 + $0x7c] ss:$12 sps:$4 sm:$0xff]  }
 0x318   :  { %v1824_v18 = vpack.c.bf16 %v1650_v17, %v1647_v30 }
 0x31a   :  { %1859 = vmatpush1.bf16.msra.mxu1 %v1824_v18 }
 0x31b   :  { %1860 = vmatprep.subr.bf16.mxu1 %v4221_v32 }
 0x31c   :  { %v3703_v20 = vpop.f32.mrb[104].mxu0 }
 0x31d   :  { %v1663_v21 = vpop.f32.mrb[105].mxu0 }
 0x31e   :  { %v3704_v59 = vpop.f32.mrb[106].mxu0  ;;  %1861 = vmatpush1.bf16.msra.mxu1 %v1825_v16 }
 0x31f   :  { %v1827_v22 = vpack.c.bf16 %v3704_v59, %v3703_v20  ;;  %v1666_v23 = vpop.f32.mrb[107].mxu0  ;;  %1862 = vmatprep.subr.bf16.mxu1 %v4221_v32  ;;  %v4090_v59 = vld [vmem:[%s5504_s0 + $0x94] ss:$12 sps:$4 sm:$0xff]  }
 0x320   :  { %v1826_v19 = vpack.c.bf16 %v1666_v23, %v1663_v21  ;;  %v4089_v21 = vld [vmem:[%s5504_s0 + $0x78] ss:$12 sps:$4 sm:$0xff]  }
 0x321   :  { %v4092_v23 = vld [vmem:[%s5504_s0 + $0xac] ss:$12 sps:$4 sm:$0xff]  }
 0x322   :  { %1863 = vmatpush1.bf16.msra.mxu1 %v1826_v19 }
 0x323   :  { %1864 = vmatprep.subr.bf16.mxu1 %v4221_v32 }
 0x324   :  { %v3707_v0 = vpop.f32.mrb[108].mxu0 }
 0x325   :  { %v1679_v27 = vpop.f32.mrb[109].mxu0 }
 0x326   :  { %v3708_v28 = vpop.f32.mrb[110].mxu0  ;;  %1865 = vmatpush1.bf16.msra.mxu1 %v1827_v22  ;;  %v4091_v22 = vld [vmem:[%s5504_s0 + $0x90] ss:$12 sps:$4 sm:$0xff]  }
 0x327   :  { %v1829_v29 = vpack.c.bf16 %v3708_v28, %v3707_v0  ;;  %v1682_v35 = vpop.f32.mrb[111].mxu0  ;;  %1866 = vmatprep.subr.bf16.mxu1 %v4221_v32 }
 0x328   :  { %v1828_v36 = vpack.c.bf16 %v1682_v35, %v1679_v27 }
 0x32a   :  { %1867 = vmatpush1.bf16.msra.mxu1 %v1828_v36  ;;  %v4093_v36 = vld [vmem:[%s5504_s0 + $0xa8] ss:$12 sps:$4 sm:$0xff]  }
 0x32b   :  { %1868 = vmatprep.subr.bf16.mxu1 %v4221_v32 }
 0x32e   :  { %1869 = vmatpush1.bf16.msra.mxu1 %v1829_v29 }
 0x32f   :  { %1870 = vmatprep.subr.bf16.mxu1 %v4221_v32 }
 0x333   :  { %v3711_v37 = vpop.f32.mrb[112].mxu0 }
 0x334   :  { %v1695_v57 = vpop.f32.mrb[113].mxu0 }
 0x335   :  { %v3712_v38 = vpop.f32.mrb[114].mxu0 }
 0x336   :  { %v1831_v39 = vpack.c.bf16 %v3712_v38, %v3711_v37  ;;  %v1698_v40 = vpop.f32.mrb[115].mxu0  ;;  %v4094_v37 = vld [vmem:[%s5504_s0 + $0xc4] ss:$12 sps:$4 sm:$0xff]   ;;  %v4071_v38 = vld [vmem:[%s5502_s2 + $0x88] sm:$0xff]  }
 0x337   :  { %v1830_v63 = vpack.c.bf16 %v1698_v40, %v1695_v57  ;;  %v4070_v57 = vld [vmem:[%s5502_s2 + $0x80] sm:$0xff]  }
 0x338   :  { %v4096_v40 = vld [vmem:[%s5504_s0 + $0x20] ss:$12 sps:$4 sm:$0xff]  }
 0x339   :  { %1871 = vmatpush1.bf16.msra.mxu1 %v1830_v63  ;;  %v4097_v63 = vld [vmem:[%s5504_s0 + $0xdc] ss:$12 sps:$4 sm:$0xff]  }
 0x33a   :  { %1872 = vmatprep.subr.bf16.mxu1 %v4221_v32 }
 0x33d   :  { %1873 = vmatpush1.bf16.msra.mxu1 %v1831_v39  ;;  %v4095_v39 = vld [vmem:[%s5504_s0 + $0xc0] ss:$12 sps:$4 sm:$0xff]  }
 0x33e   :  { %1874 = vmatprep.subr.bf16.mxu1 %v4221_v32 }
 0x343   :  { %v3715_v41 = vpop.f32.mrb[116].mxu0 }
 0x344   :  { %v1711_v43 = vpop.f32.mrb[117].mxu0 }
 0x345   :  { %v3716_v25 = vpop.f32.mrb[118].mxu0 }
 0x346   :  { %v1833_v45 = vpack.c.bf16 %v3716_v25, %v3715_v41  ;;  %v1714_v46 = vpop.f32.mrb[119].mxu0  ;;  %v4098_v41 = vld [vmem:[%s5504_s0 + $0x38] ss:$12 sps:$4 sm:$0xff]  }
 0x347   :  { %v1832_v47 = vpack.c.bf16 %v1714_v46, %v1711_v43  ;;  %v4072_v43 = vld [vmem:[%s5502_s2 + $0x90] sm:$0xff]   ;;  %v4099_v25 = vld [vmem:[%s5504_s0 + $0xd8] ss:$12 sps:$4 sm:$0xff]  }
 0x348   :  { %v4101_v46 = vld [vmem:[%s5504_s0 + $0xf4] ss:$12 sps:$4 sm:$0xff]  }
 0x349   :  { %1875 = vmatpush1.bf16.msra.mxu1 %v1832_v47  ;;  %v4102_v47 = vld [vmem:[%s5504_s0 + $0x68] ss:$12 sps:$4 sm:$0xff]  }
 0x34a   :  { %1876 = vmatprep.subr.bf16.mxu1 %v4221_v32 }
 0x34d   :  { %1877 = vmatpush1.bf16.msra.mxu1 %v1833_v45  ;;  %v4100_v45 = vld [vmem:[%s5504_s0 + $0x50] ss:$12 sps:$4 sm:$0xff]  }
 0x34e   :  { %1878 = vmatprep.subr.bf16.mxu1 %v4221_v32 }
 0x353   :  { %v3719_v10 = vpop.f32.mrb[120].mxu0 }
 0x354   :  { %v1727_v50 = vpop.f32.mrb[121].mxu0 }
 0x355   :  { %v3720_v51 = vpop.f32.mrb[122].mxu0 }
 0x356   :  { %v1835_v52 = vpack.c.bf16 %v3720_v51, %v3719_v10  ;;  %v1730_v13 = vpop.f32.mrb[123].mxu0  ;;  %v4103_v10 = vld [vmem:[%s5504_s0 + $0xf0] ss:$12 sps:$4 sm:$0xff]   ;;  %v4105_v51 = vld [vmem:[%s5504_s0 + $0x10c] ss:$12 sps:$4 sm:$0xff]  }
 0x357   :  { %v1834_v53 = vpack.c.bf16 %v1730_v13, %v1727_v50  ;;  %v4104_v50 = vld [vmem:[%s5504_s0 + $0x80] ss:$12 sps:$4 sm:$0xff]   ;;  %v4073_v13 = vld [vmem:[%s5502_s2 + $0x98] sm:$0xff]  }
 0x359   :  { %1879 = vmatpush1.bf16.msra.mxu1 %v1834_v53  ;;  %v4074_v53 = vld [vmem:[%s5502_s2 + $0xa0] sm:$0xff]  }
 0x35a   :  { %1880 = vmatprep.subr.bf16.mxu1 %v4221_v32 }
 0x35d   :  { %1881 = vmatpush1.bf16.msra.mxu1 %v1835_v52  ;;  %v4106_v52 = vld [vmem:[%s5504_s0 + $0x98] ss:$12 sps:$4 sm:$0xff]  }
 0x35e   :  { %1882 = vmatprep.subr.bf16.mxu1 %v4221_v32 }
 0x363   :  { %v3723_v31 = vpop.f32.mrb[124].mxu0 }
 0x364   :  { %v1743_v54 = vpop.f32.mrb[125].mxu0 }
 0x365   :  { %v3724_v55 = vpop.f32.mrb[126].mxu0 }
 0x366   :  { %v1837_v56 = vpack.c.bf16 %v3724_v55, %v3723_v31  ;;  %v1746_v58 = vpop.f32.mrb[127].mxu0  ;;  %v4107_v31 = vld [vmem:[%s5504_s0 + $0x108] ss:$12 sps:$4 sm:$0xff]   ;;  %v4109_v55 = vld [vmem:[%s5504_s0 + $0x124] ss:$12 sps:$4 sm:$0xff]  }
 0x367   :  { %v1836_v8 = vpack.c.bf16 %v1746_v58, %v1743_v54  ;;  %v4108_v54 = vld [vmem:[%s5504_s0 + $0xb0] ss:$12 sps:$4 sm:$0xff]   ;;  %v4075_v58 = vld [vmem:[%s5502_s2 + $0xa8] sm:$0xff]  }
 0x369   :  { %1883 = vmatpush1.bf16.msra.mxu1 %v1836_v8  ;;  %v4111_v8 = vld [vmem:[%s5504_s0 + $0x120] ss:$12 sps:$4 sm:$0xff]  }
 0x36a   :  { %1884 = vmatprep.subr.bf16.mxu1 %v4221_v32 }
 0x36d   :  { %1885 = vmatpush1.bf16.msra.mxu1 %v1837_v56  ;;  %v4110_v56 = vld [vmem:[%s5504_s0 + $0xc8] ss:$12 sps:$4 sm:$0xff]  }
 0x36e   :  { %2698 = vmatprep.subr.bf16.mxu1 %v4221_v32 }
 0x370   :  { %1887 = vmatmul.mubr.bf16.vlgmr.msra.gmra.mrb[96].mxu1 %v4079_v60  ;;  %v4112_v60 = vld [vmem:[%s5504_s0 + $0xe0] ss:$12 sps:$4 sm:$0xff]  }
 0x371   :  { %1894 = vmatprep.mubr.bf16.mxu1 %v4080_v61  ;;  %v4113_v61 = vld [vmem:[%s5504_s0 + $0x13c] ss:$12 sps:$4 sm:$0xff]  }
 0x373   :  { %v3727_v44 = vpop.f32.mrb[128].mxu0 }
 0x374   :  { %v1759_v15 = vpop.f32.mrb[129].mxu0 }
 0x375   :  { %v3728_v62 = vpop.f32.mrb[130].mxu0 }
 0x376   :  { %v1839_v1 = vpack.c.bf16 %v3728_v62, %v3727_v44  ;;  %v1762_v49 = vpop.f32.mrb[131].mxu0  ;;  %v4114_v44 = vld [vmem:[%s5504_s0 + $0xf8] ss:$12 sps:$4 sm:$0xff]   ;;  %v4116_v62 = vld [vmem:[%s5504_s0 + $0x110] ss:$12 sps:$4 sm:$0xff]  }
 0x377   :  { %v1838_v2 = vpack.c.bf16 %v1762_v49, %v1759_v15  ;;  %v4115_v15 = vld [vmem:[%s5504_s0 + $0x138] ss:$12 sps:$4 sm:$0xff]   ;;  %v4118_v49 = vld [vmem:[%s5504_s0 + $0x128] ss:$12 sps:$4 sm:$0xff]  }
 0x378   :  { %1895 = vmatmul.mubr.bf16.gmra.mrb[100].mxu1 %v4081_v3  ;;  %v4120_v3 = vld [vmem:[%s5504_s0 + $0x16c] ss:$12 sps:$4 sm:$0xff]  }
 0x379   :  { %3741 = vmatprep.subr.bf16.mxu0 %v1838_v2  ;;  %1902 = vmatprep.mubr.bf16.mxu1 %v4082_v4  ;;  %v4121_v4 = vld [vmem:[%s5504_s0 + $0x140] ss:$12 sps:$4 sm:$0xff]  }
 0x37a   :  { %3742 = vmatpush3.bf16.msra.mxu0 %v1838_v2  ;;  %v4119_v2 = vld [vmem:[%s5504_s0 + $0x150] ss:$12 sps:$4 sm:$0xff]  }
 0x37b   :  { %3743 = vmatprep.subr.bf16.mxu0 %v1839_v1 }
 0x37e   :  { %3744 = vmatpush3.bf16.msra.mxu0 %v1839_v1  ;;  %v4117_v1 = vld [vmem:[%s5504_s0 + $0x154] ss:$12 sps:$4 sm:$0xff]  }
 0x380   :  { %1903 = vmatmul.mubr.bf16.gmra.mrb[104].mxu1 %v4083_v26  ;;  %v4122_v26 = vld [vmem:[%s5504_s0 + $0x158] ss:$12 sps:$4 sm:$0xff]  }
 0x381   :  { %1910 = vmatprep.mubr.bf16.mxu1 %v4084_v5  ;;  %v4123_v5 = vld [vmem:[%s5504_s0 + $0x168] ss:$12 sps:$4 sm:$0xff]  }
 0x383   :  { %v3731_v6 = vpop.f32.mrb[132].mxu0 }
 0x384   :  { %v1775_v7 = vpop.f32.mrb[133].mxu0 }
 0x385   :  { %v3732_v34 = vpop.f32.mrb[134].mxu0 }
 0x386   :  { %v1841_v42 = vpack.c.bf16 %v3732_v34, %v3731_v6  ;;  %v1778_v9 = vpop.f32.mrb[135].mxu0  ;;  %v4124_v6 = vld [vmem:[%s5504_s0 + $0x184] ss:$12 sps:$4 sm:$0xff]   ;;  %v4126_v34 = vld [vmem:[%s5504_s0 + $0x188] ss:$12 sps:$4 sm:$0xff]  }
 0x387   :  { %v1840_v11 = vpack.c.bf16 %v1778_v9, %v1775_v7  ;;  %v4125_v7 = vld [vmem:[%s5504_s0 + $0x170] ss:$12 sps:$4 sm:$0xff]  }
 0x388   :  { %1911 = vmatmul.mubr.bf16.gmra.mrb[108].mxu1 %v4085_v12  ;;  %v4128_v9 = vld [vmem:[%s5504_s0 + $0x19c] ss:$12 sps:$4 sm:$0xff]   ;;  %v4130_v12 = vld [vmem:[%s5504_s0 + $0x1b8] ss:$12 sps:$4 sm:$0xff]  }
 0x389   :  { %3745 = vmatprep.subr.bf16.mxu0 %v1840_v11  ;;  %1918 = vmatprep.mubr.bf16.mxu1 %v4086_v24  ;;  %v4131_v24 = vld [vmem:[%s5504_s0 + $0x198] ss:$12 sps:$4 sm:$0xff]  }
 0x38a   :  { %3746 = vmatpush3.bf16.msra.mxu0 %v1840_v11  ;;  %v4129_v11 = vld [vmem:[%s5504_s0 + $0x1a0] ss:$12 sps:$4 sm:$0xff]  }
 0x38b   :  { %3747 = vmatprep.subr.bf16.mxu0 %v1841_v42 }
 0x38e   :  { %3748 = vmatpush3.bf16.msra.mxu0 %v1841_v42  ;;  %v4127_v42 = vld [vmem:[%s5504_s0 + $0x180] ss:$12 sps:$4 sm:$0xff]  }
 0x390   :  { %1919 = vmatmul.mubr.bf16.gmra.mrb[112].mxu1 %v4087_v48  ;;  %v4132_v48 = vld [vmem:[%s5504_s0 + $0x1b4] ss:$12 sps:$4 sm:$0xff]  }
 0x391   :  { %1926 = vmatprep.mubr.bf16.mxu1 %v4088_v33  ;;  %v4133_v33 = vld [vmem:[%s5504_s0 + $0x1d0] ss:$12 sps:$4 sm:$0xff]  }
 0x393   :  { %v3735_v30 = vpop.f32.mrb[136].mxu0 }
 0x394   :  { %v1791_v14 = vpop.f32.mrb[137].mxu0 }
 0x395   :  { %v3736_v16 = vpop.f32.mrb[138].mxu0 }
 0x396   :  { %v1843_v17 = vpack.c.bf16 %v3736_v16, %v3735_v30  ;;  %v1794_v18 = vpop.f32.mrb[139].mxu0  ;;  %v4134_v30 = vld [vmem:[%s5504_s0 + $0x1e8] ss:$12 sps:$4 sm:$0xff]   ;;  %v4136_v16 = vld [vmem:[%s5504_s0 + $0x1cc] ss:$12 sps:$4 sm:$0xff]  }
 0x397   :  { %v1842_v20 = vpack.c.bf16 %v1794_v18, %v1791_v14  ;;  %v4135_v14 = vld [vmem:[%s5504_s0 + $0x1b0] ss:$12 sps:$4 sm:$0xff]   ;;  %v4138_v18 = vld [vmem:[%s5504_s0 + $0x218] ss:$12 sps:$4 sm:$0xff]  }
 0x398   :  { %1927 = vmatmul.mubr.bf16.gmra.mrb[116].mxu1 %v4089_v21  ;;  %v4139_v21 = vld [vmem:[%s5504_s0 + $0x1c8] ss:$12 sps:$4 sm:$0xff]  }
 0x399   :  { %3749 = vmatprep.subr.bf16.mxu0 %v1842_v20  ;;  %1934 = vmatprep.mubr.bf16.mxu1 %v4090_v59  ;;  %v4140_v59 = vld [vmem:[%s5504_s0 + $0x1e4] ss:$12 sps:$4 sm:$0xff]  }
 0x39a   :  { %3750 = vmatpush3.bf16.msra.mxu0 %v1842_v20  ;;  %v4076_v20 = vld [vmem:[%s5502_s2 + $0xb0] sm:$0xff]  }
 0x39b   :  { %3751 = vmatprep.subr.bf16.mxu0 %v1843_v17 }
 0x39e   :  { %3752 = vmatpush3.bf16.msra.mxu0 %v1843_v17  ;;  %v4137_v17 = vld [vmem:[%s5504_s0 + $0x200] ss:$12 sps:$4 sm:$0xff]  }
 0x3a0   :  { %1935 = vmatmul.mubr.bf16.gmra.mrb[120].mxu1 %v4091_v22  ;;  %v4141_v22 = vld [vmem:[%s5504_s0 + $0x230] ss:$12 sps:$4 sm:$0xff]  }
 0x3a1   :  { %1942 = vmatprep.mubr.bf16.mxu1 %v4092_v23  ;;  %v4077_v23 = vld [vmem:[%s5502_s2 + $0xb8] sm:$0xff]  }
 0x3a3   :  { %v3739_v19 = vpop.f32.mrb[140].mxu0 }
 0x3a4   :  { %v1807_v0 = vpop.f32.mrb[141].mxu0 }
 0x3a5   :  { %v3740_v27 = vpop.f32.mrb[142].mxu0 }
 0x3a6   :  { %v1845_v28 = vpack.c.bf16 %v3740_v27, %v3739_v19  ;;  %v1810_v29 = vpop.f32.mrb[143].mxu0  ;;  %v4142_v19 = vld [vmem:[%s5504_s0 + $0x1e0] ss:$12 sps:$4 sm:$0xff]   ;;  %v4144_v27 = vld [vmem:[%s5504_s0 + $0x1f8] ss:$12 sps:$4 sm:$0xff]  }
 0x3a7   :  { %v1844_v35 = vpack.c.bf16 %v1810_v29, %v1807_v0  ;;  %v4143_v0 = vld [vmem:[%s5504_s0 + $0x1fc] ss:$12 sps:$4 sm:$0xff]  }
 0x3a8   :  { %1943 = vmatmul.mubr.bf16.gmra.mrb[124].mxu1 %v4093_v36  ;;  %v4146_v29 = vld [vmem:[%s5504_s0 + $0x210] ss:$12 sps:$4 sm:$0xff]   ;;  %v4148_v36 = vld [vmem:[%s5504_s0 + $0x228] ss:$12 sps:$4 sm:$0xff]  }
 0x3a9   :  { %3753 = vmatprep.subr.bf16.mxu0 %v1844_v35  ;;  %1950 = vmatprep.mubr.bf16.mxu1 %v4094_v37  ;;  %v4149_v37 = vld [vmem:[%s5504_s0 + $0x4] ss:$12 sps:$4 sm:$0xff]  }
 0x3aa   :  { %3754 = vmatpush3.bf16.msra.mxu0 %v1844_v35  ;;  %v4147_v35 = vld [vmem:[%s5504_s0 + $0x22c] ss:$12 sps:$4 sm:$0xff]  }
 0x3ab   :  { %3755 = vmatprep.subr.bf16.mxu0 %v1845_v28 }
 0x3ae   :  { %3756 = vmatpush3.bf16.msra.mxu0 %v1845_v28  ;;  %v4145_v28 = vld [vmem:[%s5504_s0 + $0x214] ss:$12 sps:$4 sm:$0xff]  }
 0x3af   :  { %3805 = vmatprep.subr.bf16.mxu0 %v4070_v57 }
 0x3b0   :  { %1951 = vmatmul.mubr.bf16.gmra.mrb[128].mxu1 %v4095_v39 }
 0x3b1   :  { %3758 = vmatmul.mubr.bf16.vlgmr.msra.gmra.mrb[144].mxu0 %v4096_v40  ;;  %1958 = vmatprep.mubr.bf16.mxu1 %v4097_v63 }
 0x3b2   :  { %3761 = vmatprep.mubr.bf16.mxu0 %v4098_v41  ;;  %3806 = vmatpush3.bf16.msra.mxu0 %v4070_v57 }
 0x3b3   :  { %3807 = vmatprep.subr.bf16.mxu0 %v4071_v38 }
 0x3b6   :  { %3808 = vmatpush3.bf16.msra.mxu0 %v4071_v38 }
 0x3b7   :  { %3809 = vmatprep.subr.bf16.mxu0 %v4072_v43 }
 0x3b8   :  { %1959 = vmatmul.mubr.bf16.gmra.mrb[132].mxu1 %v4099_v25 }
 0x3b9   :  { %3762 = vmatmul.mubr.bf16.gmra.mrb[148].mxu0 %v4100_v45  ;;  %1966 = vmatprep.mubr.bf16.mxu1 %v4101_v46 }
 0x3ba   :  { %3765 = vmatprep.mubr.bf16.mxu0 %v4102_v47  ;;  %3810 = vmatpush3.bf16.msra.mxu0 %v4072_v43 }
 0x3bb   :  { %3811 = vmatprep.subr.bf16.mxu0 %v4073_v13 }
 0x3be   :  { %3812 = vmatpush3.bf16.msra.mxu0 %v4073_v13 }
 0x3bf   :  { %3813 = vmatprep.subr.bf16.mxu0 %v4074_v53 }
 0x3c0   :  { %1967 = vmatmul.mubr.bf16.gmra.mrb[136].mxu1 %v4103_v10 }
 0x3c1   :  { %3766 = vmatmul.mubr.bf16.gmra.mrb[152].mxu0 %v4104_v50  ;;  %1974 = vmatprep.mubr.bf16.mxu1 %v4105_v51 }
 0x3c2   :  { %3769 = vmatprep.mubr.bf16.mxu0 %v4106_v52  ;;  %3814 = vmatpush3.bf16.msra.mxu0 %v4074_v53 }
 0x3c3   :  { %3815 = vmatprep.subr.bf16.mxu0 %v4075_v58 }
 0x3c6   :  { %3816 = vmatpush3.bf16.msra.mxu0 %v4075_v58 }
 0x3c7   :  { %3817 = vmatprep.subr.bf16.mxu0 %v4076_v20 }
 0x3c8   :  { %1975 = vmatmul.mubr.bf16.gmra.mrb[140].mxu1 %v4107_v31 }
 0x3c9   :  { %3770 = vmatmul.mubr.bf16.gmra.mrb[156].mxu0 %v4108_v54  ;;  %1982 = vmatprep.mubr.bf16.mxu1 %v4109_v55 }
 0x3ca   :  { %3773 = vmatprep.mubr.bf16.mxu0 %v4110_v56  ;;  %3818 = vmatpush3.bf16.msra.mxu0 %v4076_v20 }
 0x3cb   :  { %3819 = vmatprep.subr.bf16.mxu0 %v4077_v23 }
 0x3ce   :  { %3820 = vmatpush3.bf16.msra.mxu0 %v4077_v23 }
 0x3d0   :  { %1983 = vmatmul.mubr.bf16.gmra.mrb[144].mxu1 %v4111_v8 }
 0x3d1   :  { %3774 = vmatmul.mubr.bf16.gmra.mrb[160].mxu0 %v4112_v60  ;;  %1990 = vmatprep.mubr.bf16.mxu1 %v4113_v61 }
 0x3d2   :  { %3777 = vmatprep.mubr.bf16.mxu0 %v4114_v44 }
 0x3d8   :  { %1991 = vmatmul.mubr.bf16.gmra.mrb[148].mxu1 %v4115_v15 }
 0x3d9   :  { %3778 = vmatmul.mubr.bf16.gmra.mrb[164].mxu0 %v4116_v62  ;;  %1998 = vmatprep.mubr.bf16.mxu1 %v4117_v1 }
 0x3da   :  { %3781 = vmatprep.mubr.bf16.mxu0 %v4118_v49 }
 0x3e0   :  { %1999 = vmatmul.mubr.bf16.gmra.mrb[152].mxu1 %v4119_v2 }
 0x3e1   :  { %2006 = vmatprep.mubr.bf16.mxu1 %v4120_v3  ;;  %3782 = vmatmul.mubr.bf16.gmra.mrb[168].mxu0 %v4121_v4  ;;  %v4981_v4 = vld [vmem:[%s5505_s3 + $0x1] ss:$0 sm:$0xff] }
 0x3e2   :  { %3785 = vmatprep.mubr.bf16.mxu0 %v4122_v26 }
 0x3e8   :  { %2007 = vmatmul.mubr.bf16.gmra.mrb[156].mxu1 %v4123_v5 }
 0x3e9   :  { %2014 = vmatprep.mubr.bf16.mxu1 %v4124_v6  ;;  %3786 = vmatmul.mubr.bf16.gmra.mrb[172].mxu0 %v4125_v7 }
 0x3ea   :  { %3789 = vmatprep.mubr.bf16.mxu0 %v4126_v34 }
 0x3f0   :  { %2015 = vmatmul.mubr.bf16.gmra.mrb[160].mxu1 %v4127_v42 }
 0x3f1   :  { %2022 = vmatprep.mubr.bf16.mxu1 %v4128_v9  ;;  %3790 = vmatmul.mubr.bf16.gmra.mrb[176].mxu0 %v4129_v11 }
 0x3f2   :  { %3793 = vmatprep.mubr.bf16.mxu0 %v4130_v12 }
 0x3f8   :  { %2023 = vmatmul.mubr.bf16.gmra.mrb[164].mxu1 %v4131_v24 }
 0x3f9   :  { %2030 = vmatprep.mubr.bf16.mxu1 %v4132_v48  ;;  %3794 = vmatmul.mubr.bf16.gmra.mrb[180].mxu0 %v4133_v33 }
 0x3fa   :  { %3797 = vmatprep.mubr.bf16.mxu0 %v4134_v30 }
 0x400   :  { %2031 = vmatmul.mubr.bf16.gmra.mrb[168].mxu1 %v4135_v14 }
 0x401   :  { %2038 = vmatprep.mubr.bf16.mxu1 %v4136_v16  ;;  %3798 = vmatmul.mubr.bf16.gmra.mrb[184].mxu0 %v4137_v17 }
 0x402   :  { %3801 = vmatprep.mubr.bf16.mxu0 %v4138_v18 }
 0x408   :  { %2039 = vmatmul.mubr.bf16.gmra.mrb[172].mxu1 %v4139_v21 }
 0x409   :  { %2046 = vmatprep.mubr.bf16.mxu1 %v4140_v59  ;;  %3802 = vmatmul.mubr.bf16.gmra.mrb[188].mxu0 %v4141_v22 }
 0x410   :  { %2047 = vmatmul.mubr.bf16.gmra.mrb[176].mxu1 %v4142_v19 }
 0x411   :  { %2054 = vmatprep.mubr.bf16.mxu1 %v4143_v0 }
 0x418   :  { %2055 = vmatmul.mubr.bf16.gmra.mrb[180].mxu1 %v4144_v27 }
 0x419   :  { %2062 = vmatprep.mubr.bf16.mxu1 %v4145_v28 }
 0x420   :  { %2063 = vmatmul.mubr.bf16.gmra.mrb[184].mxu1 %v4146_v29 }
 0x421   :  { %2070 = vmatprep.mubr.bf16.mxu1 %v4147_v35 }
 0x428   :  { %2071 = vmatmul.mubr.bf16.gmra.mrb[188].mxu1 %v4148_v36 }
 0x429   :  { %2730 = vmatprep.mubr.bf16.mxu1 %v4149_v37 }
 0x443   :  { %v1888_v57 = vpop.f32.mrb[96].mxu1 }
 0x444   :  { %v1890_v38 = vpop.f32.mrb[97].mxu1  ;;  %v1889_v6 = vadd.f32 %v4981_v4, %v1888_v57 }
 0x445   :  { %v1891_v39 = vpop.f32.mrb[98].mxu1 }
 0x446   :  { %v1893_v40 = vpop.f32.mrb[99].mxu1  ;;  %v1892_v24 = vadd.f32 %v4981_v4, %v1891_v39 }
 0x44b   :  { %v1896_v63 = vpop.f32.mrb[100].mxu1 }
 0x44c   :  { %v1898_v41 = vpop.f32.mrb[101].mxu1  ;;  %v1897_v26 = vadd.f32 %v4981_v4, %v1896_v63 }
 0x44d   :  { %v1899_v43 = vpop.f32.mrb[102].mxu1 }
 0x44e   :  { %v1901_v25 = vpop.f32.mrb[103].mxu1  ;;  %v1900_v42 = vadd.f32 %v4981_v4, %v1899_v43 }
 0x453   :  { %v1904_v45 = vpop.f32.mrb[104].mxu1 }
 0x454   :  { %v1906_v46 = vpop.f32.mrb[105].mxu1  ;;  %v1905_v27 = vadd.f32 %v4981_v4, %v1904_v45 }
 0x455   :  { %v1907_v47 = vpop.f32.mrb[106].mxu1 }
 0x456   :  { %v1909_v10 = vpop.f32.mrb[107].mxu1  ;;  %v1908_v38 = vadd.f32 %v4981_v4, %v1907_v47 }
 0x45b   :  { %v1912_v50 = vpop.f32.mrb[108].mxu1 }
 0x45c   :  { %v1914_v51 = vpop.f32.mrb[109].mxu1  ;;  %v1913_v23 = vadd.f32 %v4981_v4, %v1912_v50 }
 0x45d   :  { %v1915_v52 = vpop.f32.mrb[110].mxu1 }
 0x45e   :  { %v1917_v13 = vpop.f32.mrb[111].mxu1  ;;  %v1916_v37 = vadd.f32 %v4981_v4, %v1915_v52 }
 0x463   :  { %v4964_v53 = vpop.f32.mrb[112].mxu1 }
 0x464   :  { %v1922_v31 = vpop.f32.mrb[113].mxu1  ;;  %v1921_v47 = vadd.f32 %v4981_v4, %v4964_v53 }
 0x465   :  { %v4966_v54 = vpop.f32.mrb[114].mxu1 }
 0x466   :  { %v1925_v55 = vpop.f32.mrb[115].mxu1 }
 0x46b   :  { %v1928_v56 = vpop.f32.mrb[116].mxu1 }
 0x46c   :  { %v1930_v58 = vpop.f32.mrb[117].mxu1  ;;  %v1929_v13 = vadd.f32 %v4981_v4, %v1928_v56 }
 0x46d   :  { %v4968_v8 = vpop.f32.mrb[118].mxu1 }
 0x46e   :  { %v1933_v60 = vpop.f32.mrb[119].mxu1 }
 0x473   :  { %v4970_v61 = vpop.f32.mrb[120].mxu1 }
 0x474   :  { %v1938_v44 = vpop.f32.mrb[121].mxu1 }
 0x475   :  { %v4972_v15 = vpop.f32.mrb[122].mxu1 }
 0x476   :  { %v1941_v62 = vpop.f32.mrb[123].mxu1 }
 0x477   :  { %v1932_v62 = vadd.f32 %v4981_v4, %v4968_v8 }
 0x47b   :  { %v4974_v1 = vpop.f32.mrb[124].mxu1 }
 0x47c   :  { %v1946_v49 = vpop.f32.mrb[125].mxu1  ;;  %v1945_v8 = vadd.f32 %v4981_v4, %v4974_v1 }
 0x47d   :  { %v4976_v2 = vpop.f32.mrb[126].mxu1 }
 0x47e   :  { %v1949_v3 = vpop.f32.mrb[127].mxu1 }
 0x47f   :  { %v1924_v3 = vadd.f32 %v4981_v4, %v4966_v54  ;;  %v1937_v54 = vadd.f32 %v4981_v4, %v4970_v61 }
 0x483   :  { %v4984_v5 = vpop.f32.mrb[128].mxu1 }
 0x484   :  { %v3759_v7 = vpop.f32.mrb[144].mxu0  ;;  %v1954_v34 = vpop.f32.mrb[129].mxu1 }
 0x485   :  { %v2122_v9 = vadd.f32 %v3759_v7, %v1897_v26  ;;  %v2113_v11 = vpop.f32.mrb[145].mxu0  ;;  %v4988_v12 = vpop.f32.mrb[130].mxu1 }
 0x486   :  { %v2114_v48 = vadd.f32 %v2113_v11, %v1889_v6  ;;  %v3760_v33 = vpop.f32.mrb[146].mxu0  ;;  %v1957_v30 = vpop.f32.mrb[131].mxu1 }
 0x487   :  { %v2125_v14 = vadd.f32 %v3760_v33, %v1900_v42  ;;  %v2116_v16 = vpop.f32.mrb[147].mxu0  ;;  %v2306_v18 = vmax.f32 %v2122_v9, 0.0 }
 0x488   :  { %v2117_v17 = vadd.f32 %v2116_v16, %v1892_v24  ;;  %v2304_v21 = vmax.f32 %v2114_v48, 0.0 }
 0x489   :  { %v2307_v20 = vmax.f32 %v2125_v14, 0.0 }
 0x48a   :  { %v2305_v59 = vmax.f32 %v2117_v17, 0.0 }
 0x48b   :  { %v2353_v22 = vpack.c.bf16 %v2307_v20, %v2306_v18  ;;  %v4992_v19 = vpop.f32.mrb[132].mxu1  ;;  %v1948_v20 = vadd.f32 %v4981_v4, %v4976_v2 }
 0x48c   :  { %v2352_v0 = vpack.c.bf16 %v2305_v59, %v2304_v21  ;;  %v3763_v28 = vpop.f32.mrb[148].mxu0  ;;  %v1962_v29 = vpop.f32.mrb[133].mxu1  ;;  %v1940_v59 = vadd.f32 %v4981_v4, %v4972_v15  ;;  %v1961_v2 = vadd.f32 %v4981_v4, %v4992_v19  ;;  %v1953_v15 = vadd.f32 %v4981_v4, %v4984_v5 }
 0x48d   :  { %v2138_v35 = vadd.f32 %v3763_v28, %v1913_v23  ;;  %v2129_v36 = vpop.f32.mrb[149].mxu0  ;;  %v4996_v57 = vpop.f32.mrb[134].mxu1 }
 0x48e   :  { %3821 = vmatprep.mubr.bf16.mxu0 %v2352_v0  ;;  %v2130_v39 = vadd.f32 %v2129_v36, %v1905_v27  ;;  %v3764_v40 = vpop.f32.mrb[150].mxu0  ;;  %v1965_v63 = vpop.f32.mrb[135].mxu1 }
 0x48f   :  { %3822 = vmatmul.mubr.bf16.vlgmr.msra.gmra.mrb[192].mxu0 %v2353_v22  ;;  %v2141_v41 = vadd.f32 %v3764_v40, %v1916_v37  ;;  %v2132_v43 = vpop.f32.mrb[151].mxu0  ;;  %v2310_v46 = vmax.f32 %v2138_v35, 0.0 }
 0x490   :  { %v2133_v25 = vadd.f32 %v2132_v43, %v1908_v38  ;;  %v2308_v10 = vmax.f32 %v2130_v39, 0.0 }
 0x491   :  { %v2311_v45 = vmax.f32 %v2141_v41, 0.0 }
 0x492   :  { %v2309_v50 = vmax.f32 %v2133_v25, 0.0  ;;  %v1964_v25 = vadd.f32 %v4981_v4, %v4996_v57 }
 0x493   :  { %v2355_v51 = vpack.c.bf16 %v2311_v45, %v2310_v46  ;;  %v5000_v52 = vpop.f32.mrb[136].mxu1  ;;  %v1956_v45 = vadd.f32 %v4981_v4, %v4988_v12 }
 0x494   :  { %v2354_v31 = vpack.c.bf16 %v2309_v50, %v2308_v10  ;;  %v3767_v55 = vpop.f32.mrb[152].mxu0  ;;  %v1970_v58 = vpop.f32.mrb[137].mxu1 }
 0x495   :  { %v2154_v60 = vadd.f32 %v3767_v55, %v1929_v13  ;;  %v2145_v44 = vpop.f32.mrb[153].mxu0  ;;  %v5006_v49 = vpop.f32.mrb[138].mxu1 }
 0x496   :  { %3825 = vmatprep.mubr.bf16.mxu0 %v2354_v31  ;;  %v2146_v56 = vadd.f32 %v2145_v44, %v1921_v47  ;;  %v3768_v26 = vpop.f32.mrb[154].mxu0  ;;  %v1973_v6 = vpop.f32.mrb[139].mxu1 }
 0x497   :  { %3826 = vmatmul.mubr.bf16.gmra.mrb[196].mxu0 %v2355_v51  ;;  %v2157_v7 = vadd.f32 %v3768_v26, %v1932_v62  ;;  %v2148_v34 = vpop.f32.mrb[155].mxu0  ;;  %v2314_v42 = vmax.f32 %v2154_v60, 0.0 }
 0x498   :  { %v2149_v53 = vadd.f32 %v2148_v34, %v1924_v3  ;;  %v2312_v11 = vmax.f32 %v2146_v56, 0.0  ;;  %v1969_v3 = vadd.f32 %v4981_v4, %v5000_v52 }
 0x499   :  { %v2315_v9 = vmax.f32 %v2157_v7, 0.0 }
 0x49a   :  { %v2313_v24 = vmax.f32 %v2149_v53, 0.0  ;;  %v1972_v53 = vadd.f32 %v4981_v4, %v5006_v49 }
 0x49b   :  { %v2357_v48 = vpack.c.bf16 %v2315_v9, %v2314_v42  ;;  %v1976_v33 = vpop.f32.mrb[140].mxu1 }
 0x49c   :  { %v2356_v30 = vpack.c.bf16 %v2313_v24, %v2312_v11  ;;  %v3771_v14 = vpop.f32.mrb[156].mxu0  ;;  %v1978_v16 = vpop.f32.mrb[141].mxu1  ;;  %v1977_v44 = vadd.f32 %v4981_v4, %v1976_v33 }
 0x49d   :  { %v2170_v17 = vadd.f32 %v3771_v14, %v1945_v8  ;;  %v2161_v18 = vpop.f32.mrb[157].mxu0  ;;  %v1979_v21 = vpop.f32.mrb[142].mxu1 }
 0x49e   :  { %3829 = vmatprep.mubr.bf16.mxu0 %v2356_v30  ;;  %v2162_v22 = vadd.f32 %v2161_v18, %v1937_v54  ;;  %v3772_v23 = vpop.f32.mrb[158].mxu0  ;;  %v1981_v1 = vpop.f32.mrb[143].mxu1  ;;  %v1980_v7 = vadd.f32 %v4981_v4, %v1979_v21 }
 0x49f   :  { %3830 = vmatmul.mubr.bf16.gmra.mrb[200].mxu0 %v2357_v48  ;;  %v2173_v0 = vadd.f32 %v3772_v23, %v1948_v20  ;;  %v2164_v27 = vpop.f32.mrb[159].mxu0  ;;  %v2318_v61 = vmax.f32 %v2170_v17, 0.0 }
 0x4a0   :  { %v2165_v28 = vadd.f32 %v2164_v27, %v1940_v59  ;;  %v2316_v35 = vmax.f32 %v2162_v22, 0.0 }
 0x4a1   :  { %v2319_v29 = vmax.f32 %v2173_v0, 0.0 }
 0x4a2   :  { %v2317_v36 = vmax.f32 %v2165_v28, 0.0 }
 0x4a3   :  { %v2359_v37 = vpack.c.bf16 %v2319_v29, %v2318_v61  ;;  %v1984_v38 = vpop.f32.mrb[144].mxu1 }
 0x4a4   :  { %v2358_v39 = vpack.c.bf16 %v2317_v36, %v2316_v35  ;;  %v3775_v40 = vpop.f32.mrb[160].mxu0  ;;  %v1986_v63 = vpop.f32.mrb[145].mxu1  ;;  %v1985_v20 = vadd.f32 %v4981_v4, %v1984_v38 }
 0x4a5   :  { %v2186_v41 = vadd.f32 %v3775_v40, %v1961_v2  ;;  %v2177_v43 = vpop.f32.mrb[161].mxu0  ;;  %v1987_v46 = vpop.f32.mrb[146].mxu1 }
 0x4a6   :  { %3833 = vmatprep.mubr.bf16.mxu0 %v2358_v39  ;;  %v2178_v10 = vadd.f32 %v2177_v43, %v1953_v15  ;;  %v3776_v50 = vpop.f32.mrb[162].mxu0  ;;  %v1989_v19 = vpop.f32.mrb[147].mxu1  ;;  %v1988_v0 = vadd.f32 %v4981_v4, %v1987_v46 }
 0x4a7   :  { %3834 = vmatmul.mubr.bf16.gmra.mrb[204].mxu0 %v2359_v37  ;;  %v2189_v51 = vadd.f32 %v3776_v50, %v1964_v25  ;;  %v2180_v13 = vpop.f32.mrb[163].mxu0  ;;  %v2322_v5 = vmax.f32 %v2186_v41, 0.0 }
 0x4a8   :  { %v2181_v31 = vadd.f32 %v2180_v13, %v1956_v45  ;;  %v2320_v55 = vmax.f32 %v2178_v10, 0.0 }
 0x4a9   :  { %v2323_v47 = vmax.f32 %v2189_v51, 0.0 }
 0x4aa   :  { %v2321_v58 = vmax.f32 %v2181_v31, 0.0 }
 0x4ab   :  { %v2361_v60 = vpack.c.bf16 %v2323_v47, %v2322_v5  ;;  %v1992_v57 = vpop.f32.mrb[148].mxu1 }
 0x4ac   :  { %v2360_v62 = vpack.c.bf16 %v2321_v58, %v2320_v55  ;;  %v3779_v12 = vpop.f32.mrb[164].mxu0  ;;  %v1994_v56 = vpop.f32.mrb[149].mxu1  ;;  %v1993_v16 = vadd.f32 %v4981_v4, %v1992_v57 }
 0x4ad   :  { %v2202_v26 = vadd.f32 %v3779_v12, %v1977_v44  ;;  %v2193_v6 = vpop.f32.mrb[165].mxu0  ;;  %v1995_v34 = vpop.f32.mrb[150].mxu1 }
 0x4ae   :  { %3837 = vmatprep.mubr.bf16.mxu0 %v2360_v62  ;;  %v2194_v42 = vadd.f32 %v2193_v6, %v1969_v3  ;;  %v3780_v9 = vpop.f32.mrb[166].mxu0  ;;  %v1997_v11 = vpop.f32.mrb[151].mxu1  ;;  %v1996_v23 = vadd.f32 %v4981_v4, %v1995_v34 }
 0x4af   :  { %3838 = vmatmul.mubr.bf16.gmra.mrb[208].mxu0 %v2361_v60  ;;  %v2205_v24 = vadd.f32 %v3780_v9, %v1980_v7  ;;  %v2196_v48 = vpop.f32.mrb[167].mxu0  ;;  %v2326_v33 = vmax.f32 %v2202_v26, 0.0 }
 0x4b0   :  { %v2197_v8 = vadd.f32 %v2196_v48, %v1972_v53  ;;  %v2324_v30 = vmax.f32 %v2194_v42, 0.0 }
 0x4b1   :  { %v2327_v52 = vmax.f32 %v2205_v24, 0.0 }
 0x4b2   :  { %v2325_v54 = vmax.f32 %v2197_v8, 0.0 }
 0x4b3   :  { %v2363_v14 = vpack.c.bf16 %v2327_v52, %v2326_v33  ;;  %v2000_v17 = vpop.f32.mrb[152].mxu1 }
 0x4b4   :  { %v2362_v18 = vpack.c.bf16 %v2325_v54, %v2324_v30  ;;  %v3783_v21 = vpop.f32.mrb[168].mxu0  ;;  %v2002_v49 = vpop.f32.mrb[153].mxu1  ;;  %v2001_v41 = vadd.f32 %v4981_v4, %v2000_v17 }
 0x4b5   :  { %v2218_v59 = vadd.f32 %v3783_v21, %v1993_v16  ;;  %v2209_v22 = vpop.f32.mrb[169].mxu0  ;;  %v2003_v1 = vpop.f32.mrb[154].mxu1 }
 0x4b6   :  { %3841 = vmatprep.mubr.bf16.mxu0 %v2362_v18  ;;  %v2210_v27 = vadd.f32 %v2209_v22, %v1985_v20  ;;  %v3784_v28 = vpop.f32.mrb[170].mxu0  ;;  %v2005_v61 = vpop.f32.mrb[155].mxu1  ;;  %v2004_v50 = vadd.f32 %v4981_v4, %v2003_v1 }
 0x4b7   :  { %3842 = vmatmul.mubr.bf16.gmra.mrb[212].mxu0 %v2363_v14  ;;  %v2221_v29 = vadd.f32 %v3784_v28, %v1996_v23  ;;  %v2212_v35 = vpop.f32.mrb[171].mxu0  ;;  %v2330_v37 = vmax.f32 %v2218_v59, 0.0 }
 0x4b8   :  { %v2213_v36 = vadd.f32 %v2212_v35, %v1988_v0  ;;  %v2328_v38 = vmax.f32 %v2210_v27, 0.0 }
 0x4b9   :  { %v2331_v2 = vmax.f32 %v2221_v29, 0.0 }
 0x4ba   :  { %v2329_v39 = vmax.f32 %v2213_v36, 0.0 }
 0x4bb   :  { %v2365_v15 = vpack.c.bf16 %v2331_v2, %v2330_v37  ;;  %v2008_v40 = vpop.f32.mrb[156].mxu1 }
 0x4bc   :  { %v2364_v63 = vpack.c.bf16 %v2329_v39, %v2328_v38  ;;  %v2009_v43 = vadd.f32 %v4981_v4, %v2008_v40  ;;  %v3787_v25 = vpop.f32.mrb[172].mxu0  ;;  %v2010_v46 = vpop.f32.mrb[157].mxu1 }
 0x4bd   :  { %v2225_v45 = vpop.f32.mrb[173].mxu0  ;;  %v2011_v10 = vpop.f32.mrb[158].mxu1 }
 0x4be   :  { %3845 = vmatprep.mubr.bf16.mxu0 %v2364_v63  ;;  %v2234_v19 = vadd.f32 %v3787_v25, %v2009_v43  ;;  %v2226_v51 = vadd.f32 %v2225_v45, %v2001_v41  ;;  %v2012_v13 = vadd.f32 %v4981_v4, %v2011_v10  ;;  %v3788_v31 = vpop.f32.mrb[174].mxu0  ;;  %v2013_v5 = vpop.f32.mrb[159].mxu1 }
 0x4bf   :  { %3846 = vmatmul.mubr.bf16.gmra.mrb[216].mxu0 %v2365_v15  ;;  %v2228_v47 = vpop.f32.mrb[175].mxu0 }
 0x4c0   :  { %v2237_v55 = vadd.f32 %v3788_v31, %v2012_v13  ;;  %v2229_v58 = vadd.f32 %v2228_v47, %v2004_v50  ;;  %v2334_v60 = vmax.f32 %v2234_v19, 0.0  ;;  %v2332_v44 = vmax.f32 %v2226_v51, 0.0 }
 0x4c2   :  { %v2335_v57 = vmax.f32 %v2237_v55, 0.0  ;;  %v2333_v62 = vmax.f32 %v2229_v58, 0.0 }
 0x4c3   :  { %v2016_v3 = vpop.f32.mrb[160].mxu1 }
 0x4c4   :  { %v2367_v12 = vpack.c.bf16 %v2335_v57, %v2334_v60  ;;  %v2366_v56 = vpack.c.bf16 %v2333_v62, %v2332_v44  ;;  %v2017_v26 = vadd.f32 %v4981_v4, %v2016_v3  ;;  %v2018_v6 = vpop.f32.mrb[161].mxu1  ;;  %v3791_v7 = vpop.f32.mrb[176].mxu0 }
 0x4c5   :  { %v2019_v34 = vpop.f32.mrb[162].mxu1  ;;  %v2241_v53 = vpop.f32.mrb[177].mxu0 }
 0x4c6   :  { %v2020_v42 = vadd.f32 %v4981_v4, %v2019_v34  ;;  %v2021_v9 = vpop.f32.mrb[163].mxu1  ;;  %v2242_v11 = vadd.f32 %v2241_v53, %v2017_v26  ;;  %v3792_v24 = vpop.f32.mrb[178].mxu0  ;;  %3849 = vmatprep.mubr.bf16.mxu0 %v2366_v56 }
 0x4c7   :  { %v2244_v48 = vpop.f32.mrb[179].mxu0  ;;  %3850 = vmatmul.mubr.bf16.gmra.mrb[220].mxu0 %v2367_v12 }
 0x4c8   :  { %v2336_v8 = vmax.f32 %v2242_v11, 0.0  ;;  %v2245_v33 = vadd.f32 %v2244_v48, %v2020_v42 }
 0x4ca   :  { %v2337_v52 = vmax.f32 %v2245_v33, 0.0 }
 0x4cb   :  { %v2024_v30 = vpop.f32.mrb[164].mxu1 }
 0x4cc   :  { %v2025_v54 = vadd.f32 %v4981_v4, %v2024_v30  ;;  %v2026_v14 = vpop.f32.mrb[165].mxu1  ;;  %v2368_v16 = vpack.c.bf16 %v2337_v52, %v2336_v8  ;;  %v3795_v17 = vpop.f32.mrb[180].mxu0 }
 0x4cd   :  { %v2027_v18 = vpop.f32.mrb[166].mxu1  ;;  %v2257_v20 = vpop.f32.mrb[181].mxu0 }
 0x4ce   :  { %v2250_v21 = vadd.f32 %v3791_v7, %v2025_v54  ;;  %v2028_v49 = vadd.f32 %v4981_v4, %v2027_v18  ;;  %v2029_v59 = vpop.f32.mrb[167].mxu1  ;;  %v3796_v22 = vpop.f32.mrb[182].mxu0  ;;  %3853 = vmatprep.mubr.bf16.mxu0 %v2368_v16 }
 0x4cf   :  { %v2260_v23 = vpop.f32.mrb[183].mxu0 }
 0x4d0   :  { %v2338_v1 = vmax.f32 %v2250_v21, 0.0  ;;  %v2253_v0 = vadd.f32 %v3792_v24, %v2028_v49 }
 0x4d2   :  { %v2339_v27 = vmax.f32 %v2253_v0, 0.0 }
 0x4d3   :  { %v2032_v28 = vpop.f32.mrb[168].mxu1 }
 0x4d4   :  { %v2369_v61 = vpack.c.bf16 %v2339_v27, %v2338_v1  ;;  %v2033_v29 = vadd.f32 %v4981_v4, %v2032_v28  ;;  %v2034_v35 = vpop.f32.mrb[169].mxu1  ;;  %v3799_v36 = vpop.f32.mrb[184].mxu0 }
 0x4d5   :  { %v2035_v37 = vpop.f32.mrb[170].mxu1  ;;  %v2273_v2 = vpop.f32.mrb[185].mxu0 }
 0x4d6   :  { %v2036_v38 = vadd.f32 %v4981_v4, %v2035_v37  ;;  %v2037_v39 = vpop.f32.mrb[171].mxu1  ;;  %v2258_v15 = vadd.f32 %v2257_v20, %v2033_v29  ;;  %3854 = vmatmul.mubr.bf16.gmra.mrb[224].mxu0 %v2369_v61  ;;  %v3800_v40 = vpop.f32.mrb[186].mxu0 }
 0x4d7   :  { %v2276_v63 = vpop.f32.mrb[187].mxu0 }
 0x4d8   :  { %v2340_v41 = vmax.f32 %v2258_v15, 0.0  ;;  %v2261_v43 = vadd.f32 %v2260_v23, %v2036_v38 }
 0x4da   :  { %v2341_v25 = vmax.f32 %v2261_v43, 0.0  ;;  %v4150_v43 = vld [vmem:[%s5504_s0 + $0x8] ss:$12 sps:$4 sm:$0xff]  }
 0x4db   :  { %v2040_v46 = vpop.f32.mrb[172].mxu1 }
 0x4dc   :  { %v2041_v45 = vadd.f32 %v4981_v4, %v2040_v46  ;;  %v2042_v10 = vpop.f32.mrb[173].mxu1  ;;  %v2370_v50 = vpack.c.bf16 %v2341_v25, %v2340_v41  ;;  %v3803_v19 = vpop.f32.mrb[188].mxu0 }
 0x4dd   :  { %v2043_v51 = vpop.f32.mrb[174].mxu1  ;;  %v2289_v13 = vpop.f32.mrb[189].mxu0 }
 0x4de   :  { %v2266_v31 = vadd.f32 %v3795_v17, %v2041_v45  ;;  %v2044_v5 = vadd.f32 %v4981_v4, %v2043_v51  ;;  %v2045_v47 = vpop.f32.mrb[175].mxu1  ;;  %3857 = vmatprep.mubr.bf16.mxu0 %v2370_v50  ;;  %v3804_v55 = vpop.f32.mrb[190].mxu0 }
 0x4df   :  { %v2292_v58 = vpop.f32.mrb[191].mxu0 }
 0x4e0   :  { %v2342_v60 = vmax.f32 %v2266_v31, 0.0  ;;  %v2269_v44 = vadd.f32 %v3796_v22, %v2044_v5 }
 0x4e2   :  { %v2343_v57 = vmax.f32 %v2269_v44, 0.0 }
 0x4e3   :  { %v2048_v62 = vpop.f32.mrb[176].mxu1 }
 0x4e4   :  { %v2371_v3 = vpack.c.bf16 %v2343_v57, %v2342_v60  ;;  %v2049_v12 = vadd.f32 %v4981_v4, %v2048_v62  ;;  %v2050_v56 = vpop.f32.mrb[177].mxu1 }
 0x4e5   :  { %v2051_v26 = vpop.f32.mrb[178].mxu1 }
 0x4e6   :  { %v2052_v6 = vadd.f32 %v4981_v4, %v2051_v26  ;;  %v2053_v7 = vpop.f32.mrb[179].mxu1  ;;  %v2274_v34 = vadd.f32 %v2273_v2, %v2049_v12  ;;  %3858 = vmatmul.mubr.bf16.gmra.mrb[228].mxu0 %v2371_v3 }
 0x4e8   :  { %v2344_v53 = vmax.f32 %v2274_v34, 0.0  ;;  %v2277_v42 = vadd.f32 %v2276_v63, %v2052_v6 }
 0x4ea   :  { %v2345_v9 = vmax.f32 %v2277_v42, 0.0 }
 0x4eb   :  { %v2056_v11 = vpop.f32.mrb[180].mxu1 }
 0x4ec   :  { %v2057_v24 = vadd.f32 %v4981_v4, %v2056_v11  ;;  %v2058_v48 = vpop.f32.mrb[181].mxu1  ;;  %v2372_v8 = vpack.c.bf16 %v2345_v9, %v2344_v53 }
 0x4ed   :  { %v2059_v33 = vpop.f32.mrb[182].mxu1 }
 0x4ee   :  { %v2282_v52 = vadd.f32 %v3799_v36, %v2057_v24  ;;  %v2060_v30 = vadd.f32 %v4981_v4, %v2059_v33  ;;  %v2061_v54 = vpop.f32.mrb[183].mxu1  ;;  %3861 = vmatprep.mubr.bf16.mxu0 %v2372_v8 }
 0x4f0   :  { %v2346_v14 = vmax.f32 %v2282_v52, 0.0  ;;  %v2285_v16 = vadd.f32 %v3800_v40, %v2060_v30 }
 0x4f2   :  { %v2347_v17 = vmax.f32 %v2285_v16, 0.0 }
 0x4f3   :  { %v2064_v18 = vpop.f32.mrb[184].mxu1 }
 0x4f4   :  { %v2373_v20 = vpack.c.bf16 %v2347_v17, %v2346_v14  ;;  %v2065_v21 = vadd.f32 %v4981_v4, %v2064_v18  ;;  %v2066_v49 = vpop.f32.mrb[185].mxu1 }
 0x4f5   :  { %v2067_v59 = vpop.f32.mrb[186].mxu1 }
 0x4f6   :  { %v2068_v22 = vadd.f32 %v4981_v4, %v2067_v59  ;;  %v2069_v23 = vpop.f32.mrb[187].mxu1  ;;  %v2290_v1 = vadd.f32 %v2289_v13, %v2065_v21  ;;  %3862 = vmatmul.mubr.bf16.gmra.mrb[232].mxu0 %v2373_v20 }
 0x4f8   :  { %v2348_v0 = vmax.f32 %v2290_v1, 0.0  ;;  %v2293_v27 = vadd.f32 %v2292_v58, %v2068_v22 }
 0x4fa   :  { %v2349_v28 = vmax.f32 %v2293_v27, 0.0  ;;  %v4151_v27 = vld [vmem:[%s5504_s0] ss:$12 sps:$4 sm:$0xff]  }
 0x4fb   :  { %v2072_v61 = vpop.f32.mrb[188].mxu1 }
 0x4fc   :  { %v2073_v29 = vadd.f32 %v4981_v4, %v2072_v61  ;;  %v2074_v35 = vpop.f32.mrb[189].mxu1  ;;  %v2374_v36 = vpack.c.bf16 %v2349_v28, %v2348_v0  ;;  %v4152_v28 = vld [vmem:[%s5504_s0 + $0x1c] ss:$12 sps:$4 sm:$0xff]  }
 0x4fd   :  { %v2075_v37 = vpop.f32.mrb[190].mxu1 }
 0x4fe   :  { %v2298_v2 = vadd.f32 %v3803_v19, %v2073_v29  ;;  %v2076_v38 = vadd.f32 %v4981_v4, %v2075_v37  ;;  %3865 = vmatprep.mubr.bf16.mxu0 %v2374_v36  ;;  %v2077_v39 = vpop.f32.mrb[191].mxu1 }
 0x4ff   :  { %v4155_v39 = vld [vmem:[%s5504_s0 + $0x30] ss:$12 sps:$4 sm:$0xff]  }
 0x500   :  { %v2350_v15 = vmax.f32 %v2298_v2, 0.0  ;;  %v2301_v40 = vadd.f32 %v3804_v55, %v2076_v38  ;;  %v4154_v38 = vld [vmem:[%s5504_s0 + $0x34] ss:$12 sps:$4 sm:$0xff]  }
 0x502   :  { %v2351_v63 = vmax.f32 %v2301_v40, 0.0 }
 0x504   :  { %v2375_v41 = vpack.c.bf16 %v2351_v63, %v2350_v15  ;;  %v4156_v15 = vld [vmem:[%s5504_s0 + $0x4c] ss:$12 sps:$4 sm:$0xff]  }
 0x506   :  { %3866 = vmatmul.mubr.bf16.gmra.mrb[236].mxu0 %v2375_v41 }
 0x507   :  { %3885 = vmatprep.mubr.bf16.mxu0 %v4150_v43 }
 0x562   :  { %v3823_v25 = vpop.f32.mrb[192].mxu0 }
 0x563   :  { %v2475_v46 = vpop.f32.mrb[193].mxu0 }
 0x564   :  { %v3824_v45 = vpop.f32.mrb[194].mxu0 }
 0x565   :  { %v2667_v10 = vpack.c.bf16 %v3824_v45, %v3823_v25  ;;  %v2478_v50 = vpop.f32.mrb[195].mxu0  ;;  %v4157_v45 = vld [vmem:[%s5504_s0 + $0x48] ss:$12 sps:$4 sm:$0xff]  }
 0x566   :  { %v2666_v19 = vpack.c.bf16 %v2478_v50, %v2475_v46  ;;  %v4159_v50 = vld [vmem:[%s5504_s0 + $0x60] ss:$12 sps:$4 sm:$0xff]  }
 0x568   :  { %2699 = vmatpush1.bf16.msra.mxu1 %v2666_v19  ;;  %v4160_v19 = vld [vmem:[%s5504_s0 + $0x7c] ss:$12 sps:$4 sm:$0xff]  }
 0x569   :  { %2700 = vmatprep.subr.bf16.mxu1 %v4221_v32 }
 0x56a   :  { %v3827_v4 = vpop.f32.mrb[196].mxu0 }
 0x56b   :  { %v2491_v51 = vpop.f32.mrb[197].mxu0 }
 0x56c   :  { %2701 = vmatpush1.bf16.msra.mxu1 %v2667_v10  ;;  %v3828_v13 = vpop.f32.mrb[198].mxu0  ;;  %v4158_v10 = vld [vmem:[%s5504_s0 + $0x64] ss:$12 sps:$4 sm:$0xff]  }
 0x56d   :  { %v2669_v31 = vpack.c.bf16 %v3828_v13, %v3827_v4  ;;  %v2494_v5 = vpop.f32.mrb[199].mxu0  ;;  %2702 = vmatprep.subr.bf16.mxu1 %v4221_v32 }
 0x56e   :  { %v2668_v47 = vpack.c.bf16 %v2494_v5, %v2491_v51 }
 0x570   :  { %2703 = vmatpush1.bf16.msra.mxu1 %v2668_v47 }
 0x571   :  { %2704 = vmatprep.subr.bf16.mxu1 %v4221_v32 }
 0x572   :  { %v3831_v55 = vpop.f32.mrb[200].mxu0 }
 0x573   :  { %v2507_v58 = vpop.f32.mrb[201].mxu0 }
 0x574   :  { %2705 = vmatpush1.bf16.msra.mxu1 %v2669_v31  ;;  %v3832_v60 = vpop.f32.mrb[202].mxu0 }
 0x575   :  { %v2671_v44 = vpack.c.bf16 %v3832_v60, %v3831_v55  ;;  %v2510_v57 = vpop.f32.mrb[203].mxu0  ;;  %2706 = vmatprep.subr.bf16.mxu1 %v4221_v32  ;;  %v4161_v55 = vld [vmem:[%s5504_s0 + $0x78] ss:$12 sps:$4 sm:$0xff]   ;;  %v4163_v60 = vld [vmem:[%s5504_s0 + $0x90] ss:$12 sps:$4 sm:$0xff]  }
 0x576   :  { %v2670_v62 = vpack.c.bf16 %v2510_v57, %v2507_v58  ;;  %v4162_v58 = vld [vmem:[%s5504_s0 + $0x94] ss:$12 sps:$4 sm:$0xff]  }
 0x578   :  { %2707 = vmatpush1.bf16.msra.mxu1 %v2670_v62 }
 0x579   :  { %2708 = vmatprep.subr.bf16.mxu1 %v4221_v32 }
 0x57a   :  { %v3835_v3 = vpop.f32.mrb[204].mxu0 }
 0x57b   :  { %v2523_v12 = vpop.f32.mrb[205].mxu0 }
 0x57c   :  { %2709 = vmatpush1.bf16.msra.mxu1 %v2671_v44  ;;  %v3836_v56 = vpop.f32.mrb[206].mxu0  ;;  %v4164_v44 = vld [vmem:[%s5504_s0 + $0xac] ss:$12 sps:$4 sm:$0xff]  }
 0x57d   :  { %v2673_v26 = vpack.c.bf16 %v3836_v56, %v3835_v3  ;;  %v2526_v6 = vpop.f32.mrb[207].mxu0  ;;  %2710 = vmatprep.subr.bf16.mxu1 %v4221_v32 }
 0x57e   :  { %v2672_v7 = vpack.c.bf16 %v2526_v6, %v2523_v12  ;;  %v4165_v6 = vld [vmem:[%s5504_s0 + $0xa8] ss:$12 sps:$4 sm:$0xff]  }
 0x580   :  { %2711 = vmatpush1.bf16.msra.mxu1 %v2672_v7  ;;  %v4166_v7 = vld [vmem:[%s5504_s0 + $0xc4] ss:$12 sps:$4 sm:$0xff]  }
 0x581   :  { %2712 = vmatprep.subr.bf16.mxu1 %v4221_v32 }
 0x582   :  { %v3839_v34 = vpop.f32.mrb[208].mxu0 }
 0x583   :  { %v2539_v53 = vpop.f32.mrb[209].mxu0 }
 0x584   :  { %2713 = vmatpush1.bf16.msra.mxu1 %v2673_v26  ;;  %v3840_v42 = vpop.f32.mrb[210].mxu0 }
 0x585   :  { %v2675_v9 = vpack.c.bf16 %v3840_v42, %v3839_v34  ;;  %v2542_v11 = vpop.f32.mrb[211].mxu0  ;;  %2714 = vmatprep.subr.bf16.mxu1 %v4221_v32  ;;  %v4167_v34 = vld [vmem:[%s5504_s0 + $0x20] ss:$12 sps:$4 sm:$0xff]   ;;  %v4169_v42 = vld [vmem:[%s5504_s0 + $0x38] ss:$12 sps:$4 sm:$0xff]  }
 0x586   :  { %v2674_v24 = vpack.c.bf16 %v2542_v11, %v2539_v53  ;;  %v4168_v53 = vld [vmem:[%s5504_s0 + $0xc0] ss:$12 sps:$4 sm:$0xff]   ;;  %v4171_v11 = vld [vmem:[%s5504_s0 + $0x50] ss:$12 sps:$4 sm:$0xff]  }
 0x588   :  { %2715 = vmatpush1.bf16.msra.mxu1 %v2674_v24  ;;  %v4172_v24 = vld [vmem:[%s5504_s0 + $0xd8] ss:$12 sps:$4 sm:$0xff]  }
 0x589   :  { %2716 = vmatprep.subr.bf16.mxu1 %v4221_v32 }
 0x58a   :  { %v3843_v48 = vpop.f32.mrb[212].mxu0 }
 0x58b   :  { %v2555_v8 = vpop.f32.mrb[213].mxu0 }
 0x58c   :  { %2717 = vmatpush1.bf16.msra.mxu1 %v2675_v9  ;;  %v3844_v33 = vpop.f32.mrb[214].mxu0  ;;  %v4170_v9 = vld [vmem:[%s5504_s0 + $0xdc] ss:$12 sps:$4 sm:$0xff]  }
 0x58d   :  { %v2677_v52 = vpack.c.bf16 %v3844_v33, %v3843_v48  ;;  %v2558_v30 = vpop.f32.mrb[215].mxu0  ;;  %2718 = vmatprep.subr.bf16.mxu1 %v4221_v32  ;;  %v4173_v48 = vld [vmem:[%s5504_s0 + $0x68] ss:$12 sps:$4 sm:$0xff]   ;;  %v4175_v33 = vld [vmem:[%s5504_s0 + $0x80] ss:$12 sps:$4 sm:$0xff]  }
 0x58e   :  { %v2676_v54 = vpack.c.bf16 %v2558_v30, %v2555_v8  ;;  %v4174_v8 = vld [vmem:[%s5504_s0 + $0xf4] ss:$12 sps:$4 sm:$0xff]   ;;  %v4177_v30 = vld [vmem:[%s5504_s0 + $0x98] ss:$12 sps:$4 sm:$0xff]  }
 0x590   :  { %2719 = vmatpush1.bf16.msra.mxu1 %v2676_v54  ;;  %v4178_v54 = vld [vmem:[%s5504_s0 + $0x10c] ss:$12 sps:$4 sm:$0xff]  }
 0x591   :  { %2720 = vmatprep.subr.bf16.mxu1 %v4221_v32 }
 0x592   :  { %v3847_v14 = vpop.f32.mrb[216].mxu0 }
 0x593   :  { %v2571_v16 = vpop.f32.mrb[217].mxu0 }
 0x594   :  { %2721 = vmatpush1.bf16.msra.mxu1 %v2677_v52  ;;  %v3848_v17 = vpop.f32.mrb[218].mxu0  ;;  %v4176_v52 = vld [vmem:[%s5504_s0 + $0xf0] ss:$12 sps:$4 sm:$0xff]  }
 0x595   :  { %v2679_v18 = vpack.c.bf16 %v3848_v17, %v3847_v14  ;;  %v2574_v20 = vpop.f32.mrb[219].mxu0  ;;  %2722 = vmatprep.subr.bf16.mxu1 %v4221_v32  ;;  %v4179_v14 = vld [vmem:[%s5504_s0 + $0xb0] ss:$12 sps:$4 sm:$0xff]   ;;  %v4181_v17 = vld [vmem:[%s5504_s0 + $0xc8] ss:$12 sps:$4 sm:$0xff]  }
 0x596   :  { %v2678_v21 = vpack.c.bf16 %v2574_v20, %v2571_v16  ;;  %v4180_v16 = vld [vmem:[%s5504_s0 + $0x108] ss:$12 sps:$4 sm:$0xff]   ;;  %v4183_v20 = vld [vmem:[%s5504_s0 + $0xe0] ss:$12 sps:$4 sm:$0xff]  }
 0x598   :  { %2723 = vmatpush1.bf16.msra.mxu1 %v2678_v21  ;;  %v4184_v21 = vld [vmem:[%s5504_s0 + $0x120] ss:$12 sps:$4 sm:$0xff]  }
 0x599   :  { %2724 = vmatprep.subr.bf16.mxu1 %v4221_v32 }
 0x59a   :  { %v3851_v49 = vpop.f32.mrb[220].mxu0 }
 0x59b   :  { %v2587_v59 = vpop.f32.mrb[221].mxu0 }
 0x59c   :  { %2725 = vmatpush1.bf16.msra.mxu1 %v2679_v18  ;;  %v3852_v22 = vpop.f32.mrb[222].mxu0  ;;  %v4182_v18 = vld [vmem:[%s5504_s0 + $0x124] ss:$12 sps:$4 sm:$0xff]  }
 0x59d   :  { %v2681_v23 = vpack.c.bf16 %v3852_v22, %v3851_v49  ;;  %v2590_v1 = vpop.f32.mrb[223].mxu0  ;;  %2726 = vmatprep.subr.bf16.mxu1 %v4221_v32  ;;  %v4185_v49 = vld [vmem:[%s5504_s0 + $0xf8] ss:$12 sps:$4 sm:$0xff]   ;;  %v4187_v22 = vld [vmem:[%s5504_s0 + $0x110] ss:$12 sps:$4 sm:$0xff]  }
 0x59e   :  { %v2680_v0 = vpack.c.bf16 %v2590_v1, %v2587_v59  ;;  %v4186_v59 = vld [vmem:[%s5504_s0 + $0x13c] ss:$12 sps:$4 sm:$0xff]  }
 0x59f   :  { %v4189_v1 = vld [vmem:[%s5504_s0 + $0x128] ss:$12 sps:$4 sm:$0xff]  }
 0x5a0   :  { %2727 = vmatpush1.bf16.msra.mxu1 %v2680_v0  ;;  %v4190_v0 = vld [vmem:[%s5504_s0 + $0x154] ss:$12 sps:$4 sm:$0xff]  }
 0x5a1   :  { %2728 = vmatprep.subr.bf16.mxu1 %v4221_v32  ;;  %v4153_v32 = vld [vmem:[%s5504_s0 + $0x18] ss:$12 sps:$4 sm:$0xff]  }
 0x5a4   :  { %2729 = vmatpush1.bf16.msra.mxu1 %v2681_v23  ;;  %v4188_v23 = vld [vmem:[%s5504_s0 + $0x138] ss:$12 sps:$4 sm:$0xff]  }
 0x5a7   :  { %2731 = vmatmul.mubr.bf16.vlgmr.msra.gmra.mrb[192].mxu1 %v4151_v27  ;;  %v4191_v27 = vld [vmem:[%s5504_s0 + $0x140] ss:$12 sps:$4 sm:$0xff]  }
 0x5a8   :  { %2738 = vmatprep.mubr.bf16.mxu1 %v4152_v28  ;;  %v4192_v28 = vld [vmem:[%s5504_s0 + $0x150] ss:$12 sps:$4 sm:$0xff]  }
 0x5a9   :  { %v3855_v61 = vpop.f32.mrb[224].mxu0 }
 0x5aa   :  { %v2603_v29 = vpop.f32.mrb[225].mxu0 }
 0x5ab   :  { %v3856_v35 = vpop.f32.mrb[226].mxu0 }
 0x5ac   :  { %v2683_v36 = vpack.c.bf16 %v3856_v35, %v3855_v61  ;;  %v2606_v37 = vpop.f32.mrb[227].mxu0  ;;  %v4193_v61 = vld [vmem:[%s5504_s0 + $0x158] ss:$12 sps:$4 sm:$0xff]   ;;  %v4195_v35 = vld [vmem:[%s5504_s0 + $0x170] ss:$12 sps:$4 sm:$0xff]  }
 0x5ad   :  { %v2682_v2 = vpack.c.bf16 %v2606_v37, %v2603_v29  ;;  %v4194_v29 = vld [vmem:[%s5504_s0 + $0x16c] ss:$12 sps:$4 sm:$0xff]   ;;  %v4197_v37 = vld [vmem:[%s5504_s0 + $0x184] ss:$12 sps:$4 sm:$0xff]  }
 0x5af   :  { %3869 = vmatprep.subr.bf16.mxu0 %v2682_v2  ;;  %2739 = vmatmul.mubr.bf16.gmra.mrb[196].mxu1 %v4153_v32  ;;  %v4199_v32 = vld [vmem:[%s5504_s0 + $0x180] ss:$12 sps:$4 sm:$0xff]  }
 0x5b0   :  { %3870 = vmatpush3.bf16.msra.mxu0 %v2682_v2  ;;  %2746 = vmatprep.mubr.bf16.mxu1 %v4154_v38  ;;  %v4198_v2 = vld [vmem:[%s5504_s0 + $0x188] ss:$12 sps:$4 sm:$0xff]   ;;  %v4200_v38 = vld [vmem:[%s5504_s0 + $0x1a0] ss:$12 sps:$4 sm:$0xff]  }
 0x5b1   :  { %3871 = vmatprep.subr.bf16.mxu0 %v2683_v36 }
 0x5b4   :  { %3872 = vmatpush3.bf16.msra.mxu0 %v2683_v36  ;;  %v4196_v36 = vld [vmem:[%s5504_s0 + $0x168] ss:$12 sps:$4 sm:$0xff]  }
 0x5b7   :  { %2747 = vmatmul.mubr.bf16.gmra.mrb[200].mxu1 %v4155_v39  ;;  %v4201_v39 = vld [vmem:[%s5504_s0 + $0x19c] ss:$12 sps:$4 sm:$0xff]  }
 0x5b8   :  { %2754 = vmatprep.mubr.bf16.mxu1 %v4156_v15  ;;  %v4202_v15 = vld [vmem:[%s5504_s0 + $0x1b8] ss:$12 sps:$4 sm:$0xff]  }
 0x5b9   :  { %v3859_v40 = vpop.f32.mrb[228].mxu0 }
 0x5ba   :  { %v2619_v63 = vpop.f32.mrb[229].mxu0 }
 0x5bb   :  { %v3860_v41 = vpop.f32.mrb[230].mxu0 }
 0x5bc   :  { %v2685_v43 = vpack.c.bf16 %v3860_v41, %v3859_v40  ;;  %v2622_v25 = vpop.f32.mrb[231].mxu0  ;;  %v4203_v40 = vld [vmem:[%s5504_s0 + $0x198] ss:$12 sps:$4 sm:$0xff]   ;;  %v4205_v41 = vld [vmem:[%s5504_s0 + $0x1b4] ss:$12 sps:$4 sm:$0xff]  }
 0x5bd   :  { %v2684_v46 = vpack.c.bf16 %v2622_v25, %v2619_v63  ;;  %v4204_v63 = vld [vmem:[%s5504_s0 + $0x1d0] ss:$12 sps:$4 sm:$0xff]  }
 0x5be   :  { %v4207_v25 = vld [vmem:[%s5504_s0 + $0x1b0] ss:$12 sps:$4 sm:$0xff]  }
 0x5bf   :  { %3873 = vmatprep.subr.bf16.mxu0 %v2684_v46  ;;  %2755 = vmatmul.mubr.bf16.gmra.mrb[204].mxu1 %v4157_v45  ;;  %v4209_v45 = vld [vmem:[%s5504_s0 + $0x1cc] ss:$12 sps:$4 sm:$0xff]  }
 0x5c0   :  { %3874 = vmatpush3.bf16.msra.mxu0 %v2684_v46  ;;  %2762 = vmatprep.mubr.bf16.mxu1 %v4158_v10  ;;  %v4208_v46 = vld [vmem:[%s5504_s0 + $0x200] ss:$12 sps:$4 sm:$0xff]   ;;  %v4210_v10 = vld [vmem:[%s5504_s0 + $0x218] ss:$12 sps:$4 sm:$0xff]  }
 0x5c1   :  { %3875 = vmatprep.subr.bf16.mxu0 %v2685_v43 }
 0x5c4   :  { %3876 = vmatpush3.bf16.msra.mxu0 %v2685_v43  ;;  %v4206_v43 = vld [vmem:[%s5504_s0 + $0x1e8] ss:$12 sps:$4 sm:$0xff]  }
 0x5c7   :  { %2763 = vmatmul.mubr.bf16.gmra.mrb[208].mxu1 %v4159_v50  ;;  %v4211_v50 = vld [vmem:[%s5504_s0 + $0x1c8] ss:$12 sps:$4 sm:$0xff]  }
 0x5c8   :  { %2770 = vmatprep.mubr.bf16.mxu1 %v4160_v19  ;;  %v4212_v19 = vld [vmem:[%s5504_s0 + $0x230] ss:$12 sps:$4 sm:$0xff]  }
 0x5c9   :  { %v3863_v4 = vpop.f32.mrb[232].mxu0 }
 0x5ca   :  { %v2635_v51 = vpop.f32.mrb[233].mxu0 }
 0x5cb   :  { %v3864_v13 = vpop.f32.mrb[234].mxu0 }
 0x5cc   :  { %v2687_v31 = vpack.c.bf16 %v3864_v13, %v3863_v4  ;;  %v2638_v5 = vpop.f32.mrb[235].mxu0  ;;  %v4213_v4 = vld [vmem:[%s5504_s0 + $0x1e4] ss:$12 sps:$4 sm:$0xff]   ;;  %v4215_v13 = vld [vmem:[%s5504_s0 + $0x1fc] ss:$12 sps:$4 sm:$0xff]  }
 0x5cd   :  { %v2686_v47 = vpack.c.bf16 %v2638_v5, %v2635_v51  ;;  %v4214_v51 = vld [vmem:[%s5504_s0 + $0x1e0] ss:$12 sps:$4 sm:$0xff]  }
 0x5ce   :  { %v4217_v5 = vld [vmem:[%s5504_s0 + $0x214] ss:$12 sps:$4 sm:$0xff]  }
 0x5cf   :  { %3877 = vmatprep.subr.bf16.mxu0 %v2686_v47  ;;  %2771 = vmatmul.mubr.bf16.gmra.mrb[212].mxu1 %v4161_v55  ;;  %v4219_v55 = vld [vmem:[%s5504_s0 + $0x22c] ss:$12 sps:$4 sm:$0xff]  }
 0x5d0   :  { %3878 = vmatpush3.bf16.msra.mxu0 %v2686_v47  ;;  %2778 = vmatprep.mubr.bf16.mxu1 %v4162_v58  ;;  %v4218_v47 = vld [vmem:[%s5504_s0 + $0x210] ss:$12 sps:$4 sm:$0xff]   ;;  %v4220_v58 = vld [vmem:[%s5504_s0 + $0x228] ss:$12 sps:$4 sm:$0xff]  }
 0x5d1   :  { %3879 = vmatprep.subr.bf16.mxu0 %v2687_v31 }
 0x5d4   :  { %3880 = vmatpush3.bf16.msra.mxu0 %v2687_v31  ;;  %v4216_v31 = vld [vmem:[%s5504_s0 + $0x1f8] ss:$12 sps:$4 sm:$0xff]  }
 0x5d7   :  { %2779 = vmatmul.mubr.bf16.gmra.mrb[216].mxu1 %v4163_v60 }
 0x5d8   :  { %2786 = vmatprep.mubr.bf16.mxu1 %v4164_v44 }
 0x5d9   :  { %v3867_v57 = vpop.f32.mrb[236].mxu0 }
 0x5da   :  { %v2651_v62 = vpop.f32.mrb[237].mxu0 }
 0x5db   :  { %v3868_v3 = vpop.f32.mrb[238].mxu0 }
 0x5dc   :  { %v2689_v12 = vpack.c.bf16 %v3868_v3, %v3867_v57  ;;  %v2654_v56 = vpop.f32.mrb[239].mxu0 }
 0x5dd   :  { %v2688_v26 = vpack.c.bf16 %v2654_v56, %v2651_v62 }
 0x5df   :  { %3881 = vmatprep.subr.bf16.mxu0 %v2688_v26  ;;  %2787 = vmatmul.mubr.bf16.gmra.mrb[220].mxu1 %v4165_v6 }
 0x5e0   :  { %3882 = vmatpush3.bf16.msra.mxu0 %v2688_v26  ;;  %2794 = vmatprep.mubr.bf16.mxu1 %v4166_v7 }
 0x5e1   :  { %3883 = vmatprep.subr.bf16.mxu0 %v2689_v12 }
 0x5e4   :  { %3884 = vmatpush3.bf16.msra.mxu0 %v2689_v12 }
 0x5e7   :  { %3886 = vmatmul.mubr.bf16.vlgmr.msra.gmra.mrb[240].mxu0 %v4167_v34  ;;  %2795 = vmatmul.mubr.bf16.gmra.mrb[224].mxu1 %v4168_v53 }
 0x5e8   :  { %3889 = vmatprep.mubr.bf16.mxu0 %v4169_v42  ;;  %2802 = vmatprep.mubr.bf16.mxu1 %v4170_v9 }
 0x5ef   :  { %3890 = vmatmul.mubr.bf16.gmra.mrb[244].mxu0 %v4171_v11  ;;  %2803 = vmatmul.mubr.bf16.gmra.mrb[228].mxu1 %v4172_v24 }
 0x5f0   :  { %3893 = vmatprep.mubr.bf16.mxu0 %v4173_v48  ;;  %2810 = vmatprep.mubr.bf16.mxu1 %v4174_v8 }
 0x5f7   :  { %3894 = vmatmul.mubr.bf16.gmra.mrb[248].mxu0 %v4175_v33  ;;  %2811 = vmatmul.mubr.bf16.gmra.mrb[232].mxu1 %v4176_v52 }
 0x5f8   :  { %3897 = vmatprep.mubr.bf16.mxu0 %v4177_v30  ;;  %2818 = vmatprep.mubr.bf16.mxu1 %v4178_v54 }
 0x5ff   :  { %3898 = vmatmul.mubr.bf16.gmra.mrb[252].mxu0 %v4179_v14  ;;  %2819 = vmatmul.mubr.bf16.gmra.mrb[236].mxu1 %v4180_v16 }
 0x600   :  { %3901 = vmatprep.mubr.bf16.mxu0 %v4181_v17  ;;  %2826 = vmatprep.mubr.bf16.mxu1 %v4182_v18 }
 0x607   :  { %3902 = vmatmul.mubr.bf16.gmra.mrb[0].mxu0 %v4183_v20  ;;  %2827 = vmatmul.mubr.bf16.gmra.mrb[240].mxu1 %v4184_v21 }
 0x608   :  { %3905 = vmatprep.mubr.bf16.mxu0 %v4185_v49  ;;  %2834 = vmatprep.mubr.bf16.mxu1 %v4186_v59 }
 0x60f   :  { %3906 = vmatmul.mubr.bf16.gmra.mrb[4].mxu0 %v4187_v22  ;;  %2835 = vmatmul.mubr.bf16.gmra.mrb[244].mxu1 %v4188_v23 }
 0x610   :  { %3909 = vmatprep.mubr.bf16.mxu0 %v4189_v1  ;;  %2842 = vmatprep.mubr.bf16.mxu1 %v4190_v0  ;;  %v5297_v1 = vld [vmem:[%s5505_s3 + $0x2] ss:$0 sm:$0xff] }
 0x617   :  { %3910 = vmatmul.mubr.bf16.gmra.mrb[8].mxu0 %v4191_v27  ;;  %2843 = vmatmul.mubr.bf16.gmra.mrb[248].mxu1 %v4192_v28 }
 0x618   :  { %3913 = vmatprep.mubr.bf16.mxu0 %v4193_v61  ;;  %2850 = vmatprep.mubr.bf16.mxu1 %v4194_v29 }
 0x61f   :  { %3914 = vmatmul.mubr.bf16.gmra.mrb[12].mxu0 %v4195_v35  ;;  %2851 = vmatmul.mubr.bf16.gmra.mrb[252].mxu1 %v4196_v36 }
 0x620   :  { %2858 = vmatprep.mubr.bf16.mxu1 %v4197_v37  ;;  %3917 = vmatprep.mubr.bf16.mxu0 %v4198_v2 }
 0x627   :  { %2859 = vmatmul.mubr.bf16.gmra.mrb[0].mxu1 %v4199_v32  ;;  %3918 = vmatmul.mubr.bf16.gmra.mrb[16].mxu0 %v4200_v38 }
 0x628   :  { %2866 = vmatprep.mubr.bf16.mxu1 %v4201_v39  ;;  %3921 = vmatprep.mubr.bf16.mxu0 %v4202_v15 }
 0x62f   :  { %2867 = vmatmul.mubr.bf16.gmra.mrb[4].mxu1 %v4203_v40  ;;  %3922 = vmatmul.mubr.bf16.gmra.mrb[20].mxu0 %v4204_v63 }
 0x630   :  { %2874 = vmatprep.mubr.bf16.mxu1 %v4205_v41  ;;  %3925 = vmatprep.mubr.bf16.mxu0 %v4206_v43 }
 0x637   :  { %2875 = vmatmul.mubr.bf16.gmra.mrb[8].mxu1 %v4207_v25  ;;  %3926 = vmatmul.mubr.bf16.gmra.mrb[24].mxu0 %v4208_v46 }
 0x638   :  { %2882 = vmatprep.mubr.bf16.mxu1 %v4209_v45  ;;  %3929 = vmatprep.mubr.bf16.mxu0 %v4210_v10 }
 0x63f   :  { %2883 = vmatmul.mubr.bf16.gmra.mrb[12].mxu1 %v4211_v50  ;;  %3930 = vmatmul.mubr.bf16.gmra.mrb[28].mxu0 %v4212_v19 }
 0x640   :  { %2890 = vmatprep.mubr.bf16.mxu1 %v4213_v4 }
 0x647   :  { %2891 = vmatmul.mubr.bf16.gmra.mrb[16].mxu1 %v4214_v51 }
 0x648   :  { %2898 = vmatprep.mubr.bf16.mxu1 %v4215_v13 }
 0x64f   :  { %2899 = vmatmul.mubr.bf16.gmra.mrb[20].mxu1 %v4216_v31 }
 0x650   :  { %2906 = vmatprep.mubr.bf16.mxu1 %v4217_v5 }
 0x657   :  { %2907 = vmatmul.mubr.bf16.gmra.mrb[24].mxu1 %v4218_v47 }
 0x658   :  { %2914 = vmatprep.mubr.bf16.mxu1 %v4219_v55 }
 0x65f   :  { %2915 = vmatmul.mubr.bf16.gmra.mrb[28].mxu1 %v4220_v58 }
 0x67a   :  { %v2732_v60 = vpop.f32.mrb[192].mxu1 }
 0x67b   :  { %v2734_v44 = vpop.f32.mrb[193].mxu1  ;;  %v2733_v27 = vadd.f32 %v5297_v1, %v2732_v60 }
 0x67c   :  { %v2735_v57 = vpop.f32.mrb[194].mxu1 }
 0x67d   :  { %v2737_v62 = vpop.f32.mrb[195].mxu1  ;;  %v2736_v2 = vadd.f32 %v5297_v1, %v2735_v57 }
 0x682   :  { %v2740_v3 = vpop.f32.mrb[196].mxu1 }
 0x683   :  { %v2742_v12 = vpop.f32.mrb[197].mxu1  ;;  %v2741_v0 = vadd.f32 %v5297_v1, %v2740_v3 }
 0x684   :  { %v2743_v56 = vpop.f32.mrb[198].mxu1 }
 0x685   :  { %v2745_v26 = vpop.f32.mrb[199].mxu1  ;;  %v2744_v36 = vadd.f32 %v5297_v1, %v2743_v56 }
 0x68a   :  { %v2748_v6 = vpop.f32.mrb[200].mxu1 }
 0x68b   :  { %v2750_v7 = vpop.f32.mrb[201].mxu1  ;;  %v2749_v25 = vadd.f32 %v5297_v1, %v2748_v6 }
 0x68c   :  { %v2751_v34 = vpop.f32.mrb[202].mxu1 }
 0x68d   :  { %v2753_v53 = vpop.f32.mrb[203].mxu1  ;;  %v2752_v51 = vadd.f32 %v5297_v1, %v2751_v34 }
 0x692   :  { %v2756_v42 = vpop.f32.mrb[204].mxu1 }
 0x693   :  { %v2758_v9 = vpop.f32.mrb[205].mxu1  ;;  %v2757_v43 = vadd.f32 %v5297_v1, %v2756_v42 }
 0x694   :  { %v2759_v11 = vpop.f32.mrb[206].mxu1 }
 0x695   :  { %v2761_v24 = vpop.f32.mrb[207].mxu1  ;;  %v2760_v19 = vadd.f32 %v5297_v1, %v2759_v11 }
 0x69a   :  { %v2764_v48 = vpop.f32.mrb[208].mxu1 }
 0x69b   :  { %v2766_v8 = vpop.f32.mrb[209].mxu1  ;;  %v2765_v57 = vadd.f32 %v5297_v1, %v2764_v48 }
 0x69c   :  { %v5284_v33 = vpop.f32.mrb[210].mxu1 }
 0x69d   :  { %v2769_v52 = vpop.f32.mrb[211].mxu1  ;;  %v2768_v7 = vadd.f32 %v5297_v1, %v5284_v33 }
 0x6a2   :  { %v2772_v30 = vpop.f32.mrb[212].mxu1 }
 0x6a3   :  { %v2774_v54 = vpop.f32.mrb[213].mxu1  ;;  %v2773_v44 = vadd.f32 %v5297_v1, %v2772_v30 }
 0x6a4   :  { %v2775_v14 = vpop.f32.mrb[214].mxu1 }
 0x6a5   :  { %v2777_v16 = vpop.f32.mrb[215].mxu1  ;;  %v2776_v26 = vadd.f32 %v5297_v1, %v2775_v14 }
 0x6aa   :  { %v5286_v17 = vpop.f32.mrb[216].mxu1 }
 0x6ab   :  { %v2782_v18 = vpop.f32.mrb[217].mxu1  ;;  %v2781_v33 = vadd.f32 %v5297_v1, %v5286_v17 }
 0x6ac   :  { %v5288_v20 = vpop.f32.mrb[218].mxu1 }
 0x6ad   :  { %v2785_v21 = vpop.f32.mrb[219].mxu1 }
 0x6ae   :  { %v2784_v21 = vadd.f32 %v5297_v1, %v5288_v20 }
 0x6b2   :  { %v5290_v49 = vpop.f32.mrb[220].mxu1 }
 0x6b3   :  { %v2790_v59 = vpop.f32.mrb[221].mxu1  ;;  %v2789_v8 = vadd.f32 %v5297_v1, %v5290_v49 }
 0x6b4   :  { %v5292_v22 = vpop.f32.mrb[222].mxu1 }
 0x6b5   :  { %v2793_v23 = vpop.f32.mrb[223].mxu1  ;;  %v2792_v16 = vadd.f32 %v5297_v1, %v5292_v22 }
 0x6ba   :  { %v3887_v28 = vpop.f32.mrb[240].mxu0  ;;  %v5301_v61 = vpop.f32.mrb[224].mxu1 }
 0x6bb   :  { %v2957_v29 = vpop.f32.mrb[241].mxu0  ;;  %v2966_v35 = vadd.f32 %v3887_v28, %v2741_v0  ;;  %v2798_v37 = vpop.f32.mrb[225].mxu1  ;;  %v2797_v22 = vadd.f32 %v5297_v1, %v5301_v61 }
 0x6bc   :  { %v2958_v32 = vadd.f32 %v2957_v29, %v2733_v27  ;;  %v3888_v38 = vpop.f32.mrb[242].mxu0  ;;  %v5305_v39 = vpop.f32.mrb[226].mxu1 }
 0x6bd   :  { %v2960_v15 = vpop.f32.mrb[243].mxu0  ;;  %3150 = vst [vmem:[%s5506_s4 + $0x10] sm:$0xff] %v2966_v35  ;;  %v2969_v40 = vadd.f32 %v3888_v38, %v2744_v36  ;;  %v2801_v63 = vpop.f32.mrb[227].mxu1  ;;  %v2800_v38 = vadd.f32 %v5297_v1, %v5305_v39 }
 0x6be   :  { %3148 = vst [vmem:[%s5506_s4] sm:$0xff] %v2958_v32  ;;  %v2961_v41 = vadd.f32 %v2960_v15, %v2736_v2 }
 0x6bf   :  { %3151 = vst [vmem:[%s5506_s4 + $0x18] sm:$0xff] %v2969_v40 }
 0x6c0   :  { %3149 = vst [vmem:[%s5506_s4 + $0x8] sm:$0xff] %v2961_v41 }
 0x6c2   :  { %v3891_v46 = vpop.f32.mrb[244].mxu0  ;;  %v2804_v45 = vpop.f32.mrb[228].mxu1 }
 0x6c3   :  { %v2973_v10 = vpop.f32.mrb[245].mxu0  ;;  %v2982_v50 = vadd.f32 %v3891_v46, %v2757_v43  ;;  %v2806_v4 = vpop.f32.mrb[229].mxu1  ;;  %v2805_v20 = vadd.f32 %v5297_v1, %v2804_v45 }
 0x6c4   :  { %v2974_v13 = vadd.f32 %v2973_v10, %v2749_v25  ;;  %v3892_v31 = vpop.f32.mrb[246].mxu0  ;;  %v2807_v5 = vpop.f32.mrb[230].mxu1 }
 0x6c5   :  { %v2976_v47 = vpop.f32.mrb[247].mxu0  ;;  %3154 = vst [vmem:[%s5506_s4 + $0x30] sm:$0xff] %v2982_v50  ;;  %v2985_v55 = vadd.f32 %v3892_v31, %v2760_v19  ;;  %v2809_v58 = vpop.f32.mrb[231].mxu1  ;;  %v2808_v2 = vadd.f32 %v5297_v1, %v2807_v5 }
 0x6c6   :  { %3152 = vst [vmem:[%s5506_s4 + $0x20] sm:$0xff] %v2974_v13  ;;  %v2977_v60 = vadd.f32 %v2976_v47, %v2752_v51 }
 0x6c7   :  { %3155 = vst [vmem:[%s5506_s4 + $0x38] sm:$0xff] %v2985_v55 }
 0x6c8   :  { %3153 = vst [vmem:[%s5506_s4 + $0x28] sm:$0xff] %v2977_v60 }
 0x6ca   :  { %v3895_v62 = vpop.f32.mrb[248].mxu0  ;;  %v2812_v3 = vpop.f32.mrb[232].mxu1 }
 0x6cb   :  { %v2989_v12 = vpop.f32.mrb[249].mxu0  ;;  %v2998_v56 = vadd.f32 %v3895_v62, %v2773_v44  ;;  %v2814_v6 = vpop.f32.mrb[233].mxu1  ;;  %v2813_v46 = vadd.f32 %v5297_v1, %v2812_v3 }
 0x6cc   :  { %v2990_v34 = vadd.f32 %v2989_v12, %v2765_v57  ;;  %v3896_v53 = vpop.f32.mrb[250].mxu0  ;;  %v2815_v42 = vpop.f32.mrb[234].mxu1 }
 0x6cd   :  { %v2992_v9 = vpop.f32.mrb[251].mxu0  ;;  %3158 = vst [vmem:[%s5506_s4 + $0x50] sm:$0xff] %v2998_v56  ;;  %v3001_v11 = vadd.f32 %v3896_v53, %v2776_v26  ;;  %v2817_v24 = vpop.f32.mrb[235].mxu1  ;;  %v2816_v13 = vadd.f32 %v5297_v1, %v2815_v42 }
 0x6ce   :  { %3156 = vst [vmem:[%s5506_s4 + $0x40] sm:$0xff] %v2990_v34  ;;  %v2993_v48 = vadd.f32 %v2992_v9, %v2768_v7 }
 0x6cf   :  { %3159 = vst [vmem:[%s5506_s4 + $0x58] sm:$0xff] %v3001_v11 }
 0x6d0   :  { %3157 = vst [vmem:[%s5506_s4 + $0x48] sm:$0xff] %v2993_v48 }
 0x6d2   :  { %v3899_v52 = vpop.f32.mrb[252].mxu0  ;;  %v2820_v30 = vpop.f32.mrb[236].mxu1 }
 0x6d3   :  { %v3005_v54 = vpop.f32.mrb[253].mxu0  ;;  %v3014_v14 = vadd.f32 %v3899_v52, %v2789_v8  ;;  %v2822_v18 = vpop.f32.mrb[237].mxu1  ;;  %v2821_v39 = vadd.f32 %v5297_v1, %v2820_v30 }
 0x6d4   :  { %v3006_v59 = vadd.f32 %v3005_v54, %v2781_v33  ;;  %v3900_v23 = vpop.f32.mrb[254].mxu0  ;;  %v2823_v0 = vpop.f32.mrb[238].mxu1 }
 0x6d5   :  { %v3008_v27 = vpop.f32.mrb[255].mxu0  ;;  %3162 = vst [vmem:[%s5506_s4 + $0x70] sm:$0xff] %v3014_v14  ;;  %v3017_v17 = vadd.f32 %v3900_v23, %v2792_v16  ;;  %v2825_v49 = vpop.f32.mrb[239].mxu1  ;;  %v2824_v4 = vadd.f32 %v5297_v1, %v2823_v0 }
 0x6d6   :  { %3160 = vst [vmem:[%s5506_s4 + $0x60] sm:$0xff] %v3006_v59  ;;  %v3009_v28 = vadd.f32 %v3008_v27, %v2784_v21 }
 0x6d7   :  { %3163 = vst [vmem:[%s5506_s4 + $0x78] sm:$0xff] %v3017_v17 }
 0x6d8   :  { %3161 = vst [vmem:[%s5506_s4 + $0x68] sm:$0xff] %v3009_v28 }
 0x6da   :  { %v3903_v29 = vpop.f32.mrb[0].mxu0  ;;  %v2828_v35 = vpop.f32.mrb[240].mxu1 }
 0x6db   :  { %v3021_v36 = vpop.f32.mrb[1].mxu0  ;;  %v3030_v37 = vadd.f32 %v3903_v29, %v2805_v20  ;;  %v2830_v32 = vpop.f32.mrb[241].mxu1  ;;  %v2829_v62 = vadd.f32 %v5297_v1, %v2828_v35 }
 0x6dc   :  { %v3022_v15 = vadd.f32 %v3021_v36, %v2797_v22  ;;  %v3904_v40 = vpop.f32.mrb[2].mxu0  ;;  %v2831_v63 = vpop.f32.mrb[242].mxu1 }
 0x6dd   :  { %v3024_v41 = vpop.f32.mrb[3].mxu0  ;;  %3166 = vst [vmem:[%s5506_s4 + $0x90] sm:$0xff] %v3030_v37  ;;  %v3033_v43 = vadd.f32 %v3904_v40, %v2808_v2  ;;  %v2833_v61 = vpop.f32.mrb[243].mxu1  ;;  %v2832_v34 = vadd.f32 %v5297_v1, %v2831_v63 }
 0x6de   :  { %3164 = vst [vmem:[%s5506_s4 + $0x80] sm:$0xff] %v3022_v15  ;;  %v3025_v25 = vadd.f32 %v3024_v41, %v2800_v38 }
 0x6df   :  { %3167 = vst [vmem:[%s5506_s4 + $0x98] sm:$0xff] %v3033_v43 }
 0x6e0   :  { %3165 = vst [vmem:[%s5506_s4 + $0x88] sm:$0xff] %v3025_v25 }
 0x6e2   :  { %v3907_v45 = vpop.f32.mrb[4].mxu0  ;;  %v2836_v10 = vpop.f32.mrb[244].mxu1 }
 0x6e3   :  { %v3037_v50 = vpop.f32.mrb[5].mxu0  ;;  %v3046_v19 = vadd.f32 %v3907_v45, %v2821_v39  ;;  %v2838_v51 = vpop.f32.mrb[245].mxu1  ;;  %v2837_v57 = vadd.f32 %v5297_v1, %v2836_v10 }
 0x6e4   :  { %v3038_v31 = vadd.f32 %v3037_v50, %v2813_v46  ;;  %v3908_v5 = vpop.f32.mrb[6].mxu0  ;;  %v2839_v47 = vpop.f32.mrb[246].mxu1 }
 0x6e5   :  { %v3040_v55 = vpop.f32.mrb[7].mxu0  ;;  %3170 = vst [vmem:[%s5506_s4 + $0xb0] sm:$0xff] %v3046_v19  ;;  %v3049_v58 = vadd.f32 %v3908_v5, %v2824_v4  ;;  %v2841_v60 = vpop.f32.mrb[247].mxu1  ;;  %v2840_v6 = vadd.f32 %v5297_v1, %v2839_v47 }
 0x6e6   :  { %3168 = vst [vmem:[%s5506_s4 + $0xa0] sm:$0xff] %v3038_v31  ;;  %v3041_v44 = vadd.f32 %v3040_v55, %v2816_v13 }
 0x6e7   :  { %3171 = vst [vmem:[%s5506_s4 + $0xb8] sm:$0xff] %v3049_v58 }
 0x6e8   :  { %3169 = vst [vmem:[%s5506_s4 + $0xa8] sm:$0xff] %v3041_v44 }
 0x6ea   :  { %v3911_v3 = vpop.f32.mrb[8].mxu0  ;;  %v2844_v12 = vpop.f32.mrb[248].mxu1 }
 0x6eb   :  { %v3053_v56 = vpop.f32.mrb[9].mxu0  ;;  %v3062_v26 = vadd.f32 %v3911_v3, %v2837_v57  ;;  %v2846_v7 = vpop.f32.mrb[249].mxu1  ;;  %v2845_v33 = vadd.f32 %v5297_v1, %v2844_v12 }
 0x6ec   :  { %v3054_v53 = vadd.f32 %v3053_v56, %v2829_v62  ;;  %v3912_v42 = vpop.f32.mrb[10].mxu0  ;;  %v2847_v9 = vpop.f32.mrb[250].mxu1 }
 0x6ed   :  { %v3056_v11 = vpop.f32.mrb[11].mxu0  ;;  %3174 = vst [vmem:[%s5506_s4 + $0xd0] sm:$0xff] %v3062_v26  ;;  %v3065_v24 = vadd.f32 %v3912_v42, %v2840_v6  ;;  %v2849_v48 = vpop.f32.mrb[251].mxu1  ;;  %v2848_v18 = vadd.f32 %v5297_v1, %v2847_v9 }
 0x6ee   :  { %3172 = vst [vmem:[%s5506_s4 + $0xc0] sm:$0xff] %v3054_v53  ;;  %v3057_v8 = vadd.f32 %v3056_v11, %v2832_v34 }
 0x6ef   :  { %3175 = vst [vmem:[%s5506_s4 + $0xd8] sm:$0xff] %v3065_v24 }
 0x6f0   :  { %3173 = vst [vmem:[%s5506_s4 + $0xc8] sm:$0xff] %v3057_v8 }
 0x6f2   :  { %v3915_v52 = vpop.f32.mrb[12].mxu0  ;;  %v2852_v30 = vpop.f32.mrb[252].mxu1 }
 0x6f3   :  { %v3069_v54 = vpop.f32.mrb[13].mxu0  ;;  %v2853_v14 = vadd.f32 %v5297_v1, %v2852_v30  ;;  %v2854_v16 = vpop.f32.mrb[253].mxu1 }
 0x6f4   :  { %v3070_v21 = vadd.f32 %v3069_v54, %v2845_v33  ;;  %v3916_v59 = vpop.f32.mrb[14].mxu0  ;;  %v2855_v23 = vpop.f32.mrb[254].mxu1 }
 0x6f5   :  { %v3072_v0 = vpop.f32.mrb[15].mxu0  ;;  %v3078_v27 = vadd.f32 %v3915_v52, %v2853_v14  ;;  %v2856_v17 = vadd.f32 %v5297_v1, %v2855_v23  ;;  %v2857_v49 = vpop.f32.mrb[255].mxu1 }
 0x6f6   :  { %3176 = vst [vmem:[%s5506_s4 + $0xe0] sm:$0xff] %v3070_v21  ;;  %v3073_v28 = vadd.f32 %v3072_v0, %v2848_v18 }
 0x6f7   :  { %3178 = vst [vmem:[%s5506_s4 + $0xf0] sm:$0xff] %v3078_v27  ;;  %v3081_v20 = vadd.f32 %v3916_v59, %v2856_v17 }
 0x6f8   :  { %3177 = vst [vmem:[%s5506_s4 + $0xe8] sm:$0xff] %v3073_v28 }
 0x6f9   :  { %3179 = vst [vmem:[%s5506_s4 + $0xf8] sm:$0xff] %v3081_v20 }
 0x6fa   :  { %v2860_v22 = vpop.f32.mrb[0].mxu1  ;;  %v3919_v29 = vpop.f32.mrb[16].mxu0 }
 0x6fb   :  { %v2861_v35 = vadd.f32 %v5297_v1, %v2860_v22  ;;  %v2862_v36 = vpop.f32.mrb[1].mxu1  ;;  %v3085_v37 = vpop.f32.mrb[17].mxu0 }
 0x6fc   :  { %v2863_v2 = vpop.f32.mrb[2].mxu1  ;;  %v3920_v32 = vpop.f32.mrb[18].mxu0 }
 0x6fd   :  { %v2864_v38 = vadd.f32 %v5297_v1, %v2863_v2  ;;  %v2865_v15 = vpop.f32.mrb[3].mxu1  ;;  %v3086_v40 = vadd.f32 %v3085_v37, %v2861_v35  ;;  %v3088_v63 = vpop.f32.mrb[19].mxu0 }
 0x6ff   :  { %3180 = vst [vmem:[%s5506_s4 + $0x100] sm:$0xff] %v3086_v40  ;;  %v3089_v41 = vadd.f32 %v3088_v63, %v2864_v38 }
 0x701   :  { %3181 = vst [vmem:[%s5506_s4 + $0x108] sm:$0xff] %v3089_v41 }
 0x702   :  { %v2868_v43 = vpop.f32.mrb[4].mxu1  ;;  %v3923_v61 = vpop.f32.mrb[20].mxu0 }
 0x703   :  { %v2869_v25 = vadd.f32 %v5297_v1, %v2868_v43  ;;  %v2870_v39 = vpop.f32.mrb[5].mxu1  ;;  %v3101_v46 = vpop.f32.mrb[21].mxu0 }
 0x704   :  { %v2871_v45 = vpop.f32.mrb[6].mxu1  ;;  %v3924_v10 = vpop.f32.mrb[22].mxu0 }
 0x705   :  { %v3094_v50 = vadd.f32 %v3919_v29, %v2869_v25  ;;  %v2872_v19 = vadd.f32 %v5297_v1, %v2871_v45  ;;  %v2873_v4 = vpop.f32.mrb[7].mxu1  ;;  %v3104_v51 = vpop.f32.mrb[23].mxu0 }
 0x707   :  { %3182 = vst [vmem:[%s5506_s4 + $0x110] sm:$0xff] %v3094_v50  ;;  %v3097_v13 = vadd.f32 %v3920_v32, %v2872_v19 }
 0x709   :  { %3183 = vst [vmem:[%s5506_s4 + $0x118] sm:$0xff] %v3097_v13 }
 0x70a   :  { %v2876_v31 = vpop.f32.mrb[8].mxu1  ;;  %v3927_v5 = vpop.f32.mrb[24].mxu0 }
 0x70b   :  { %v2877_v47 = vadd.f32 %v5297_v1, %v2876_v31  ;;  %v2878_v55 = vpop.f32.mrb[9].mxu1  ;;  %v3117_v58 = vpop.f32.mrb[25].mxu0 }
 0x70c   :  { %v2879_v60 = vpop.f32.mrb[10].mxu1  ;;  %v3928_v44 = vpop.f32.mrb[26].mxu0 }
 0x70d   :  { %v2880_v57 = vadd.f32 %v5297_v1, %v2879_v60  ;;  %v2881_v62 = vpop.f32.mrb[11].mxu1  ;;  %v3102_v3 = vadd.f32 %v3101_v46, %v2877_v47  ;;  %v3120_v12 = vpop.f32.mrb[27].mxu0 }
 0x70f   :  { %3184 = vst [vmem:[%s5506_s4 + $0x120] sm:$0xff] %v3102_v3  ;;  %v3105_v56 = vadd.f32 %v3104_v51, %v2880_v57 }
 0x711   :  { %3185 = vst [vmem:[%s5506_s4 + $0x128] sm:$0xff] %v3105_v56 }
 0x712   :  { %v2884_v26 = vpop.f32.mrb[12].mxu1  ;;  %v3931_v6 = vpop.f32.mrb[28].mxu0 }
 0x713   :  { %v2885_v7 = vadd.f32 %v5297_v1, %v2884_v26  ;;  %v2886_v34 = vpop.f32.mrb[13].mxu1  ;;  %v3133_v53 = vpop.f32.mrb[29].mxu0 }
 0x714   :  { %v2887_v42 = vpop.f32.mrb[14].mxu1  ;;  %v3932_v9 = vpop.f32.mrb[30].mxu0 }
 0x715   :  { %v3110_v11 = vadd.f32 %v3923_v61, %v2885_v7  ;;  %v2888_v24 = vadd.f32 %v5297_v1, %v2887_v42  ;;  %v2889_v48 = vpop.f32.mrb[15].mxu1  ;;  %v3136_v8 = vpop.f32.mrb[31].mxu0 }
 0x717   :  { %3186 = vst [vmem:[%s5506_s4 + $0x130] sm:$0xff] %v3110_v11  ;;  %v3113_v33 = vadd.f32 %v3924_v10, %v2888_v24 }
 0x719   :  { %3187 = vst [vmem:[%s5506_s4 + $0x138] sm:$0xff] %v3113_v33 }
 0x71a   :  { %v2892_v52 = vpop.f32.mrb[16].mxu1 }
 0x71b   :  { %v2893_v30 = vadd.f32 %v5297_v1, %v2892_v52  ;;  %v2894_v54 = vpop.f32.mrb[17].mxu1 }
 0x71c   :  { %v2895_v14 = vpop.f32.mrb[18].mxu1 }
 0x71d   :  { %v2896_v16 = vadd.f32 %v5297_v1, %v2895_v14  ;;  %v2897_v18 = vpop.f32.mrb[19].mxu1  ;;  %v3118_v21 = vadd.f32 %v3117_v58, %v2893_v30 }
 0x71f   :  { %3188 = vst [vmem:[%s5506_s4 + $0x140] sm:$0xff] %v3118_v21  ;;  %v3121_v59 = vadd.f32 %v3120_v12, %v2896_v16 }
 0x721   :  { %3189 = vst [vmem:[%s5506_s4 + $0x148] sm:$0xff] %v3121_v59 }
 0x722   :  { %v2900_v23 = vpop.f32.mrb[20].mxu1 }
 0x723   :  { %v2901_v0 = vadd.f32 %v5297_v1, %v2900_v23  ;;  %v2902_v27 = vpop.f32.mrb[21].mxu1 }
 0x724   :  { %v2903_v17 = vpop.f32.mrb[22].mxu1 }
 0x725   :  { %v3126_v49 = vadd.f32 %v3927_v5, %v2901_v0  ;;  %v2904_v28 = vadd.f32 %v5297_v1, %v2903_v17  ;;  %v2905_v20 = vpop.f32.mrb[23].mxu1 }
 0x727   :  { %3190 = vst [vmem:[%s5506_s4 + $0x150] sm:$0xff] %v3126_v49  ;;  %v3129_v22 = vadd.f32 %v3928_v44, %v2904_v28 }
 0x729   :  { %3191 = vst [vmem:[%s5506_s4 + $0x158] sm:$0xff] %v3129_v22 }
 0x72a   :  { %v2908_v29 = vpop.f32.mrb[24].mxu1 }
 0x72b   :  { %v2909_v35 = vadd.f32 %v5297_v1, %v2908_v29  ;;  %v2910_v36 = vpop.f32.mrb[25].mxu1 }
 0x72c   :  { %v2911_v37 = vpop.f32.mrb[26].mxu1 }
 0x72d   :  { %v2912_v2 = vadd.f32 %v5297_v1, %v2911_v37  ;;  %v2913_v32 = vpop.f32.mrb[27].mxu1  ;;  %v3134_v38 = vadd.f32 %v3133_v53, %v2909_v35 }
 0x72f   :  { %3192 = vst [vmem:[%s5506_s4 + $0x160] sm:$0xff] %v3134_v38  ;;  %v3137_v15 = vadd.f32 %v3136_v8, %v2912_v2 }
 0x731   :  { %3193 = vst [vmem:[%s5506_s4 + $0x168] sm:$0xff] %v3137_v15 }
 0x732   :  { %v2916_v40 = vpop.f32.mrb[28].mxu1 }
 0x733   :  { %v2917_v63 = vadd.f32 %v5297_v1, %v2916_v40  ;;  %v2918_v41 = vpop.f32.mrb[29].mxu1 }
 0x734   :  { %v2919_v43 = vpop.f32.mrb[30].mxu1 }
 0x735   :  { %v3142_v61 = vadd.f32 %v3931_v6, %v2917_v63  ;;  %v2920_v25 = vadd.f32 %v5297_v1, %v2919_v43  ;;  %v2921_v39 = vpop.f32.mrb[31].mxu1 }
 0x737   :  { %3194 = vst [vmem:[%s5506_s4 + $0x170] sm:$0xff] %v3142_v61  ;;  %v3145_v46 = vadd.f32 %v3932_v9, %v2920_v25 }
 0x739   :  { %3195 = vst [vmem:[%s5506_s4 + $0x178] sm:$0xff] %v3145_v46 }

</bundles_post_ra>
